<compile_context>
chip_gen: v5e
topology: v5e:2x2
jax: 0.10.0
libtpu: 0.0.40
codegen_flags: <defaults>
</compile_context>

<pallas_src>
import jax
import jax.numpy as jnp
import numpy as np
from jax.experimental import pallas as pl
from jax.experimental.pallas import tpu as pltpu

HIDDEN = 768                     # BERT hidden size (hard-coded by the module)
SEG_CH = 256                     # AttentionUNet class_number
EXT_DIM = 64                     # UNet_extractor output dim
PAIR_DIM = HIDDEN + EXT_DIM      # 832
NUM_GROUPS = PAIR_DIM // 64      # 13
NUM_CLASSES = 5
HEAD_COLS = NUM_CLASSES * 64     # 320
OUT_PAD = 128                    # lane-dense output width; logits live in columns 0..4
MAX_TP = 256                     # row-tile cap (v5e VMEM / v7x 2-core grid splitting)


# --------------------------------------------------------------------------------------
# Fused per-pair kernel (similarity -> seg pixel -> extractor -> grouped bilinear head).
# --------------------------------------------------------------------------------------
def fused_pair_kernel(e1_ref, e2_ref,
                      wbil_ref, bbil_ref,
                      wseg_ref, bseg_ref,
                      wext_ref, bext_ref,
                      whead_ref, bhead_ref, summat_ref,
                      out_ref):
    e1_bf = e1_ref[...]                                        # [TP, 768] bf16
    e2_bf = e2_ref[...]
    e1 = e1_bf.astype(jnp.float32)                             # upcast once for VPU math
    e2 = e2_bf.astype(jnp.float32)

    # --- similarity values at the gathered (h, t) positions -------------------------
    dot_p = jnp.sum(e1 * e2, axis=-1, keepdims=True)           # DotProductMatrixAttention
    n1 = jnp.sqrt(jnp.sum(e1 * e1, axis=-1, keepdims=True))
    n2 = jnp.sqrt(jnp.sum(e2 * e2, axis=-1, keepdims=True))
    # CosineMatrixAttention: (e1/(|e1|+eps)) . (e2/(|e2|+eps)) == dot / ((|e1|+eps)(|e2|+eps))
    cos_p = dot_p / ((n1 + 1e-13) * (n2 + 1e-13))              # exact divide (finite on pads)

    # BilinearMatrixAttention(768, 768): e1 @ W @ e2 + bias  (bf16 MXU operands, f32 acc)
    xw = jnp.dot(e1_bf, wbil_ref[...], preferred_element_type=jnp.float32)     # [TP, 768]
    bil_p = jnp.sum(xw * e2, axis=-1, keepdims=True) + bbil_ref[0]

    # --- seg-net stand-in (1x1 conv 3->256 + ReLU) evaluated only at the pairs ------
    w_seg = wseg_ref[...]                                      # [3, 256] rows: dot/cos/bil
    ht0 = jnp.maximum(dot_p * w_seg[0:1, :]
                      + cos_p * w_seg[1:2, :]
                      + bil_p * w_seg[2:3, :]
                      + bseg_ref[...], 0.0)                    # [TP, 256] f32

    # --- UNet_extractor + tanh (bf16 MXU, f32 accumulate) ----------------------------
    ht1 = jnp.tanh(jnp.dot(ht0.astype(jnp.bfloat16), wext_ref[...],
                           preferred_element_type=jnp.float32) + bext_ref[...])  # [TP, 64]
    ht1_bf = ht1.astype(jnp.bfloat16)

    hs = jnp.tanh(e1).astype(jnp.bfloat16)                     # [TP, 768] bf16
    ts = jnp.tanh(e2).astype(jnp.bfloat16)                     # [TP, 768] bf16

    # --- grouped bilinear classifier: 13 bf16 matmuls [TP,64]@[64,320] ---------------
    acc = jnp.zeros((e1.shape[0], HEAD_COLS), jnp.float32)
    for g in range(NUM_GROUPS):
        if g < NUM_GROUPS - 1:
            hs_g = hs[:, 64 * g:64 * (g + 1)]
            ts_g = ts[:, 64 * g:64 * (g + 1)]
        else:
            hs_g = ht1_bf
            ts_g = ht1_bf
        term = jnp.dot(hs_g, whead_ref[g], preferred_element_type=jnp.float32)   # [TP, 320]
        acc = acc + term * jnp.tile(ts_g, (1, NUM_CLASSES))    # bf16 tile, f32 accumulate

    # block-sum each 64-wide class chunk with one lane-dense [TP,320]@[320,128] matmul
    out_ref[...] = (jnp.dot(acc, summat_ref[...], preferred_element_type=jnp.float32)
                    + bhead_ref[...])


def run_fused(e1, e2, params):
    P = e1.shape[0]
    # bf16 inputs -> keep the row tile a multiple of 16; cap at 256 so the working set fits
    # v5e's default scoped VMEM and the grid can split across v7x's two TensorCores.
    TP = min(MAX_TP, ((P + 15) // 16) * 16)
    Ppad = ((P + TP - 1) // TP) * TP
    e1 = e1.astype(jnp.bfloat16)
    e2 = e2.astype(jnp.bfloat16)
    if Ppad != P:
        e1 = jnp.pad(e1, ((0, Ppad - P), (0, 0)))
        e2 = jnp.pad(e2, ((0, Ppad - P), (0, 0)))

    out = pl.pallas_call(
        fused_pair_kernel,
        out_shape=jax.ShapeDtypeStruct((Ppad, OUT_PAD), jnp.float32),
        grid=(Ppad // TP,),
        in_specs=[
            pl.BlockSpec((TP, HIDDEN), lambda i: (i, 0)),
            pl.BlockSpec((TP, HIDDEN), lambda i: (i, 0)),
            pl.BlockSpec((HIDDEN, HIDDEN), lambda i: (0, 0)),
            pl.BlockSpec(memory_space=pltpu.MemorySpace.SMEM),
            pl.BlockSpec((3, SEG_CH), lambda i: (0, 0)),
            pl.BlockSpec((1, SEG_CH), lambda i: (0, 0)),
            pl.BlockSpec((SEG_CH, EXT_DIM), lambda i: (0, 0)),
            pl.BlockSpec((1, EXT_DIM), lambda i: (0, 0)),
            pl.BlockSpec((NUM_GROUPS, 64, HEAD_COLS), lambda i: (0, 0, 0)),
            pl.BlockSpec((1, OUT_PAD), lambda i: (0, 0)),
            pl.BlockSpec((HEAD_COLS, OUT_PAD), lambda i: (0, 0)),
        ],
        out_specs=pl.BlockSpec((TP, OUT_PAD), lambda i: (i, 0)),
        compiler_params=pltpu.CompilerParams(dimension_semantics=("parallel",)),
    )(e1, e2,
      params["w_bil_attn"], params["b_bil_attn"],
      params["w_seg"], params["b_seg"],
      params["w_ext"], params["b_ext"],
      params["whead_packed"], params["b_head_pad"], params["sum_mat"])
    return out[:P, :NUM_CLASSES]


# --------------------------------------------------------------------------------------
# Host-side glue: entity-mention averaging (reproduces the PyTorch loops, including the
# quirk where the outer accumulator is initialised with the last mention's average).
# --------------------------------------------------------------------------------------
def compute_entity_embs(out_all, drug_pos_article):
    ents = []
    for mentions in drug_pos_article:
        mention_avgs = []
        curr = jnp.zeros((HIDDEN,), jnp.float32)
        for mention in mentions:
            count = mention[0]                       # mention = [count, pos_1, ..., pos_count]
            toks = jnp.stack([out_all[mention[k]] for k in range(1, count + 1)], axis=0)
            curr = jnp.sum(toks, axis=0) / (len(mention) - 1)
            mention_avgs.append(curr)
        for m in mention_avgs:                       # starts from the *last* mention average (torch quirk)
            curr = curr + m
        curr = curr / len(mentions)
        ents.append(curr)
    return jnp.stack(ents, axis=0)                   # [num_entities, 768]


def _gather_pairs(out_all, drug_pos_article, hts_article):
    entity_emb = compute_entity_embs(out_all, drug_pos_article)          # [E, 768]
    hts_arr = jnp.asarray(hts_article, dtype=jnp.int32)                  # [P, 2]
    return entity_emb[hts_arr[:, 0]], entity_emb[hts_arr[:, 1]]


def forward(out_all, drug_pos_article, hts_article, params):
    """Single-document forward (matches the PyTorch per-article forward)."""
    e1, e2 = _gather_pairs(out_all, drug_pos_article, hts_article)       # [P, 768] each
    return run_fused(e1, e2, params)                                     # [P, 5]


def forward_batched(docs, params):
    """Batch the (h, t) pairs of many documents into ONE fused pallas_call so the weight
    DMA (~1.7 MiB bf16) and per-call/step overhead are amortized over all pairs."""
    e1_list, e2_list, counts = [], [], []
    for out_all, drug_pos_article, hts_article in docs:
        e1, e2 = _gather_pairs(out_all, drug_pos_article, hts_article)
        e1_list.append(e1)
        e2_list.append(e2)
        counts.append(len(hts_article))
    logits = run_fused(jnp.concatenate(e1_list, axis=0),
                       jnp.concatenate(e2_list, axis=0), params)
    splits = [int(x) for x in np.cumsum(counts)[:-1]]
    return jnp.split(logits, splits, axis=0) if splits else [logits]


def init_params(key):
    ks = jax.random.split(key, 6)
    # BilinearMatrixAttention(768, 768): stored bf16 for the MXU / halved DMA, f32 accumulation.
    w_bil_attn = (0.02 * jax.random.normal(ks[0], (HIDDEN, HIDDEN), jnp.float32)
                  ).astype(jnp.bfloat16)
    b_bil_attn = jnp.asarray([0.1], jnp.float32)
    w_seg = 0.5 * jax.random.normal(ks[1], (3, SEG_CH), jnp.float32)
    b_seg = 0.01 * jax.random.normal(ks[2], (1, SEG_CH), jnp.float32)
    # UNet_extractor: nn.Linear(256, 64), stored bf16 for the MXU.
    w_ext = (0.05 * jax.random.normal(ks[3], (SEG_CH, EXT_DIM), jnp.float32)
             ).astype(jnp.bfloat16)
    b_ext = 0.01 * jax.random.normal(ks[4], (1, EXT_DIM), jnp.float32)
    # nn.Linear(832*64, 5): weight [5, 53248]; repack to [13, 64, 5*64] with
    # whead[g, i, c*64+j] = W[c, g*4096 + i*64 + j]   (stored bf16 for the MXU)
    w_head = 0.01 * jax.random.normal(ks[5], (NUM_CLASSES, PAIR_DIM * 64), jnp.float32)
    whead_packed = (w_head.reshape(NUM_CLASSES, NUM_GROUPS, 64, 64)
                    .transpose(1, 2, 0, 3)
                    .reshape(NUM_GROUPS, 64, NUM_CLASSES * 64)).astype(jnp.bfloat16)
    # Head bias padded to a lane-dense 128-wide row (only cols 0..4 are real).
    b_head_pad = jnp.zeros((1, OUT_PAD), jnp.float32).at[0, :NUM_CLASSES].set(0.05)
    # 0/1 block-sum matrix, padded to 128 lane-dense columns: sum_mat[c*64+j, c] = 1.
    sm = np.zeros((HEAD_COLS, OUT_PAD), np.float32)
    for c in range(NUM_CLASSES):
        sm[c * 64:(c + 1) * 64, c] = 1.0
    sum_mat = jnp.asarray(sm)
    return dict(w_bil_attn=w_bil_attn, b_bil_attn=b_bil_attn,
                w_seg=w_seg, b_seg=b_seg, w_ext=w_ext, b_ext=b_ext,
                whead_packed=whead_packed, b_head_pad=b_head_pad, sum_mat=sum_mat)


if __name__ == "__main__":
    key = jax.random.PRNGKey(0)
    k_tok_a, k_tok_b, k_par = jax.random.split(key, 3)

    # Synthetic BioBERT token embeddings (stand-in for out_0..out_4): 5 chunks x 64 tokens.
    NUM_TOK = 5 * 64
    out_all_a = jax.random.normal(k_tok_a, (NUM_TOK, HIDDEN), jnp.float32)
    out_all_b = jax.random.normal(k_tok_b, (NUM_TOK, HIDDEN), jnp.float32)

    # Document A: 6 entities, 8 head/tail pairs.
    drug_pos_a = [
        [[3, 1, 5, 9], [2, 14, 20]],
        [[2, 33, 40]],
        [[1, 57], [3, 60, 61, 62]],
        [[2, 80, 81], [2, 90, 100], [1, 110]],
        [[4, 120, 121, 122, 123]],
        [[2, 150, 151], [1, 200]],
    ]
    hts_a = [(0, 1), (0, 2), (1, 3), (2, 4), (3, 5), (4, 0), (5, 1), (2, 3)]

    # Document B: 4 entities, 6 head/tail pairs (used for the batched-pairs path).
    drug_pos_b = [
        [[2, 4, 8], [1, 30]],
        [[3, 70, 71, 72]],
        [[1, 101], [2, 140, 141]],
        [[2, 250, 251]],
    ]
    hts_b = [(0, 1), (1, 2), (2, 3), (3, 0), (0, 2), (1, 3)]

    params = init_params(k_par)

    # Single-document forward (matches the module's per-article forward).
    logits_a = forward(out_all_a, drug_pos_a, hts_a, params)
    logits_a = jax.block_until_ready(logits_a)

    # Pairs from several documents fused into one pallas_call (weight-DMA amortization).
    logits_list = forward_batched([(out_all_a, drug_pos_a, hts_a),
                                   (out_all_b, drug_pos_b, hts_b)], params)
    logits_list = jax.block_until_ready(logits_list)

    assert logits_a.shape == (len(hts_a), NUM_CLASSES)
    assert logits_list[0].shape == (len(hts_a), NUM_CLASSES)
    assert logits_list[1].shape == (len(hts_b), NUM_CLASSES)
    assert bool(jnp.all(jnp.isfinite(logits_a)))
    assert all(bool(jnp.all(jnp.isfinite(l))) for l in logits_list)
    assert np.allclose(np.asarray(logits_a), np.asarray(logits_list[0]),
                       rtol=1e-3, atol=1e-3)
    print("KERNEL_OK")
</pallas_src>

<mosaic_0001>
module attributes {stable_mosaic.version = 11 : i64} {
  func.func @fused_pair_kernel(%arg0: i32, %arg1: memref<16x768xbf16, #tpu.memory_space<vmem>>, %arg2: memref<16x768xbf16, #tpu.memory_space<vmem>>, %arg3: memref<768x768xbf16, #tpu.memory_space<vmem>>, %arg4: memref<1xf32, #tpu.memory_space<smem>>, %arg5: memref<3x256xf32, #tpu.memory_space<vmem>>, %arg6: memref<1x256xf32, #tpu.memory_space<vmem>>, %arg7: memref<256x64xbf16, #tpu.memory_space<vmem>>, %arg8: memref<1x64xf32, #tpu.memory_space<vmem>>, %arg9: memref<13x64x320xbf16, #tpu.memory_space<vmem>>, %arg10: memref<1x128xf32, #tpu.memory_space<vmem>>, %arg11: memref<320x128xf32, #tpu.memory_space<vmem>>, %arg12: memref<16x128xf32, #tpu.memory_space<vmem>>) attributes {dimension_semantics = [#tpu.dimension_semantics<parallel>], iteration_bounds = array<i64: 1>, scalar_prefetch = 0 : i64, scratch_operands = 0 : i64, tpu.core_type = #tpu.core_type<tc>, window_params = [{transform_indices = @transform_0, window_bounds = array<i64: 16, 768>}, {transform_indices = @transform_1, window_bounds = array<i64: 16, 768>}, {pipeline_mode = #tpu.pipeline_mode<synchronous>, transform_indices = @transform_2, window_bounds = array<i64: 768, 768>}, {transform_indices = @transform_3, window_bounds = array<i64: 1>}, {pipeline_mode = #tpu.pipeline_mode<synchronous>, transform_indices = @transform_4, window_bounds = array<i64: 3, 256>}, {pipeline_mode = #tpu.pipeline_mode<synchronous>, transform_indices = @transform_5, window_bounds = array<i64: 1, 256>}, {pipeline_mode = #tpu.pipeline_mode<synchronous>, transform_indices = @transform_6, window_bounds = array<i64: 256, 64>}, {pipeline_mode = #tpu.pipeline_mode<synchronous>, transform_indices = @transform_7, window_bounds = array<i64: 1, 64>}, {pipeline_mode = #tpu.pipeline_mode<synchronous>, transform_indices = @transform_8, window_bounds = array<i64: 13, 64, 320>}, {pipeline_mode = #tpu.pipeline_mode<synchronous>, transform_indices = @transform_9, window_bounds = array<i64: 1, 128>}, {pipeline_mode = #tpu.pipeline_mode<synchronous>, transform_indices = @transform_10, window_bounds = array<i64: 320, 128>}, {transform_indices = @transform_11, window_bounds = array<i64: 16, 128>}]} {
    %c0 = arith.constant 0 : index
    %c0_0 = arith.constant 0 : index
    %0 = vector.load %arg1[%c0, %c0_0] : memref<16x768xbf16, #tpu.memory_space<vmem>>, vector<16x768xbf16>
    %c0_1 = arith.constant 0 : index
    %c0_2 = arith.constant 0 : index
    %1 = vector.load %arg2[%c0_1, %c0_2] : memref<16x768xbf16, #tpu.memory_space<vmem>>, vector<16x768xbf16>
    %2 = arith.extf %0 : vector<16x768xbf16> to vector<16x768xf32>
    %3 = arith.extf %1 : vector<16x768xbf16> to vector<16x768xf32>
    %4 = arith.mulf %2, %3 : vector<16x768xf32>
    %cst = arith.constant dense<0.000000e+00> : vector<16xf32>
    %5 = vector.multi_reduction <add>, %4, %cst [1] : vector<16x768xf32> to vector<16xf32>
    %6 = vector.shape_cast %5 : vector<16xf32> to vector<16x1xf32>
    %7 = arith.mulf %2, %2 : vector<16x768xf32>
    %cst_3 = arith.constant dense<0.000000e+00> : vector<16xf32>
    %8 = vector.multi_reduction <add>, %7, %cst_3 [1] : vector<16x768xf32> to vector<16xf32>
    %9 = vector.shape_cast %8 : vector<16xf32> to vector<16x1xf32>
    %10 = math.sqrt %9 : vector<16x1xf32>
    %11 = arith.mulf %3, %3 : vector<16x768xf32>
    %cst_4 = arith.constant dense<0.000000e+00> : vector<16xf32>
    %12 = vector.multi_reduction <add>, %11, %cst_4 [1] : vector<16x768xf32> to vector<16xf32>
    %13 = vector.shape_cast %12 : vector<16xf32> to vector<16x1xf32>
    %14 = math.sqrt %13 : vector<16x1xf32>
    %cst_5 = arith.constant 9.99999982E-14 : f32
    %15 = vector.broadcast %cst_5 : f32 to vector<16x1xf32>
    %16 = arith.addf %10, %15 : vector<16x1xf32>
    %cst_6 = arith.constant 9.99999982E-14 : f32
    %17 = vector.broadcast %cst_6 : f32 to vector<16x1xf32>
    %18 = arith.addf %14, %17 : vector<16x1xf32>
    %19 = arith.mulf %16, %18 : vector<16x1xf32>
    %20 = arith.divf %6, %19 : vector<16x1xf32>
    %c0_7 = arith.constant 0 : index
    %c0_8 = arith.constant 0 : index
    %21 = vector.load %arg3[%c0_7, %c0_8] : memref<768x768xbf16, #tpu.memory_space<vmem>>, vector<768x768xbf16>
    %cst_9 = arith.constant dense<0.000000e+00> : vector<16x768xf32>
    %22 = tpu.matmul %0, %21, %cst_9 {dimension_numbers = #tpu.dot_dimension_numbers<[1], [0], [0], [1], [0, 0, 1, 1], [], []>} : vector<16x768xbf16>, vector<768x768xbf16>, vector<16x768xf32> -> vector<16x768xf32>
    %23 = arith.mulf %22, %3 : vector<16x768xf32>
    %cst_10 = arith.constant dense<0.000000e+00> : vector<16xf32>
    %24 = vector.multi_reduction <add>, %23, %cst_10 [1] : vector<16x768xf32> to vector<16xf32>
    %25 = vector.shape_cast %24 : vector<16xf32> to vector<16x1xf32>
    %c0_11 = arith.constant 0 : index
    %26 = memref.load %arg4[%c0_11] : memref<1xf32, #tpu.memory_space<smem>>
    %27 = vector.broadcast %26 : f32 to vector<16x1xf32>
    %28 = arith.addf %25, %27 : vector<16x1xf32>
    %c0_12 = arith.constant 0 : index
    %c0_13 = arith.constant 0 : index
    %29 = vector.load %arg5[%c0_12, %c0_13] : memref<3x256xf32, #tpu.memory_space<vmem>>, vector<3x256xf32>
    %30 = vector.extract_strided_slice %29 {offsets = [0, 0], sizes = [1, 256], strides = [1, 1]} : vector<3x256xf32> to vector<1x256xf32>
    %31 = vector.broadcast %6 : vector<16x1xf32> to vector<16x256xf32>
    %32 = vector.broadcast %30 : vector<1x256xf32> to vector<16x256xf32>
    %33 = arith.mulf %31, %32 : vector<16x256xf32>
    %34 = vector.extract_strided_slice %29 {offsets = [1, 0], sizes = [1, 256], strides = [1, 1]} : vector<3x256xf32> to vector<1x256xf32>
    %35 = vector.broadcast %20 : vector<16x1xf32> to vector<16x256xf32>
    %36 = vector.broadcast %34 : vector<1x256xf32> to vector<16x256xf32>
    %37 = arith.mulf %35, %36 : vector<16x256xf32>
    %38 = arith.addf %33, %37 : vector<16x256xf32>
    %39 = vector.extract_strided_slice %29 {offsets = [2, 0], sizes = [1, 256], strides = [1, 1]} : vector<3x256xf32> to vector<1x256xf32>
    %40 = vector.broadcast %28 : vector<16x1xf32> to vector<16x256xf32>
    %41 = vector.broadcast %39 : vector<1x256xf32> to vector<16x256xf32>
    %42 = arith.mulf %40, %41 : vector<16x256xf32>
    %43 = arith.addf %38, %42 : vector<16x256xf32>
    %c0_14 = arith.constant 0 : index
    %c0_15 = arith.constant 0 : index
    %44 = vector.load %arg6[%c0_14, %c0_15] : memref<1x256xf32, #tpu.memory_space<vmem>>, vector<1x256xf32>
    %45 = vector.broadcast %44 : vector<1x256xf32> to vector<16x256xf32>
    %46 = arith.addf %43, %45 : vector<16x256xf32>
    %cst_16 = arith.constant 0.000000e+00 : f32
    %47 = vector.broadcast %cst_16 : f32 to vector<16x256xf32>
    %48 = arith.maximumf %46, %47 : vector<16x256xf32>
    %49 = arith.truncf %48 : vector<16x256xf32> to vector<16x256xbf16>
    %c0_17 = arith.constant 0 : index
    %c0_18 = arith.constant 0 : index
    %50 = vector.load %arg7[%c0_17, %c0_18] : memref<256x64xbf16, #tpu.memory_space<vmem>>, vector<256x64xbf16>
    %cst_19 = arith.constant dense<0.000000e+00> : vector<16x64xf32>
    %51 = tpu.matmul %49, %50, %cst_19 {dimension_numbers = #tpu.dot_dimension_numbers<[1], [0], [0], [1], [0, 0, 1, 1], [], []>} : vector<16x256xbf16>, vector<256x64xbf16>, vector<16x64xf32> -> vector<16x64xf32>
    %c0_20 = arith.constant 0 : index
    %c0_21 = arith.constant 0 : index
    %52 = vector.load %arg8[%c0_20, %c0_21] : memref<1x64xf32, #tpu.memory_space<vmem>>, vector<1x64xf32>
    %53 = vector.broadcast %52 : vector<1x64xf32> to vector<16x64xf32>
    %54 = arith.addf %51, %53 : vector<16x64xf32>
    %55 = math.tanh %54 : vector<16x64xf32>
    %56 = arith.truncf %55 : vector<16x64xf32> to vector<16x64xbf16>
    %57 = math.tanh %2 : vector<16x768xf32>
    %58 = arith.truncf %57 : vector<16x768xf32> to vector<16x768xbf16>
    %59 = math.tanh %3 : vector<16x768xf32>
    %60 = arith.truncf %59 : vector<16x768xf32> to vector<16x768xbf16>
    %cst_22 = arith.constant 0.000000e+00 : f32
    %61 = vector.broadcast %cst_22 : f32 to vector<16x320xf32>
    %62 = vector.extract_strided_slice %58 {offsets = [0, 0], sizes = [16, 64], strides = [1, 1]} : vector<16x768xbf16> to vector<16x64xbf16>
    %63 = vector.extract_strided_slice %60 {offsets = [0, 0], sizes = [16, 64], strides = [1, 1]} : vector<16x768xbf16> to vector<16x64xbf16>
    %c0_23 = arith.constant 0 : index
    %c0_24 = arith.constant 0 : index
    %c0_25 = arith.constant 0 : index
    %64 = vector.load %arg9[%c0_23, %c0_24, %c0_25] : memref<13x64x320xbf16, #tpu.memory_space<vmem>>, vector<1x64x320xbf16>
    %65 = vector.shape_cast %64 : vector<1x64x320xbf16> to vector<64x320xbf16>
    %cst_26 = arith.constant dense<0.000000e+00> : vector<16x320xf32>
    %66 = tpu.matmul %62, %65, %cst_26 {dimension_numbers = #tpu.dot_dimension_numbers<[1], [0], [0], [1], [0, 0, 1, 1], [], []>} : vector<16x64xbf16>, vector<64x320xbf16>, vector<16x320xf32> -> vector<16x320xf32>
    %67 = tpu.concatenate %63, %63, %63, %63, %63 in 1 : vector<16x64xbf16>, vector<16x64xbf16>, vector<16x64xbf16>, vector<16x64xbf16>, vector<16x64xbf16> -> vector<16x320xbf16>
    %68 = arith.extf %67 : vector<16x320xbf16> to vector<16x320xf32>
    %69 = arith.mulf %66, %68 : vector<16x320xf32>
    %70 = arith.addf %61, %69 : vector<16x320xf32>
    %71 = vector.extract_strided_slice %58 {offsets = [0, 64], sizes = [16, 64], strides = [1, 1]} : vector<16x768xbf16> to vector<16x64xbf16>
    %72 = vector.extract_strided_slice %60 {offsets = [0, 64], sizes = [16, 64], strides = [1, 1]} : vector<16x768xbf16> to vector<16x64xbf16>
    %c1 = arith.constant 1 : index
    %c0_27 = arith.constant 0 : index
    %c0_28 = arith.constant 0 : index
    %73 = vector.load %arg9[%c1, %c0_27, %c0_28] : memref<13x64x320xbf16, #tpu.memory_space<vmem>>, vector<1x64x320xbf16>
    %74 = vector.shape_cast %73 : vector<1x64x320xbf16> to vector<64x320xbf16>
    %cst_29 = arith.constant dense<0.000000e+00> : vector<16x320xf32>
    %75 = tpu.matmul %71, %74, %cst_29 {dimension_numbers = #tpu.dot_dimension_numbers<[1], [0], [0], [1], [0, 0, 1, 1], [], []>} : vector<16x64xbf16>, vector<64x320xbf16>, vector<16x320xf32> -> vector<16x320xf32>
    %76 = tpu.concatenate %72, %72, %72, %72, %72 in 1 : vector<16x64xbf16>, vector<16x64xbf16>, vector<16x64xbf16>, vector<16x64xbf16>, vector<16x64xbf16> -> vector<16x320xbf16>
    %77 = arith.extf %76 : vector<16x320xbf16> to vector<16x320xf32>
    %78 = arith.mulf %75, %77 : vector<16x320xf32>
    %79 = arith.addf %70, %78 : vector<16x320xf32>
    %80 = vector.extract_strided_slice %58 {offsets = [0, 128], sizes = [16, 64], strides = [1, 1]} : vector<16x768xbf16> to vector<16x64xbf16>
    %81 = vector.extract_strided_slice %60 {offsets = [0, 128], sizes = [16, 64], strides = [1, 1]} : vector<16x768xbf16> to vector<16x64xbf16>
    %c2 = arith.constant 2 : index
    %c0_30 = arith.constant 0 : index
    %c0_31 = arith.constant 0 : index
    %82 = vector.load %arg9[%c2, %c0_30, %c0_31] : memref<13x64x320xbf16, #tpu.memory_space<vmem>>, vector<1x64x320xbf16>
    %83 = vector.shape_cast %82 : vector<1x64x320xbf16> to vector<64x320xbf16>
    %cst_32 = arith.constant dense<0.000000e+00> : vector<16x320xf32>
    %84 = tpu.matmul %80, %83, %cst_32 {dimension_numbers = #tpu.dot_dimension_numbers<[1], [0], [0], [1], [0, 0, 1, 1], [], []>} : vector<16x64xbf16>, vector<64x320xbf16>, vector<16x320xf32> -> vector<16x320xf32>
    %85 = tpu.concatenate %81, %81, %81, %81, %81 in 1 : vector<16x64xbf16>, vector<16x64xbf16>, vector<16x64xbf16>, vector<16x64xbf16>, vector<16x64xbf16> -> vector<16x320xbf16>
    %86 = arith.extf %85 : vector<16x320xbf16> to vector<16x320xf32>
    %87 = arith.mulf %84, %86 : vector<16x320xf32>
    %88 = arith.addf %79, %87 : vector<16x320xf32>
    %89 = vector.extract_strided_slice %58 {offsets = [0, 192], sizes = [16, 64], strides = [1, 1]} : vector<16x768xbf16> to vector<16x64xbf16>
    %90 = vector.extract_strided_slice %60 {offsets = [0, 192], sizes = [16, 64], strides = [1, 1]} : vector<16x768xbf16> to vector<16x64xbf16>
    %c3 = arith.constant 3 : index
    %c0_33 = arith.constant 0 : index
    %c0_34 = arith.constant 0 : index
    %91 = vector.load %arg9[%c3, %c0_33, %c0_34] : memref<13x64x320xbf16, #tpu.memory_space<vmem>>, vector<1x64x320xbf16>
    %92 = vector.shape_cast %91 : vector<1x64x320xbf16> to vector<64x320xbf16>
    %cst_35 = arith.constant dense<0.000000e+00> : vector<16x320xf32>
    %93 = tpu.matmul %89, %92, %cst_35 {dimension_numbers = #tpu.dot_dimension_numbers<[1], [0], [0], [1], [0, 0, 1, 1], [], []>} : vector<16x64xbf16>, vector<64x320xbf16>, vector<16x320xf32> -> vector<16x320xf32>
    %94 = tpu.concatenate %90, %90, %90, %90, %90 in 1 : vector<16x64xbf16>, vector<16x64xbf16>, vector<16x64xbf16>, vector<16x64xbf16>, vector<16x64xbf16> -> vector<16x320xbf16>
    %95 = arith.extf %94 : vector<16x320xbf16> to vector<16x320xf32>
    %96 = arith.mulf %93, %95 : vector<16x320xf32>
    %97 = arith.addf %88, %96 : vector<16x320xf32>
    %98 = vector.extract_strided_slice %58 {offsets = [0, 256], sizes = [16, 64], strides = [1, 1]} : vector<16x768xbf16> to vector<16x64xbf16>
    %99 = vector.extract_strided_slice %60 {offsets = [0, 256], sizes = [16, 64], strides = [1, 1]} : vector<16x768xbf16> to vector<16x64xbf16>
    %c4 = arith.constant 4 : index
    %c0_36 = arith.constant 0 : index
    %c0_37 = arith.constant 0 : index
    %100 = vector.load %arg9[%c4, %c0_36, %c0_37] : memref<13x64x320xbf16, #tpu.memory_space<vmem>>, vector<1x64x320xbf16>
    %101 = vector.shape_cast %100 : vector<1x64x320xbf16> to vector<64x320xbf16>
    %cst_38 = arith.constant dense<0.000000e+00> : vector<16x320xf32>
    %102 = tpu.matmul %98, %101, %cst_38 {dimension_numbers = #tpu.dot_dimension_numbers<[1], [0], [0], [1], [0, 0, 1, 1], [], []>} : vector<16x64xbf16>, vector<64x320xbf16>, vector<16x320xf32> -> vector<16x320xf32>
    %103 = tpu.concatenate %99, %99, %99, %99, %99 in 1 : vector<16x64xbf16>, vector<16x64xbf16>, vector<16x64xbf16>, vector<16x64xbf16>, vector<16x64xbf16> -> vector<16x320xbf16>
    %104 = arith.extf %103 : vector<16x320xbf16> to vector<16x320xf32>
    %105 = arith.mulf %102, %104 : vector<16x320xf32>
    %106 = arith.addf %97, %105 : vector<16x320xf32>
    %107 = vector.extract_strided_slice %58 {offsets = [0, 320], sizes = [16, 64], strides = [1, 1]} : vector<16x768xbf16> to vector<16x64xbf16>
    %108 = vector.extract_strided_slice %60 {offsets = [0, 320], sizes = [16, 64], strides = [1, 1]} : vector<16x768xbf16> to vector<16x64xbf16>
    %c5 = arith.constant 5 : index
    %c0_39 = arith.constant 0 : index
    %c0_40 = arith.constant 0 : index
    %109 = vector.load %arg9[%c5, %c0_39, %c0_40] : memref<13x64x320xbf16, #tpu.memory_space<vmem>>, vector<1x64x320xbf16>
    %110 = vector.shape_cast %109 : vector<1x64x320xbf16> to vector<64x320xbf16>
    %cst_41 = arith.constant dense<0.000000e+00> : vector<16x320xf32>
    %111 = tpu.matmul %107, %110, %cst_41 {dimension_numbers = #tpu.dot_dimension_numbers<[1], [0], [0], [1], [0, 0, 1, 1], [], []>} : vector<16x64xbf16>, vector<64x320xbf16>, vector<16x320xf32> -> vector<16x320xf32>
    %112 = tpu.concatenate %108, %108, %108, %108, %108 in 1 : vector<16x64xbf16>, vector<16x64xbf16>, vector<16x64xbf16>, vector<16x64xbf16>, vector<16x64xbf16> -> vector<16x320xbf16>
    %113 = arith.extf %112 : vector<16x320xbf16> to vector<16x320xf32>
    %114 = arith.mulf %111, %113 : vector<16x320xf32>
    %115 = arith.addf %106, %114 : vector<16x320xf32>
    %116 = vector.extract_strided_slice %58 {offsets = [0, 384], sizes = [16, 64], strides = [1, 1]} : vector<16x768xbf16> to vector<16x64xbf16>
    %117 = vector.extract_strided_slice %60 {offsets = [0, 384], sizes = [16, 64], strides = [1, 1]} : vector<16x768xbf16> to vector<16x64xbf16>
    %c6 = arith.constant 6 : index
    %c0_42 = arith.constant 0 : index
    %c0_43 = arith.constant 0 : index
    %118 = vector.load %arg9[%c6, %c0_42, %c0_43] : memref<13x64x320xbf16, #tpu.memory_space<vmem>>, vector<1x64x320xbf16>
    %119 = vector.shape_cast %118 : vector<1x64x320xbf16> to vector<64x320xbf16>
    %cst_44 = arith.constant dense<0.000000e+00> : vector<16x320xf32>
    %120 = tpu.matmul %116, %119, %cst_44 {dimension_numbers = #tpu.dot_dimension_numbers<[1], [0], [0], [1], [0, 0, 1, 1], [], []>} : vector<16x64xbf16>, vector<64x320xbf16>, vector<16x320xf32> -> vector<16x320xf32>
    %121 = tpu.concatenate %117, %117, %117, %117, %117 in 1 : vector<16x64xbf16>, vector<16x64xbf16>, vector<16x64xbf16>, vector<16x64xbf16>, vector<16x64xbf16> -> vector<16x320xbf16>
    %122 = arith.extf %121 : vector<16x320xbf16> to vector<16x320xf32>
    %123 = arith.mulf %120, %122 : vector<16x320xf32>
    %124 = arith.addf %115, %123 : vector<16x320xf32>
    %125 = vector.extract_strided_slice %58 {offsets = [0, 448], sizes = [16, 64], strides = [1, 1]} : vector<16x768xbf16> to vector<16x64xbf16>
    %126 = vector.extract_strided_slice %60 {offsets = [0, 448], sizes = [16, 64], strides = [1, 1]} : vector<16x768xbf16> to vector<16x64xbf16>
    %c7 = arith.constant 7 : index
    %c0_45 = arith.constant 0 : index
    %c0_46 = arith.constant 0 : index
    %127 = vector.load %arg9[%c7, %c0_45, %c0_46] : memref<13x64x320xbf16, #tpu.memory_space<vmem>>, vector<1x64x320xbf16>
    %128 = vector.shape_cast %127 : vector<1x64x320xbf16> to vector<64x320xbf16>
    %cst_47 = arith.constant dense<0.000000e+00> : vector<16x320xf32>
    %129 = tpu.matmul %125, %128, %cst_47 {dimension_numbers = #tpu.dot_dimension_numbers<[1], [0], [0], [1], [0, 0, 1, 1], [], []>} : vector<16x64xbf16>, vector<64x320xbf16>, vector<16x320xf32> -> vector<16x320xf32>
    %130 = tpu.concatenate %126, %126, %126, %126, %126 in 1 : vector<16x64xbf16>, vector<16x64xbf16>, vector<16x64xbf16>, vector<16x64xbf16>, vector<16x64xbf16> -> vector<16x320xbf16>
    %131 = arith.extf %130 : vector<16x320xbf16> to vector<16x320xf32>
    %132 = arith.mulf %129, %131 : vector<16x320xf32>
    %133 = arith.addf %124, %132 : vector<16x320xf32>
    %134 = vector.extract_strided_slice %58 {offsets = [0, 512], sizes = [16, 64], strides = [1, 1]} : vector<16x768xbf16> to vector<16x64xbf16>
    %135 = vector.extract_strided_slice %60 {offsets = [0, 512], sizes = [16, 64], strides = [1, 1]} : vector<16x768xbf16> to vector<16x64xbf16>
    %c8 = arith.constant 8 : index
    %c0_48 = arith.constant 0 : index
    %c0_49 = arith.constant 0 : index
    %136 = vector.load %arg9[%c8, %c0_48, %c0_49] : memref<13x64x320xbf16, #tpu.memory_space<vmem>>, vector<1x64x320xbf16>
    %137 = vector.shape_cast %136 : vector<1x64x320xbf16> to vector<64x320xbf16>
    %cst_50 = arith.constant dense<0.000000e+00> : vector<16x320xf32>
    %138 = tpu.matmul %134, %137, %cst_50 {dimension_numbers = #tpu.dot_dimension_numbers<[1], [0], [0], [1], [0, 0, 1, 1], [], []>} : vector<16x64xbf16>, vector<64x320xbf16>, vector<16x320xf32> -> vector<16x320xf32>
    %139 = tpu.concatenate %135, %135, %135, %135, %135 in 1 : vector<16x64xbf16>, vector<16x64xbf16>, vector<16x64xbf16>, vector<16x64xbf16>, vector<16x64xbf16> -> vector<16x320xbf16>
    %140 = arith.extf %139 : vector<16x320xbf16> to vector<16x320xf32>
    %141 = arith.mulf %138, %140 : vector<16x320xf32>
    %142 = arith.addf %133, %141 : vector<16x320xf32>
    %143 = vector.extract_strided_slice %58 {offsets = [0, 576], sizes = [16, 64], strides = [1, 1]} : vector<16x768xbf16> to vector<16x64xbf16>
    %144 = vector.extract_strided_slice %60 {offsets = [0, 576], sizes = [16, 64], strides = [1, 1]} : vector<16x768xbf16> to vector<16x64xbf16>
    %c9 = arith.constant 9 : index
    %c0_51 = arith.constant 0 : index
    %c0_52 = arith.constant 0 : index
    %145 = vector.load %arg9[%c9, %c0_51, %c0_52] : memref<13x64x320xbf16, #tpu.memory_space<vmem>>, vector<1x64x320xbf16>
    %146 = vector.shape_cast %145 : vector<1x64x320xbf16> to vector<64x320xbf16>
    %cst_53 = arith.constant dense<0.000000e+00> : vector<16x320xf32>
    %147 = tpu.matmul %143, %146, %cst_53 {dimension_numbers = #tpu.dot_dimension_numbers<[1], [0], [0], [1], [0, 0, 1, 1], [], []>} : vector<16x64xbf16>, vector<64x320xbf16>, vector<16x320xf32> -> vector<16x320xf32>
    %148 = tpu.concatenate %144, %144, %144, %144, %144 in 1 : vector<16x64xbf16>, vector<16x64xbf16>, vector<16x64xbf16>, vector<16x64xbf16>, vector<16x64xbf16> -> vector<16x320xbf16>
    %149 = arith.extf %148 : vector<16x320xbf16> to vector<16x320xf32>
    %150 = arith.mulf %147, %149 : vector<16x320xf32>
    %151 = arith.addf %142, %150 : vector<16x320xf32>
    %152 = vector.extract_strided_slice %58 {offsets = [0, 640], sizes = [16, 64], strides = [1, 1]} : vector<16x768xbf16> to vector<16x64xbf16>
    %153 = vector.extract_strided_slice %60 {offsets = [0, 640], sizes = [16, 64], strides = [1, 1]} : vector<16x768xbf16> to vector<16x64xbf16>
    %c10 = arith.constant 10 : index
    %c0_54 = arith.constant 0 : index
    %c0_55 = arith.constant 0 : index
    %154 = vector.load %arg9[%c10, %c0_54, %c0_55] : memref<13x64x320xbf16, #tpu.memory_space<vmem>>, vector<1x64x320xbf16>
    %155 = vector.shape_cast %154 : vector<1x64x320xbf16> to vector<64x320xbf16>
    %cst_56 = arith.constant dense<0.000000e+00> : vector<16x320xf32>
    %156 = tpu.matmul %152, %155, %cst_56 {dimension_numbers = #tpu.dot_dimension_numbers<[1], [0], [0], [1], [0, 0, 1, 1], [], []>} : vector<16x64xbf16>, vector<64x320xbf16>, vector<16x320xf32> -> vector<16x320xf32>
    %157 = tpu.concatenate %153, %153, %153, %153, %153 in 1 : vector<16x64xbf16>, vector<16x64xbf16>, vector<16x64xbf16>, vector<16x64xbf16>, vector<16x64xbf16> -> vector<16x320xbf16>
    %158 = arith.extf %157 : vector<16x320xbf16> to vector<16x320xf32>
    %159 = arith.mulf %156, %158 : vector<16x320xf32>
    %160 = arith.addf %151, %159 : vector<16x320xf32>
    %161 = vector.extract_strided_slice %58 {offsets = [0, 704], sizes = [16, 64], strides = [1, 1]} : vector<16x768xbf16> to vector<16x64xbf16>
    %162 = vector.extract_strided_slice %60 {offsets = [0, 704], sizes = [16, 64], strides = [1, 1]} : vector<16x768xbf16> to vector<16x64xbf16>
    %c11 = arith.constant 11 : index
    %c0_57 = arith.constant 0 : index
    %c0_58 = arith.constant 0 : index
    %163 = vector.load %arg9[%c11, %c0_57, %c0_58] : memref<13x64x320xbf16, #tpu.memory_space<vmem>>, vector<1x64x320xbf16>
    %164 = vector.shape_cast %163 : vector<1x64x320xbf16> to vector<64x320xbf16>
    %cst_59 = arith.constant dense<0.000000e+00> : vector<16x320xf32>
    %165 = tpu.matmul %161, %164, %cst_59 {dimension_numbers = #tpu.dot_dimension_numbers<[1], [0], [0], [1], [0, 0, 1, 1], [], []>} : vector<16x64xbf16>, vector<64x320xbf16>, vector<16x320xf32> -> vector<16x320xf32>
    %166 = tpu.concatenate %162, %162, %162, %162, %162 in 1 : vector<16x64xbf16>, vector<16x64xbf16>, vector<16x64xbf16>, vector<16x64xbf16>, vector<16x64xbf16> -> vector<16x320xbf16>
    %167 = arith.extf %166 : vector<16x320xbf16> to vector<16x320xf32>
    %168 = arith.mulf %165, %167 : vector<16x320xf32>
    %169 = arith.addf %160, %168 : vector<16x320xf32>
    %c12 = arith.constant 12 : index
    %c0_60 = arith.constant 0 : index
    %c0_61 = arith.constant 0 : index
    %170 = vector.load %arg9[%c12, %c0_60, %c0_61] : memref<13x64x320xbf16, #tpu.memory_space<vmem>>, vector<1x64x320xbf16>
    %171 = vector.shape_cast %170 : vector<1x64x320xbf16> to vector<64x320xbf16>
    %cst_62 = arith.constant dense<0.000000e+00> : vector<16x320xf32>
    %172 = tpu.matmul %56, %171, %cst_62 {dimension_numbers = #tpu.dot_dimension_numbers<[1], [0], [0], [1], [0, 0, 1, 1], [], []>} : vector<16x64xbf16>, vector<64x320xbf16>, vector<16x320xf32> -> vector<16x320xf32>
    %173 = tpu.concatenate %56, %56, %56, %56, %56 in 1 : vector<16x64xbf16>, vector<16x64xbf16>, vector<16x64xbf16>, vector<16x64xbf16>, vector<16x64xbf16> -> vector<16x320xbf16>
    %174 = arith.extf %173 : vector<16x320xbf16> to vector<16x320xf32>
    %175 = arith.mulf %172, %174 : vector<16x320xf32>
    %176 = arith.addf %169, %175 : vector<16x320xf32>
    %c0_63 = arith.constant 0 : index
    %c0_64 = arith.constant 0 : index
    %177 = vector.load %arg11[%c0_63, %c0_64] : memref<320x128xf32, #tpu.memory_space<vmem>>, vector<320x128xf32>
    %cst_65 = arith.constant dense<0.000000e+00> : vector<16x128xf32>
    %178 = tpu.matmul %176, %177, %cst_65 {dimension_numbers = #tpu.dot_dimension_numbers<[1], [0], [0], [1], [0, 0, 1, 1], [], []>} : vector<16x320xf32>, vector<320x128xf32>, vector<16x128xf32> -> vector<16x128xf32>
    %c0_66 = arith.constant 0 : index
    %c0_67 = arith.constant 0 : index
    %179 = vector.load %arg10[%c0_66, %c0_67] : memref<1x128xf32, #tpu.memory_space<vmem>>, vector<1x128xf32>
    %180 = vector.broadcast %179 : vector<1x128xf32> to vector<16x128xf32>
    %181 = arith.addf %178, %180 : vector<16x128xf32>
    %c0_68 = arith.constant 0 : index
    %c0_69 = arith.constant 0 : index
    %182 = vector.load %arg12[%c0_68, %c0_69] : memref<16x128xf32, #tpu.memory_space<vmem>>, vector<16x128xf32>
    tpu.vector_store %arg12[%c0_68, %c0_69], %181 {strides = array<i32>} : memref<16x128xf32, #tpu.memory_space<vmem>>, vector<16x128xf32>,
    return
  }
  func.func @transform_0(%arg0: i32) -> (i32, i32) {
    %c0_i32 = arith.constant 0 : i32
    %c0_i32_0 = arith.constant 0 : i32
    return %arg0, %c0_i32 : i32, i32
  }
  func.func @transform_1(%arg0: i32) -> (i32, i32) {
    %c0_i32 = arith.constant 0 : i32
    %c0_i32_0 = arith.constant 0 : i32
    return %arg0, %c0_i32 : i32, i32
  }
  func.func @transform_2(%arg0: i32) -> (i32, i32) {
    %c0_i32 = arith.constant 0 : i32
    %c0_i32_0 = arith.constant 0 : i32
    %c0_i32_1 = arith.constant 0 : i32
    return %c0_i32, %c0_i32_0 : i32, i32
  }
  func.func @transform_3(%arg0: i32) -> i32 {
    %c0_i32 = arith.constant 0 : i32
    %c0_i32_0 = arith.constant 0 : i32
    return %c0_i32 : i32
  }
  func.func @transform_4(%arg0: i32) -> (i32, i32) {
    %c0_i32 = arith.constant 0 : i32
    %c0_i32_0 = arith.constant 0 : i32
    %c0_i32_1 = arith.constant 0 : i32
    return %c0_i32, %c0_i32_0 : i32, i32
  }
  func.func @transform_5(%arg0: i32) -> (i32, i32) {
    %c0_i32 = arith.constant 0 : i32
    %c0_i32_0 = arith.constant 0 : i32
    %c0_i32_1 = arith.constant 0 : i32
    return %c0_i32, %c0_i32_0 : i32, i32
  }
  func.func @transform_6(%arg0: i32) -> (i32, i32) {
    %c0_i32 = arith.constant 0 : i32
    %c0_i32_0 = arith.constant 0 : i32
    %c0_i32_1 = arith.constant 0 : i32
    return %c0_i32, %c0_i32_0 : i32, i32
  }
  func.func @transform_7(%arg0: i32) -> (i32, i32) {
    %c0_i32 = arith.constant 0 : i32
    %c0_i32_0 = arith.constant 0 : i32
    %c0_i32_1 = arith.constant 0 : i32
    return %c0_i32, %c0_i32_0 : i32, i32
  }
  func.func @transform_8(%arg0: i32) -> (i32, i32, i32) {
    %c0_i32 = arith.constant 0 : i32
    %c0_i32_0 = arith.constant 0 : i32
    %c0_i32_1 = arith.constant 0 : i32
    %c0_i32_2 = arith.constant 0 : i32
    return %c0_i32, %c0_i32_0, %c0_i32_1 : i32, i32, i32
  }
  func.func @transform_9(%arg0: i32) -> (i32, i32) {
    %c0_i32 = arith.constant 0 : i32
    %c0_i32_0 = arith.constant 0 : i32
    %c0_i32_1 = arith.constant 0 : i32
    return %c0_i32, %c0_i32_0 : i32, i32
  }
  func.func @transform_10(%arg0: i32) -> (i32, i32) {
    %c0_i32 = arith.constant 0 : i32
    %c0_i32_0 = arith.constant 0 : i32
    %c0_i32_1 = arith.constant 0 : i32
    return %c0_i32, %c0_i32_0 : i32, i32
  }
  func.func @transform_11(%arg0: i32) -> (i32, i32) {
    %c0_i32 = arith.constant 0 : i32
    %c0_i32_0 = arith.constant 0 : i32
    return %arg0, %c0_i32 : i32, i32
  }
}

</mosaic_0001>

<bundles_post_ra>
// kernel: tpu_custom_call.1
= control target key start
LH: loop header
LB: loop body
LE: loop exit
PB: predicated region body
PF: predicated region fallthrough
CT: control target
= control target key end

     0   :  { %17 = vsyncpa [#allocation4], 0  ;;  %s8827_s0 = inlined_call_operand.hbm [shape: bf16[16,768], index: 0, kind: input, shape index: {}]   ;;  %s8828_s1 = inlined_call_operand.hbm [shape: bf16[16,768], index: 1, kind: input, shape index: {}]   ;;  %s8829_s2 = inlined_call_operand.hbm [shape: bf16[768,768], index: 2, kind: input, shape index: {}]   ;;  %s8830_s3 = inlined_call_operand.<no memory space> [shape: f32[1], index: 3, kind: input, shape index: {}]   ;;  %s8831_s4 = inlined_call_operand.hbm [shape: f32[3,256], index: 4, kind: input, shape index: {}]   ;;  %s8832_s5 = inlined_call_operand.hbm [shape: f32[1,256], index: 5, kind: input, shape index: {}]   ;;  %s8833_s6 = inlined_call_operand.vmem [shape: bf16[256,64], index: 6, kind: input, shape index: {}]   ;;  %s8834_s7 = inlined_call_operand.hbm [shape: f32[1,64], index: 7, kind: input, shape index: {}]   ;;  %s8835_s8 = inlined_call_operand.hbm [shape: bf16[13,64,320], index: 8, kind: input, shape index: {}]   ;;  %s8836_s9 = inlined_call_operand.hbm [shape: f32[1,128], index: 9, kind: input, shape index: {}]   ;;  %s8837_s10 = inlined_call_operand.hbm [shape: f32[320,128], index: 10, kind: input, shape index: {}]   ;;  %s8838_s11 = inlined_call_operand.hbm [shape: f32[16,128], index: 11, kind: output, shape index: {}]  }
   0x1   :  { %18 = vsyncpa [#allocation7], 0 }
   0x2   :  { %19 = vsyncpa [#allocation10], 0 }
   0x3   :  { %20 = vsyncpa [#allocation13], 0 }
   0x4   :  { %21 = vsyncpa [#allocation16], 0 }
   0x5   :  { %22 = vsyncpa [#allocation5], 0  ;;  %s40_s19 = sshll.u32 %s8828_s1, 4  ;;  %s7746_s20 = smov [#allocation6]   ;;  %s41_s19 = int_to_ptr.hbm [resolvable:$true] %s40_s19 }
   0x6   :  { %s42_s21 = sshll.u32 %s7746_s20, 4  ;;  %s69_s24 = sshll.u32 %s8831_s4, 4  ;;  %s43_s21 = int_to_ptr.vmem [resolvable:$true] %s42_s21  ;;  %s70_s24 = int_to_ptr.hbm [resolvable:$true] %s69_s24 }
   0x7   :  { %s7747_s25 = smov 384   ;;  %s7748_s26 = smov 24  }
   0x8   :  { %48 = dma.hbm_to_vmem [thread:$0]  %s41_s19, 768, %s43_s21, [#allocation7], %s7747_s25, %s7747_s25, %s7748_s26  }
   0x9   :  { %s7749_s27 = smov [#allocation9]   ;;  %s93_s1 = sshll.u32 %s8834_s7, 4  ;;  %s94_s1 = int_to_ptr.hbm [resolvable:$true] %s93_s1 }
   0xa   :  { %s71_s28 = sshll.u32 %s7749_s27, 4  ;;  %s117_s4 = sshll.u32 %s8836_s9, 4  ;;  %s72_s28 = int_to_ptr.vmem [resolvable:$true] %s71_s28  ;;  %s118_s4 = int_to_ptr.hbm [resolvable:$true] %s117_s4 }
   0xb   :  { %74 = dma.hbm_to_vmem [thread:$0]  %s70_s24, 128, %s72_s28, [#allocation10]  }
   0xc   :  { %s7750_s14 = smov [#allocation12]   ;;  %s7751_s16 = smov [#allocation15]  }
   0xd   :  { %s95_s15 = sshll.u32 %s7750_s14, 4  ;;  %s119_s17 = sshll.u32 %s7751_s16, 4  ;;  %s96_s15 = int_to_ptr.vmem [resolvable:$true] %s95_s15  ;;  %s120_s17 = int_to_ptr.vmem [resolvable:$true] %s119_s17 }
   0xe   :  { %98 = dma.hbm_to_vmem [thread:$0]  %s94_s1, 16, %s96_s15, [#allocation13]  }
   0xf   :  { %s27_s20 = sshll.u32 %s8827_s0, 4  ;;  %s53_s22 = sshll.u32 %s8829_s2, 4  ;;  %s28_s20 = int_to_ptr.hbm [resolvable:$true] %s27_s20  ;;  %s54_s22 = int_to_ptr.hbm [resolvable:$true] %s53_s22 }
  0x10   :  { %122 = dma.hbm_to_vmem [thread:$0]  %s118_s4, 16, %s120_s17, [#allocation16]  }
  0x11   :  { %s7752_s23 = smov [#allocation3]   ;;  %s7753_s24 = smov [#allocation8]  }
  0x12   :  { %s29_s9 = sshll.u32 %s7752_s23, 4  ;;  %s55_s27 = sshll.u32 %s7753_s24, 4  ;;  %s30_s9 = int_to_ptr.vmem [resolvable:$true] %s29_s9  ;;  %s56_s27 = int_to_ptr.vmem [resolvable:$true] %s55_s27 }
  0x13   :  { %35 = dma.hbm_to_vmem [thread:$0]  %s28_s20, 768, %s30_s9, [#allocation4], %s7747_s25, %s7747_s25, %s7748_s26  }
  0x14   :  { %s80_s0 = sshll.u32 %s8832_s5, 4  ;;  %s103_s1 = sshll.u32 %s8835_s8, 4  ;;  %s81_s0 = int_to_ptr.hbm [resolvable:$true] %s80_s0  ;;  %s104_s1 = int_to_ptr.hbm [resolvable:$true] %s103_s1 }
  0x15   :  { %61 = dma.hbm_to_vmem [thread:$0]  %s54_s22, 36864, %s56_s27, [#allocation7], %s7747_s25, %s7747_s25, %s7748_s26  }
  0x16   :  { %s7754_s12 = smov [#allocation11]   ;;  %s7755_s4 = smov [#allocation14]  }
  0x17   :  { %s82_s13 = sshll.u32 %s7754_s12, 4  ;;  %s105_s14 = sshll.u32 %s7755_s4, 4  ;;  %s83_s13 = int_to_ptr.vmem [resolvable:$true] %s82_s13  ;;  %s106_s14 = int_to_ptr.vmem [resolvable:$true] %s105_s14 }
  0x18   :  { %85 = dma.hbm_to_vmem [thread:$0]  %s81_s0, 32, %s83_s13, [#allocation10]  }
  0x19   :  { %s7756_s15 = smov 192   ;;  %s7757_s5 = smov 12  }
  0x1a   :  { %111 = dma.hbm_to_vmem [thread:$0]  %s104_s1, 19968, %s106_s14, [#allocation13], %s7756_s15, %s7756_s15, %s7757_s5  }
  0x1b   :  { %s127_s18 = sshll.u32 %s8837_s10, 4  ;;  %s7758_s25 = smov [#allocation17]   ;;  %s128_s18 = int_to_ptr.hbm [resolvable:$true] %s127_s18 }
  0x1c   :  { %s129_s26 = sshll.u32 %s7758_s25, 4  ;;  %s7759_s8 = smov 128   ;;  %s130_s26 = int_to_ptr.vmem [resolvable:$true] %s129_s26 }
  0x1d   :  { %s7760_s19 = smov 8  }
  0x1e   :  { %135 = dma.hbm_to_vmem [thread:$0]  %s128_s18, 5120, %s130_s26, [#allocation16], %s7759_s8, %s7759_s8, %s7760_s19  }
  0x1f   :  { %7734 = dma.done.wait [#allocation4], 768  }
  0x20   :  { %7735 = vsyncadd [#allocation4], 4294966528 }
  0x21   :  { %7736 = dma.done.wait [#allocation7], 37632  }
  0x22   :  { %7737 = vsyncadd [#allocation7], 4294929664 }
  0x23   :  { %7738 = dma.done.wait [#allocation10], 160  }
  0x24   :  { %7739 = vsyncadd [#allocation10], 4294967136 }
  0x25   :  { %7740 = dma.done.wait [#allocation13], 19984  }
  0x26   :  { %7741 = vsyncadd [#allocation13], 4294947312 }
  0x27   :  { %7742 = dma.done.wait [#allocation16], 5136  }
  0x28   :  { %7743 = vsyncadd [#allocation16], 4294962160  ;;  %v5234_v0 = vld [vmem:[#allocation8 + $0x150] sm:$0xf]  ;;  %v6996_v1 = vld [vmem:[#allocation8 + $0x164] sm:$0xf0] }
  0x29   :  { %v5426_v2 = vld [vmem:[#allocation8 + $0x2d0] sm:$0xf]  ;;  %v5235_v3 = vor.u32 %v6996_v1, %v5234_v0  ;;  %v7044_v4 = vld [vmem:[#allocation8 + $0x2e4] sm:$0xf0]  ;;  %v5210_v11 = vld [vmem:[#allocation8 + $0x120] sm:$0xf] }
  0x2a   :  { %v5618_v5 = vld [vmem:[#allocation8 + $0x450] sm:$0xf]  ;;  %v7092_v6 = vld [vmem:[#allocation8 + $0x464] sm:$0xf0]  ;;  %v5427_v7 = vor.u32 %v7044_v4, %v5426_v2  ;;  %v6990_v13 = vld [vmem:[#allocation8 + $0x134] sm:$0xf0] }
  0x2b   :  { %v5619_v8 = vor.u32 %v7092_v6, %v5618_v5  ;;  %v5810_v9 = vld [vmem:[#allocation8 + $0x5d0] sm:$0xf]  ;;  %v7140_v10 = vld [vmem:[#allocation8 + $0x5e4] sm:$0xf0]  ;;  %2129 = vmatpush.bf16.msra.mxu0 %v5235_v3  ;;  %v5402_v14 = vld [vmem:[#allocation8 + $0x2a0] sm:$0xf]  ;;  %v5211_v16 = vor.u32 %v6990_v13, %v5210_v11 }
  0x2c   :  { %v5811_v12 = vor.u32 %v7140_v10, %v5810_v9  ;;  %v7038_v15 = vld [vmem:[#allocation8 + $0x2b4] sm:$0xf0]  ;;  %2143 = vmatpush.bf16.msra.mxu1 %v5427_v7  ;;  %v5594_v18 = vld [vmem:[#allocation8 + $0x420] sm:$0xf]  ;;  %v5186_v23 = vld [vmem:[#allocation8 + $0xf0] sm:$0xf] }
  0x2d   :  { %2157 = vmatpush.bf16.msra.mxu2 %v5619_v8  ;;  %v5403_v17 = vor.u32 %v7038_v15, %v5402_v14  ;;  %v7086_v19 = vld [vmem:[#allocation8 + $0x434] sm:$0xf0]  ;;  %v5786_v20 = vld [vmem:[#allocation8 + $0x5a0] sm:$0xf]  ;;  %v6984_v24 = vld [vmem:[#allocation8 + $0x104] sm:$0xf0] }
  0x2e   :  { %2171 = vmatpush.bf16.msra.mxu3 %v5811_v12  ;;  %v5595_v21 = vor.u32 %v7086_v19, %v5594_v18  ;;  %v7134_v22 = vld [vmem:[#allocation8 + $0x5b4] sm:$0xf0]  ;;  %v5378_v26 = vld [vmem:[#allocation8 + $0x270] sm:$0xf]  ;;  %v7032_v27 = vld [vmem:[#allocation8 + $0x284] sm:$0xf0]  ;;  %v5187_v29 = vor.u32 %v6984_v24, %v5186_v23 }
  0x2f   :  { %v5787_v25 = vor.u32 %v7134_v22, %v5786_v20  ;;  %v5570_v28 = vld [vmem:[#allocation8 + $0x3f0] sm:$0xf]  ;;  %2130 = vmatpush.bf16.msra.mxu0 %v5211_v16  ;;  %v7080_v30 = vld [vmem:[#allocation8 + $0x404] sm:$0xf0]  ;;  %v5379_v33 = vor.u32 %v7032_v27, %v5378_v26  ;;  %v5162_v35 = vld [vmem:[#allocation8 + $0xc0] sm:$0xf] }
  0x30   :  { %v5762_v31 = vld [vmem:[#allocation8 + $0x570] sm:$0xf]  ;;  %v7128_v32 = vld [vmem:[#allocation8 + $0x584] sm:$0xf0]  ;;  %2144 = vmatpush.bf16.msra.mxu1 %v5403_v17  ;;  %v5571_v34 = vor.u32 %v7080_v30, %v5570_v28  ;;  %v6978_v36 = vld [vmem:[#allocation8 + $0xd4] sm:$0xf0] }
  0x31   :  { %2158 = vmatpush.bf16.msra.mxu2 %v5595_v21  ;;  %v5354_v37 = vld [vmem:[#allocation8 + $0x240] sm:$0xf]  ;;  %v5763_v38 = vor.u32 %v7128_v32, %v5762_v31  ;;  %v7026_v39 = vld [vmem:[#allocation8 + $0x254] sm:$0xf0]  ;;  %v5163_v44 = vor.u32 %v6978_v36, %v5162_v35  ;;  %v5138_v47 = vld [vmem:[#allocation8 + $0x90] sm:$0xf] }
  0x32   :  { %2172 = vmatpush.bf16.msra.mxu3 %v5787_v25  ;;  %v5546_v40 = vld [vmem:[#allocation8 + $0x3c0] sm:$0xf]  ;;  %v7074_v41 = vld [vmem:[#allocation8 + $0x3d4] sm:$0xf0]  ;;  %v5355_v45 = vor.u32 %v7026_v39, %v5354_v37  ;;  %v6972_v48 = vld [vmem:[#allocation8 + $0xa4] sm:$0xf0] }
  0x33   :  { %v5738_v42 = vld [vmem:[#allocation8 + $0x540] sm:$0xf]  ;;  %v7122_v43 = vld [vmem:[#allocation8 + $0x554] sm:$0xf0]  ;;  %2131 = vmatpush.bf16.msra.mxu0 %v5187_v29  ;;  %v5547_v46 = vor.u32 %v7074_v41, %v5546_v40  ;;  %v5330_v49 = vld [vmem:[#allocation8 + $0x210] sm:$0xf]  ;;  %v5139_v56 = vor.u32 %v6972_v48, %v5138_v47 }
  0x34   :  { %2145 = vmatpush.bf16.msra.mxu1 %v5379_v33  ;;  %v5739_v50 = vor.u32 %v7122_v43, %v5738_v42  ;;  %v7020_v51 = vld [vmem:[#allocation8 + $0x224] sm:$0xf0]  ;;  %v5522_v52 = vld [vmem:[#allocation8 + $0x390] sm:$0xf]  ;;  %v5114_v59 = vld [vmem:[#allocation8 + $0x60] sm:$0xf] }
  0x35   :  { %2159 = vmatpush.bf16.msra.mxu2 %v5571_v34  ;;  %v7068_v53 = vld [vmem:[#allocation8 + $0x3a4] sm:$0xf0]  ;;  %v5714_v54 = vld [vmem:[#allocation8 + $0x510] sm:$0xf]  ;;  %v5331_v57 = vor.u32 %v7020_v51, %v5330_v49  ;;  %v6966_v60 = vld [vmem:[#allocation8 + $0x74] sm:$0xf0] }
  0x36   :  { %2173 = vmatpush.bf16.msra.mxu3 %v5763_v38  ;;  %v7116_v55 = vld [vmem:[#allocation8 + $0x524] sm:$0xf0]  ;;  %v5523_v58 = vor.u32 %v7068_v53, %v5522_v52  ;;  %v5306_v61 = vld [vmem:[#allocation8 + $0x1e0] sm:$0xf]  ;;  %v7014_v63 = vld [vmem:[#allocation8 + $0x1f4] sm:$0xf0]  ;;  %v5115_v4 = vor.u32 %v6966_v60, %v5114_v59 }
  0x37   :  { %2132 = vmatpush.bf16.msra.mxu0 %v5163_v44  ;;  %v5715_v62 = vor.u32 %v7116_v55, %v5714_v54  ;;  %v5498_v0 = vld [vmem:[#allocation8 + $0x360] sm:$0xf]  ;;  %v7062_v1 = vld [vmem:[#allocation8 + $0x374] sm:$0xf0]  ;;  %v5307_v5 = vor.u32 %v7014_v63, %v5306_v61  ;;  %v5090_v7 = vld [vmem:[#allocation8 + $0x30] sm:$0xf] }
  0x38   :  { %2146 = vmatpush.bf16.msra.mxu1 %v5355_v45  ;;  %v5690_v2 = vld [vmem:[#allocation8 + $0x4e0] sm:$0xf]  ;;  %v7110_v3 = vld [vmem:[#allocation8 + $0x4f4] sm:$0xf0]  ;;  %v5499_v6 = vor.u32 %v7062_v1, %v5498_v0  ;;  %v6960_v8 = vld [vmem:[#allocation8 + $0x44] sm:$0xf0] }
  0x39   :  { %2160 = vmatpush.bf16.msra.mxu2 %v5547_v46  ;;  %v5282_v9 = vld [vmem:[#allocation8 + $0x1b0] sm:$0xf]  ;;  %v5691_v10 = vor.u32 %v7110_v3, %v5690_v2  ;;  %v7008_v11 = vld [vmem:[#allocation8 + $0x1c4] sm:$0xf0]  ;;  %v5091_v16 = vor.u32 %v6960_v8, %v5090_v7  ;;  %v5066_v17 = vld [vmem:[#allocation8] sm:$0xf] }
  0x3a   :  { %2174 = vmatpush.bf16.msra.mxu3 %v5739_v50  ;;  %v5474_v12 = vld [vmem:[#allocation8 + $0x330] sm:$0xf]  ;;  %v7056_v13 = vld [vmem:[#allocation8 + $0x344] sm:$0xf0]  ;;  %v6954_v18 = vld [vmem:[#allocation8 + $0x14] sm:$0xf0]  ;;  %v5283_v19 = vor.u32 %v7008_v11, %v5282_v9 }
  0x3b   :  { %2133 = vmatpush.bf16.msra.mxu0 %v5139_v56  ;;  %v5666_v14 = vld [vmem:[#allocation8 + $0x4b0] sm:$0xf]  ;;  %v7104_v15 = vld [vmem:[#allocation8 + $0x4c4] sm:$0xf0]  ;;  %v5475_v20 = vor.u32 %v7056_v13, %v5474_v12  ;;  %v5258_v21 = vld [vmem:[#allocation8 + $0x180] sm:$0xf]  ;;  %v5067_v31 = vor.u32 %v6954_v18, %v5066_v17 }
  0x3c   :  { %2147 = vmatpush.bf16.msra.mxu1 %v5331_v57  ;;  %v7002_v22 = vld [vmem:[#allocation8 + $0x194] sm:$0xf0]  ;;  %v5450_v23 = vld [vmem:[#allocation8 + $0x300] sm:$0xf]  ;;  %v5667_v24 = vor.u32 %v7104_v15, %v5666_v14  ;;  %v6002_v28 = vld [vmem:[#allocation8 + $0x750] sm:$0xf] }
  0x3d   :  { %2161 = vmatpush.bf16.msra.mxu2 %v5523_v58  ;;  %v7050_v25 = vld [vmem:[#allocation8 + $0x314] sm:$0xf0]  ;;  %v5642_v26 = vld [vmem:[#allocation8 + $0x480] sm:$0xf]  ;;  %v7188_v29 = vld [vmem:[#allocation8 + $0x764] sm:$0xf0]  ;;  %v5259_v35 = vor.u32 %v7002_v22, %v5258_v21 }
  0x3e   :  { %2175 = vmatpush.bf16.msra.mxu3 %v5715_v62  ;;  %v7098_v27 = vld [vmem:[#allocation8 + $0x494] sm:$0xf0]  ;;  %v6194_v30 = vld [vmem:[#allocation8 + $0x8d0] sm:$0xf]  ;;  %v7236_v32 = vld [vmem:[#allocation8 + $0x8e4] sm:$0xf0]  ;;  %v5451_v36 = vor.u32 %v7050_v25, %v5450_v23  ;;  %v6003_v40 = vor.u32 %v7188_v29, %v6002_v28 }
  0x3f   :  { %2134 = vmatpush.bf16.msra.mxu0 %v5115_v4  ;;  %v6993_v33 = vld [vmem:[#allocation8 + $0x154] sm:$0xf]  ;;  %v5236_v34 = vld [vmem:[#allocation8 + $0x168] sm:$0xf0]  ;;  %v5643_v39 = vor.u32 %v7098_v27, %v5642_v26  ;;  %v5978_v41 = vld [vmem:[#allocation8 + $0x720] sm:$0xf]  ;;  %v6195_v42 = vor.u32 %v7236_v32, %v6194_v30 }
  0x40   :  { %2148 = vmatpush.bf16.msra.mxu1 %v5307_v5  ;;  %v7041_v37 = vld [vmem:[#allocation8 + $0x2d4] sm:$0xf]  ;;  %v5428_v38 = vld [vmem:[#allocation8 + $0x2e8] sm:$0xf0]  ;;  %v5239_v43 = vor.u32 %v6993_v33, %v5236_v34  ;;  %v7182_v44 = vld [vmem:[#allocation8 + $0x734] sm:$0xf0] }
  0x41   :  { %2162 = vmatpush.bf16.msra.mxu2 %v5499_v6  ;;  %v6170_v45 = vld [vmem:[#allocation8 + $0x8a0] sm:$0xf]  ;;  %v7230_v46 = vld [vmem:[#allocation8 + $0x8b4] sm:$0xf0]  ;;  %v5431_v47 = vor.u32 %v7041_v37, %v5428_v38  ;;  %v6987_v48 = vld [vmem:[#allocation8 + $0x124] sm:$0xf]  ;;  %v5979_v54 = vor.u32 %v7182_v44, %v5978_v41 }
  0x42   :  { %2176 = vmatpush.bf16.msra.mxu3 %v5691_v10  ;;  %v5212_v49 = vld [vmem:[#allocation8 + $0x138] sm:$0xf0]  ;;  %v7035_v50 = vld [vmem:[#allocation8 + $0x2a4] sm:$0xf]  ;;  %v5042_v52 = vld [vmem:[#allocation3] sm:$0xf]  ;;  %v6171_v59 = vor.u32 %v7230_v46, %v6170_v45 }
  0x43   :  { %2135 = vmatpush.bf16.msra.mxu0 %v5091_v16  ;;  %v5404_v51 = vld [vmem:[#allocation8 + $0x2b8] sm:$0xf0]  ;;  %v6948_v53 = vld [vmem:[#allocation3 + $0x14] sm:$0xf0]  ;;  %v5954_v55 = vld [vmem:[#allocation8 + $0x6f0] sm:$0xf]  ;;  %v5215_v60 = vor.u32 %v6987_v48, %v5212_v49 }
  0x44   :  { %2149 = vmatpush.bf16.msra.mxu1 %v5283_v19  ;;  %v7176_v56 = vld [vmem:[#allocation8 + $0x704] sm:$0xf0]  ;;  %v6146_v57 = vld [vmem:[#allocation8 + $0x870] sm:$0xf]  ;;  %v7862_v58 = vor.u32 %v6948_v53, %v5042_v52  ;;  %v6981_v62 = vld [vmem:[#allocation8 + $0xf4] sm:$0xf]  ;;  %v5407_v0 = vor.u32 %v7035_v50, %v5404_v51 }
  0x45   :  { %2163 = vmatpush.bf16.msra.mxu2 %v5475_v20  ;;  %v7224_v61 = vld [vmem:[#allocation8 + $0x884] sm:$0xf0]  ;;  %v5188_v63 = vld [vmem:[#allocation8 + $0x108] sm:$0xf0]  ;;  %v7029_v1 = vld [vmem:[#allocation8 + $0x274] sm:$0xf]  ;;  %v5955_v8 = vor.u32 %v7176_v56, %v5954_v55 }
  0x46   :  { %2177 = vmatpush.bf16.msra.mxu3 %v5667_v24  ;;  %v6945_v2 = vld [vmem:[#allocation3 + $0x4] sm:$0xf]  ;;  %v5044_v3 = vld [vmem:[#allocation3 + $0x18] sm:$0xf0]  ;;  %v5380_v4 = vld [vmem:[#allocation8 + $0x288] sm:$0xf0]  ;;  %v6147_v12 = vor.u32 %v7224_v61, %v6146_v57  ;;  %v5191_v13 = vor.u32 %v6981_v62, %v5188_v63 }
  0x47   :  { %2136 = vmatpush.bf16.msra.mxu0 %v5067_v31  ;;  %v7865_v5 = vor.u32 %v6945_v2, %v5044_v3  ;;  %v5050_v6 = vld [vmem:[#allocation3 + $0x8] sm:$0xf]  ;;  %v6949_v7 = vld [vmem:[#allocation3 + $0x1c] sm:$0xf0]  ;;  %v7170_v10 = vld [vmem:[#allocation8 + $0x6d4] sm:$0xf0]  ;;  %v5383_v17 = vor.u32 %v7029_v1, %v5380_v4 }
  0x48   :  { %2150 = vmatpush.bf16.msra.mxu1 %v5259_v35  ;;  %v5930_v9 = vld [vmem:[#allocation8 + $0x6c0] sm:$0xf]  ;;  %v7867_v11 = vor.u32 %v6949_v7, %v5050_v6  ;;  %v7218_v15 = vld [vmem:[#allocation8 + $0x854] sm:$0xf0]  ;;  %v6975_v16 = vld [vmem:[#allocation8 + $0xc4] sm:$0xf] }
  0x49   :  { %2164 = vmatpush.bf16.msra.mxu2 %v5451_v36  ;;  %v6122_v14 = vld [vmem:[#allocation8 + $0x840] sm:$0xf]  ;;  %v5164_v18 = vld [vmem:[#allocation8 + $0xd8] sm:$0xf0]  ;;  %v6946_v19 = vld [vmem:[#allocation3 + $0xc] sm:$0xf]  ;;  %v5931_v24 = vor.u32 %v7170_v10, %v5930_v9 }
  0x4a   :  { %2178 = vmatpush.bf16.msra.mxu3 %v5643_v39  ;;  %2137 = vmatmul.bf16.vlgmr.msra.gmra.mxu0 %v7862_v58  ;;  %v5052_v20 = vld [vmem:[#allocation3 + $0x20] sm:$0xf0]  ;;  %v5356_v22 = vld [vmem:[#allocation8 + $0x258] sm:$0xf0]  ;;  %v6123_v25 = vor.u32 %v7218_v15, %v6122_v14  ;;  %v5167_v26 = vor.u32 %v6975_v16, %v5164_v18  ;;  %v5906_v27 = vld [vmem:[#allocation8 + $0x690] sm:$0xf] }
  0x4b   :  { %2185 = vmatpush.bf16.msrb.mxu0 %v6003_v40  ;;  %2151 = vmatmul.bf16.vlgmr.msra.gmra.mxu1 %v7865_v5  ;;  %v7023_v21 = vld [vmem:[#allocation8 + $0x244] sm:$0xf]  ;;  %v7871_v23 = vor.u32 %v6946_v19, %v5052_v20  ;;  %v7164_v28 = vld [vmem:[#allocation8 + $0x6a4] sm:$0xf0]  ;;  %v6098_v29 = vld [vmem:[#allocation8 + $0x810] sm:$0xf] }
  0x4c   :  { %2199 = vmatpush.bf16.msrb.mxu1 %v6195_v42  ;;  %2165 = vmatmul.bf16.vlgmr.msra.gmra.mxu2 %v7867_v11  ;;  %v5359_v30 = vor.u32 %v7023_v21, %v5356_v22  ;;  %v7212_v31 = vld [vmem:[#allocation8 + $0x824] sm:$0xf0]  ;;  %v6969_v32 = vld [vmem:[#allocation8 + $0x94] sm:$0xf]  ;;  %v5140_v33 = vld [vmem:[#allocation8 + $0xa8] sm:$0xf0]  ;;  %v5907_v36 = vor.u32 %v7164_v28, %v5906_v27 }
  0x4d   :  { %2213 = vmatpush.bf16.msrb.mxu2 %v5239_v43  ;;  %v7017_v34 = vld [vmem:[#allocation8 + $0x214] sm:$0xf]  ;;  %v5332_v35 = vld [vmem:[#allocation8 + $0x228] sm:$0xf0]  ;;  %2179 = vmatmul.bf16.vlgmr.msra.gmra.mxu3 %v7871_v23  ;;  %v6099_v37 = vor.u32 %v7212_v31, %v6098_v29  ;;  %v5143_v38 = vor.u32 %v6969_v32, %v5140_v33  ;;  %v5882_v39 = vld [vmem:[#allocation8 + $0x660] sm:$0xf] }
  0x4e   :  { %2227 = vmatpush.bf16.msrb.mxu3 %v5431_v47  ;;  %v7158_v40 = vld [vmem:[#allocation8 + $0x674] sm:$0xf0]  ;;  %v6074_v41 = vld [vmem:[#allocation8 + $0x7e0] sm:$0xf]  ;;  %v5335_v42 = vor.u32 %v7017_v34, %v5332_v35  ;;  %v6963_v44 = vld [vmem:[#allocation8 + $0x64] sm:$0xf] }
  0x4f   :  { %2186 = vmatpush.bf16.msrb.mxu0 %v5979_v54  ;;  %v7206_v43 = vld [vmem:[#allocation8 + $0x7f4] sm:$0xf0]  ;;  %v5116_v45 = vld [vmem:[#allocation8 + $0x78] sm:$0xf0]  ;;  %v7011_v46 = vld [vmem:[#allocation8 + $0x1e4] sm:$0xf]  ;;  %v5883_v48 = vor.u32 %v7158_v40, %v5882_v39 }
  0x50   :  { %2200 = vmatpush.bf16.msrb.mxu1 %v6171_v59  ;;  %v5308_v47 = vld [vmem:[#allocation8 + $0x1f8] sm:$0xf0]  ;;  %v6075_v49 = vor.u32 %v7206_v43, %v6074_v41  ;;  %v5119_v50 = vor.u32 %v6963_v44, %v5116_v45  ;;  %v5858_v51 = vld [vmem:[#allocation8 + $0x630] sm:$0xf]  ;;  %v7152_v52 = vld [vmem:[#allocation8 + $0x644] sm:$0xf0] }
  0x51   :  { %2214 = vmatpush.bf16.msrb.mxu2 %v5215_v60  ;;  %v6050_v53 = vld [vmem:[#allocation8 + $0x7b0] sm:$0xf]  ;;  %v5311_v54 = vor.u32 %v7011_v46, %v5308_v47  ;;  %v7200_v55 = vld [vmem:[#allocation8 + $0x7c4] sm:$0xf0]  ;;  %v6957_v56 = vld [vmem:[#allocation8 + $0x34] sm:$0xf]  ;;  %v5859_v61 = vor.u32 %v7152_v52, %v5858_v51 }
  0x52   :  { %2228 = vmatpush.bf16.msrb.mxu3 %v5407_v0  ;;  %v5092_v57 = vld [vmem:[#allocation8 + $0x48] sm:$0xf0]  ;;  %v7005_v59 = vld [vmem:[#allocation8 + $0x1b4] sm:$0xf]  ;;  %v5834_v62 = vld [vmem:[#allocation8 + $0x600] sm:$0xf]  ;;  %v6051_v1 = vor.u32 %v7200_v55, %v6050_v53 }
  0x53   :  { %2187 = vmatpush.bf16.msrb.mxu0 %v5955_v8  ;;  %v5284_v60 = vld [vmem:[#allocation8 + $0x1c8] sm:$0xf0]  ;;  %v7146_v63 = vld [vmem:[#allocation8 + $0x614] sm:$0xf0]  ;;  %v6026_v0 = vld [vmem:[#allocation8 + $0x780] sm:$0xf]  ;;  %v5095_v2 = vor.u32 %v6957_v56, %v5092_v57 }
  0x54   :  { %2201 = vmatpush.bf16.msrb.mxu1 %v6147_v12  ;;  %v7194_v3 = vld [vmem:[#allocation8 + $0x794] sm:$0xf0]  ;;  %v6951_v4 = vld [vmem:[#allocation8 + $0x4] sm:$0xf]  ;;  %v5068_v6 = vld [vmem:[#allocation8 + $0x18] sm:$0xf0]  ;;  %v5287_v7 = vor.u32 %v7005_v59, %v5284_v60  ;;  %v5835_v15 = vor.u32 %v7146_v63, %v5834_v62 }
  0x55   :  { %2215 = vmatpush.bf16.msrb.mxu2 %v5191_v13  ;;  %v6999_v8 = vld [vmem:[#allocation8 + $0x184] sm:$0xf]  ;;  %v5260_v9 = vld [vmem:[#allocation8 + $0x198] sm:$0xf0]  ;;  %v7089_v10 = vld [vmem:[#allocation8 + $0x454] sm:$0xf]  ;;  %v6027_v19 = vor.u32 %v7194_v3, %v6026_v0  ;;  %v5071_v20 = vor.u32 %v6951_v4, %v5068_v6 }
  0x56   :  { %2229 = vmatpush.bf16.msrb.mxu3 %v5383_v17  ;;  %v5620_v12 = vld [vmem:[#allocation8 + $0x468] sm:$0xf0]  ;;  %v7137_v13 = vld [vmem:[#allocation8 + $0x5d4] sm:$0xf]  ;;  %v5058_v22 = vld [vmem:[#allocation3 + $0x10] sm:$0xf] }
  0x57   :  { %2188 = vmatpush.bf16.msrb.mxu0 %v5931_v24  ;;  %v5812_v14 = vld [vmem:[#allocation8 + $0x5e8] sm:$0xf0]  ;;  %v7185_v16 = vld [vmem:[#allocation8 + $0x754] sm:$0xf]  ;;  %v6950_v24 = vld [vmem:[#allocation3 + $0x24] sm:$0xf0] }
  0x58   :  { %2202 = vmatpush.bf16.msrb.mxu1 %v6123_v25  ;;  %v6004_v17 = vld [vmem:[#allocation8 + $0x768] sm:$0xf0]  ;;  %v7233_v18 = vld [vmem:[#allocation8 + $0x8d4] sm:$0xf]  ;;  %v5263_v25 = vor.u32 %v6999_v8, %v5260_v9  ;;  %v5815_v29 = vor.u32 %v7137_v13, %v5812_v14  ;;  %v7083_v31 = vld [vmem:[#allocation8 + $0x424] sm:$0xf]  ;;  %v7874_v35 = vor.u32 %v6950_v24, %v5058_v22 }
  0x59   :  { %2216 = vmatpush.bf16.msrb.mxu2 %v5167_v26  ;;  %v6196_v21 = vld [vmem:[#allocation8 + $0x8e8] sm:$0xf0]  ;;  %v5623_v26 = vor.u32 %v7089_v10, %v5620_v12  ;;  %v6947_v27 = vld [vmem:[#allocation3 + $0x14] sm:$0xf]  ;;  %v5596_v32 = vld [vmem:[#allocation8 + $0x438] sm:$0xf0] }
  0x5a   :  { %2230 = vmatpush.bf16.msrb.mxu3 %v5359_v30  ;;  %v5060_v28 = vld [vmem:[#allocation3 + $0x28] sm:$0xf0]  ;;  %v6007_v30 = vor.u32 %v7185_v16, %v6004_v17  ;;  %v7131_v33 = vld [vmem:[#allocation8 + $0x5a4] sm:$0xf]  ;;  %v6199_v34 = vor.u32 %v7233_v18, %v6196_v21  ;;  %v6172_v41 = vld [vmem:[#allocation8 + $0x8b8] sm:$0xf0] }
  0x5b   :  { %2189 = vmatpush.bf16.msrb.mxu0 %v5907_v36  ;;  %v5788_v36 = vld [vmem:[#allocation8 + $0x5b8] sm:$0xf0]  ;;  %v7876_v39 = vor.u32 %v6947_v27, %v5060_v28  ;;  %v7227_v40 = vld [vmem:[#allocation8 + $0x8a4] sm:$0xf]  ;;  %v7077_v45 = vld [vmem:[#allocation8 + $0x3f4] sm:$0xf] }
  0x5c   :  { %2203 = vmatpush.bf16.msrb.mxu1 %v6099_v37  ;;  %v7179_v37 = vld [vmem:[#allocation8 + $0x724] sm:$0xf]  ;;  %v5791_v43 = vor.u32 %v7131_v33, %v5788_v36  ;;  %v5572_v46 = vld [vmem:[#allocation8 + $0x408] sm:$0xf0]  ;;  %v7125_v47 = vld [vmem:[#allocation8 + $0x574] sm:$0xf] }
  0x5d   :  { %2217 = vmatpush.bf16.msrb.mxu2 %v5143_v38  ;;  %v5980_v38 = vld [vmem:[#allocation8 + $0x738] sm:$0xf0]  ;;  %v5956_v51 = vld [vmem:[#allocation8 + $0x708] sm:$0xf0]  ;;  %v7221_v52 = vld [vmem:[#allocation8 + $0x874] sm:$0xf] }
  0x5e   :  { %2231 = vmatpush.bf16.msrb.mxu3 %v5335_v42  ;;  %v5599_v42 = vor.u32 %v7083_v31, %v5596_v32  ;;  %v5983_v44 = vor.u32 %v7179_v37, %v5980_v38  ;;  %v6148_v53 = vld [vmem:[#allocation8 + $0x888] sm:$0xf0]  ;;  %v7071_v57 = vld [vmem:[#allocation8 + $0x3c4] sm:$0xf]  ;;  %v5548_v59 = vld [vmem:[#allocation8 + $0x3d8] sm:$0xf0] }
  0x5f   :  { %2190 = vmatpush.bf16.msrb.mxu0 %v5883_v48  ;;  %v6175_v48 = vor.u32 %v7227_v40, %v6172_v41  ;;  %v7119_v60 = vld [vmem:[#allocation8 + $0x544] sm:$0xf]  ;;  %v5740_v62 = vld [vmem:[#allocation8 + $0x558] sm:$0xf0]  ;;  %v5551_v3 = vor.u32 %v7071_v57, %v5548_v59  ;;  %v5524_v8 = vld [vmem:[#allocation8 + $0x3a8] sm:$0xf0] }
  0x60   :  { %2204 = vmatpush.bf16.msrb.mxu1 %v6075_v49  ;;  %v5764_v49 = vld [vmem:[#allocation8 + $0x588] sm:$0xf0]  ;;  %v7167_v63 = vld [vmem:[#allocation8 + $0x6c4] sm:$0xf]  ;;  %v5932_v0 = vld [vmem:[#allocation8 + $0x6d8] sm:$0xf0]  ;;  %v5743_v4 = vor.u32 %v7119_v60, %v5740_v62 }
  0x61   :  { %2218 = vmatpush.bf16.msrb.mxu2 %v5119_v50  ;;  %v7173_v50 = vld [vmem:[#allocation8 + $0x6f4] sm:$0xf]  ;;  %v5767_v55 = vor.u32 %v7125_v47, %v5764_v49  ;;  %v5935_v6 = vor.u32 %v7167_v63, %v5932_v0  ;;  %v5716_v12 = vld [vmem:[#allocation8 + $0x528] sm:$0xf0]  ;;  %v5500_v21 = vld [vmem:[#allocation8 + $0x378] sm:$0xf0] }
  0x62   :  { %2232 = vmatpush.bf16.msrb.mxu3 %v5311_v54  ;;  %v5575_v54 = vor.u32 %v7077_v45, %v5572_v46  ;;  %v5959_v56 = vor.u32 %v7173_v50, %v5956_v51  ;;  %v7113_v9 = vld [vmem:[#allocation8 + $0x514] sm:$0xf]  ;;  %v5908_v14 = vld [vmem:[#allocation8 + $0x6a8] sm:$0xf0]  ;;  %v7107_v22 = vld [vmem:[#allocation8 + $0x4e4] sm:$0xf] }
  0x63   :  { %2191 = vmatpush.bf16.msrb.mxu0 %v5859_v61  ;;  %v6151_v61 = vor.u32 %v7221_v52, %v6148_v53  ;;  %v7161_v13 = vld [vmem:[#allocation8 + $0x694] sm:$0xf]  ;;  %v6100_v16 = vld [vmem:[#allocation8 + $0x828] sm:$0xf0]  ;;  %v5719_v18 = vor.u32 %v7113_v9, %v5716_v12  ;;  %v5884_v27 = vld [vmem:[#allocation8 + $0x678] sm:$0xf0] }
  0x64   :  { %2205 = vmatpush.bf16.msrb.mxu1 %v6051_v1  ;;  %v7215_v1 = vld [vmem:[#allocation8 + $0x844] sm:$0xf]  ;;  %v7053_v33 = vld [vmem:[#allocation8 + $0x334] sm:$0xf]  ;;  %v5668_v38 = vld [vmem:[#allocation8 + $0x4c8] sm:$0xf0] }
  0x65   :  { %2219 = vmatpush.bf16.msrb.mxu2 %v5095_v2  ;;  %v6124_v2 = vld [vmem:[#allocation8 + $0x858] sm:$0xf0]  ;;  %v7203_v28 = vld [vmem:[#allocation8 + $0x7e4] sm:$0xf]  ;;  %v7101_v36 = vld [vmem:[#allocation8 + $0x4b4] sm:$0xf] }
  0x66   :  { %2233 = vmatpush.bf16.msrb.mxu3 %v5287_v7  ;;  %v7065_v7 = vld [vmem:[#allocation8 + $0x394] sm:$0xf]  ;;  %v6127_v10 = vor.u32 %v7215_v1, %v6124_v2  ;;  %v5860_v41 = vld [vmem:[#allocation8 + $0x648] sm:$0xf0]  ;;  %v5452_v46 = vld [vmem:[#allocation8 + $0x318] sm:$0xf0]  ;;  %v5671_v49 = vor.u32 %v7101_v36, %v5668_v38 }
  0x67   :  { %2192 = vmatpush.bf16.msrb.mxu0 %v5835_v15  ;;  %v7209_v15 = vld [vmem:[#allocation8 + $0x814] sm:$0xf]  ;;  %v5527_v17 = vor.u32 %v7065_v7, %v5524_v8  ;;  %v7095_v47 = vld [vmem:[#allocation8 + $0x484] sm:$0xf]  ;;  %v5836_v52 = vld [vmem:[#allocation8 + $0x618] sm:$0xf0] }
  0x68   :  { %2206 = vmatpush.bf16.msrb.mxu1 %v6027_v19  ;;  %v5911_v19 = vor.u32 %v7161_v13, %v5908_v14  ;;  %v6103_v24 = vor.u32 %v7209_v15, %v6100_v16  ;;  %v7149_v40 = vld [vmem:[#allocation8 + $0x634] sm:$0xf]  ;;  %v7143_v51 = vld [vmem:[#allocation8 + $0x604] sm:$0xf]  ;;  %v6997_v57 = vld [vmem:[#allocation8 + $0x16c] sm:$0xf0] }
  0x69   :  { %2220 = vmatpush.bf16.msrb.mxu2 %v5071_v20  ;;  %v7059_v20 = vld [vmem:[#allocation8 + $0x364] sm:$0xf]  ;;  %v5863_v50 = vor.u32 %v7149_v40, %v5860_v41  ;;  %v5434_v59 = vld [vmem:[#allocation8 + $0x2d8] sm:$0xf]  ;;  %v7045_v60 = vld [vmem:[#allocation8 + $0x2ec] sm:$0xf0]  ;;  %v5839_v1 = vor.u32 %v7143_v51, %v5836_v52 }
  0x6a   :  { %2234 = vmatpush.bf16.msrb.mxu3 %v5263_v25  ;;  %2193 = vmatmul.bf16.vlgmr.msrb.gmra.mxu0 %v7874_v35  ;;  %v5692_v25 = vld [vmem:[#allocation8 + $0x4f8] sm:$0xf0]  ;;  %v7191_v53 = vld [vmem:[#allocation8 + $0x784] sm:$0xf]  ;;  %v5626_v62 = vld [vmem:[#allocation8 + $0x458] sm:$0xf]  ;;  %v5435_v7 = vor.u32 %v7045_v60, %v5434_v59 }
  0x6b   :  { %2241 = vmatpush.bf16.msra.mxu0 %v5623_v26  ;;  %2207 = vmatmul.bf16.vlgmr.msrb.gmra.mxu1 %v7876_v39  ;;  %v7155_v26 = vld [vmem:[#allocation8 + $0x664] sm:$0xf]  ;;  %v5695_v31 = vor.u32 %v7107_v22, %v5692_v25  ;;  %v7093_v63 = vld [vmem:[#allocation8 + $0x46c] sm:$0xf0]  ;;  %v5818_v2 = vld [vmem:[#allocation8 + $0x5d8] sm:$0xf] }
  0x6c   :  { %2255 = vmatpush.bf16.msra.mxu1 %v5815_v29  ;;  %2221 = vmatmul.bf16.vlgmr.msrb.gmra.mxu2 %v7862_v58  ;;  %v6076_v29 = vld [vmem:[#allocation8 + $0x7f8] sm:$0xf0]  ;;  %v5887_v32 = vor.u32 %v7155_v26, %v5884_v27  ;;  %v5627_v8 = vor.u32 %v7093_v63, %v5626_v62  ;;  %v5218_v9 = vld [vmem:[#allocation8 + $0x128] sm:$0xf]  ;;  %v7039_v14 = vld [vmem:[#allocation8 + $0x2bc] sm:$0xf0] }
  0x6d   :  { %2269 = vmatpush.bf16.msra.mxu2 %v6007_v30  ;;  %2235 = vmatmul.bf16.vlgmr.msrb.gmra.mxu3 %v7865_v5  ;;  %v5503_v30 = vor.u32 %v7059_v20, %v5500_v21  ;;  %v6079_v37 = vor.u32 %v7203_v28, %v6076_v29  ;;  %v5410_v12 = vld [vmem:[#allocation8 + $0x2a8] sm:$0xf]  ;;  %v7087_v16 = vld [vmem:[#allocation8 + $0x43c] sm:$0xf0]  ;;  %v5194_v22 = vld [vmem:[#allocation8 + $0xf8] sm:$0xf] }
  0x6e   :  { %2283 = vmatpush.bf16.msra.mxu3 %v6199_v34  ;;  %v5476_v34 = vld [vmem:[#allocation8 + $0x348] sm:$0xf0]  ;;  %v5602_v15 = vld [vmem:[#allocation8 + $0x428] sm:$0xf]  ;;  %v5411_v20 = vor.u32 %v7039_v14, %v5410_v12  ;;  %v5386_v25 = vld [vmem:[#allocation8 + $0x278] sm:$0xf] }
  0x6f   :  { %2242 = vmatpush.bf16.msra.mxu0 %v5599_v42  ;;  %v7197_v42 = vld [vmem:[#allocation8 + $0x7b4] sm:$0xf]  ;;  %v5479_v45 = vor.u32 %v7053_v33, %v5476_v34  ;;  %v5603_v21 = vor.u32 %v7087_v16, %v5602_v15  ;;  %v7033_v27 = vld [vmem:[#allocation8 + $0x28c] sm:$0xf0]  ;;  %v5578_v28 = vld [vmem:[#allocation8 + $0x3f8] sm:$0xf] }
  0x70   :  { %2256 = vmatpush.bf16.msra.mxu1 %v5791_v43  ;;  %v6052_v43 = vld [vmem:[#allocation8 + $0x7c8] sm:$0xf0]  ;;  %v7081_v29 = vld [vmem:[#allocation8 + $0x40c] sm:$0xf0]  ;;  %v5387_v33 = vor.u32 %v7033_v27, %v5386_v25  ;;  %v5170_v36 = vld [vmem:[#allocation8 + $0xc8] sm:$0xf] }
  0x71   :  { %2270 = vmatpush.bf16.msra.mxu2 %v5983_v44  ;;  %v7047_v44 = vld [vmem:[#allocation8 + $0x304] sm:$0xf]  ;;  %v5579_v34 = vor.u32 %v7081_v29, %v5578_v28  ;;  %v5362_v38 = vld [vmem:[#allocation8 + $0x248] sm:$0xf]  ;;  %v7027_v41 = vld [vmem:[#allocation8 + $0x25c] sm:$0xf0] }
  0x72   :  { %2284 = vmatpush.bf16.msra.mxu3 %v6175_v48  ;;  %v5644_v48 = vld [vmem:[#allocation8 + $0x498] sm:$0xf0]  ;;  %v5338_v51 = vld [vmem:[#allocation8 + $0x218] sm:$0xf]  ;;  %v5122_v62 = vld [vmem:[#allocation8 + $0x68] sm:$0xf] }
  0x73   :  { %2243 = vmatpush.bf16.msra.mxu0 %v5575_v54  ;;  %v6055_v54 = vor.u32 %v7197_v42, %v6052_v43  ;;  %v5647_v0 = vor.u32 %v7095_v47, %v5644_v48  ;;  %v5554_v42 = vld [vmem:[#allocation8 + $0x3c8] sm:$0xf]  ;;  %v7075_v43 = vld [vmem:[#allocation8 + $0x3dc] sm:$0xf0]  ;;  %v5363_v47 = vor.u32 %v7027_v41, %v5362_v38  ;;  %v5098_v12 = vld [vmem:[#allocation8 + $0x38] sm:$0xf] }
  0x74   :  { %2257 = vmatpush.bf16.msra.mxu1 %v5767_v55  ;;  %v6028_v55 = vld [vmem:[#allocation8 + $0x798] sm:$0xf0]  ;;  %v5555_v48 = vor.u32 %v7075_v43, %v5554_v42  ;;  %v6967_v63 = vld [vmem:[#allocation8 + $0x7c] sm:$0xf0]  ;;  %v5290_v14 = vld [vmem:[#allocation8 + $0x1b8] sm:$0xf] }
  0x75   :  { %2271 = vmatpush.bf16.msra.mxu2 %v5959_v56  ;;  %v5242_v56 = vld [vmem:[#allocation8 + $0x158] sm:$0xf]  ;;  %v7009_v16 = vld [vmem:[#allocation8 + $0x1cc] sm:$0xf0]  ;;  %v5266_v27 = vld [vmem:[#allocation8 + $0x188] sm:$0xf] }
  0x76   :  { %2285 = vmatpush.bf16.msra.mxu3 %v6151_v61  ;;  %v5455_v61 = vor.u32 %v7047_v44, %v5452_v46  ;;  %v5746_v44 = vld [vmem:[#allocation8 + $0x548] sm:$0xf]  ;;  %v5291_v25 = vor.u32 %v7009_v16, %v5290_v14  ;;  %v7003_v28 = vld [vmem:[#allocation8 + $0x19c] sm:$0xf0]  ;;  %v6994_v41 = vld [vmem:[#allocation8 + $0x15c] sm:$0xf] }
  0x77   :  { %2244 = vmatpush.bf16.msra.mxu0 %v5551_v3  ;;  %v7141_v3 = vld [vmem:[#allocation8 + $0x5ec] sm:$0xf0]  ;;  %v5458_v29 = vld [vmem:[#allocation8 + $0x308] sm:$0xf]  ;;  %v5244_v42 = vld [vmem:[#allocation8 + $0x170] sm:$0xf0]  ;;  %v5267_v43 = vor.u32 %v7003_v28, %v5266_v27 }
  0x78   :  { %2258 = vmatpush.bf16.msra.mxu1 %v5743_v4  ;;  %v6031_v4 = vor.u32 %v7191_v53, %v6028_v55  ;;  %v5819_v13 = vor.u32 %v7141_v3, %v5818_v2  ;;  %v7021_v53 = vld [vmem:[#allocation8 + $0x22c] sm:$0xf0]  ;;  %v7015_v2 = vld [vmem:[#allocation8 + $0x1fc] sm:$0xf0]  ;;  %v5506_v3 = vld [vmem:[#allocation8 + $0x368] sm:$0xf] }
  0x79   :  { %2272 = vmatpush.bf16.msra.mxu2 %v5935_v6  ;;  %v5243_v6 = vor.u32 %v6997_v57, %v5242_v56  ;;  %v7069_v55 = vld [vmem:[#allocation8 + $0x3ac] sm:$0xf0]  ;;  %v5722_v56 = vld [vmem:[#allocation8 + $0x518] sm:$0xf]  ;;  %v5339_v60 = vor.u32 %v7021_v53, %v5338_v51  ;;  %v5986_v51 = vld [vmem:[#allocation8 + $0x728] sm:$0xf] }
  0x7a   :  { %2286 = vmatpush.bf16.msra.mxu3 %v6127_v10  ;;  %v6991_v10 = vld [vmem:[#allocation8 + $0x13c] sm:$0xf0]  ;;  %v7117_v57 = vld [vmem:[#allocation8 + $0x52c] sm:$0xf0]  ;;  %v6178_v53 = vld [vmem:[#allocation8 + $0x8a8] sm:$0xf] }
  0x7b   :  { %2245 = vmatpush.bf16.msra.mxu0 %v5527_v17  ;;  %v5794_v17 = vld [vmem:[#allocation8 + $0x5a8] sm:$0xf]  ;;  %v5914_v27 = vld [vmem:[#allocation8 + $0x698] sm:$0xf]  ;;  %v7165_v28 = vld [vmem:[#allocation8 + $0x6ac] sm:$0xf0] }
  0x7c   :  { %2259 = vmatpush.bf16.msra.mxu1 %v5719_v18  ;;  %v7135_v18 = vld [vmem:[#allocation8 + $0x5bc] sm:$0xf0]  ;;  %v5938_v14 = vld [vmem:[#allocation8 + $0x6c8] sm:$0xf]  ;;  %s7761_s10 = smov 64   ;;  %vm3004_vm0 = vcmask 523264  }
  0x7d   :  { %2273 = vmatpush.bf16.msra.mxu2 %v5911_v19  ;;  %v5219_v19 = vor.u32 %v6991_v10, %v5218_v9  ;;  %v5795_v26 = vor.u32 %v7135_v18, %v5794_v17  ;;  %v5482_v17 = vld [vmem:[#allocation8 + $0x338] sm:$0xf]  ;;  %v7057_v18 = vld [vmem:[#allocation8 + $0x34c] sm:$0xf0]  ;;  %v6130_v16 = vld [vmem:[#allocation8 + $0x848] sm:$0xf] }
  0x7e   :  { %2287 = vmatpush.bf16.msra.mxu3 %v6103_v24  ;;  %v6985_v24 = vld [vmem:[#allocation8 + $0x10c] sm:$0xf0]  ;;  %s5023_s0 = sshll.u32 %s8838_s11, 4  ;;  %s5024_s0 = int_to_ptr.hbm [resolvable:$true] %s5023_s0 }
  0x7f   :  { %2246 = vmatpush.bf16.msra.mxu0 %v5503_v30  ;;  %v5770_v30 = vld [vmem:[#allocation8 + $0x578] sm:$0xf] }
  0x80   :  { %2260 = vmatpush.bf16.msra.mxu1 %v5695_v31  ;;  %v7129_v31 = vld [vmem:[#allocation8 + $0x58c] sm:$0xf0] }
  0x81   :  { %2274 = vmatpush.bf16.msra.mxu2 %v5887_v32  ;;  %v5195_v32 = vor.u32 %v6985_v24, %v5194_v22  ;;  %v5771_v40 = vor.u32 %v7129_v31, %v5770_v30  ;;  %v5074_v22 = vld [vmem:[#allocation8 + $0x8] sm:$0xf]  ;;  %v6955_v24 = vld [vmem:[#allocation8 + $0x1c] sm:$0xf0] }
  0x82   :  { %2288 = vmatpush.bf16.msra.mxu3 %v6079_v37  ;;  %v6979_v37 = vld [vmem:[#allocation8 + $0xdc] sm:$0xf0]  ;;  %v5075_v38 = vor.u32 %v6955_v24, %v5074_v22  ;;  %v5364_v22 = vld [vmem:[#allocation8 + $0x260] sm:$0xf0] }
  0x83   :  { %2247 = vmatpush.bf16.msra.mxu0 %v5479_v45  ;;  %v7123_v45 = vld [vmem:[#allocation8 + $0x55c] sm:$0xf0]  ;;  %v5171_v46 = vor.u32 %v6979_v37, %v5170_v36  ;;  %v7189_v36 = vld [vmem:[#allocation8 + $0x76c] sm:$0xf0]  ;;  %v6202_v37 = vld [vmem:[#allocation8 + $0x8d8] sm:$0xf] }
  0x84   :  { %2261 = vmatpush.bf16.msra.mxu1 %v5671_v49  ;;  %v5146_v49 = vld [vmem:[#allocation8 + $0x98] sm:$0xf]  ;;  %v5747_v52 = vor.u32 %v7123_v45, %v5746_v44  ;;  %v7051_v31 = vld [vmem:[#allocation8 + $0x31c] sm:$0xf0]  ;;  %v7042_v45 = vld [vmem:[#allocation8 + $0x2dc] sm:$0xf] }
  0x85   :  { %2275 = vmatpush.bf16.msra.mxu2 %v5863_v50  ;;  %v6973_v50 = vld [vmem:[#allocation8 + $0xac] sm:$0xf0]  ;;  %v5459_v44 = vor.u32 %v7051_v31, %v5458_v29  ;;  %v6106_v29 = vld [vmem:[#allocation8 + $0x818] sm:$0xf] }
  0x86   :  { %2289 = vmatpush.bf16.msra.mxu3 %v6055_v54  ;;  %v5530_v54 = vld [vmem:[#allocation8 + $0x398] sm:$0xf]  ;;  %v5147_v59 = vor.u32 %v6973_v50, %v5146_v49  ;;  %v5247_v50 = vor.u32 %v6994_v41, %v5244_v42  ;;  %v7213_v31 = vld [vmem:[#allocation8 + $0x82c] sm:$0xf0]  ;;  %v5890_v41 = vld [vmem:[#allocation8 + $0x668] sm:$0xf] }
  0x87   :  { %2248 = vmatpush.bf16.msra.mxu0 %v5455_v61  ;;  %v5531_v61 = vor.u32 %v7069_v55, %v5530_v54  ;;  %v7231_v55 = vld [vmem:[#allocation8 + $0x8bc] sm:$0xf0] }
  0x88   :  { %2262 = vmatpush.bf16.msra.mxu1 %v5647_v0  ;;  %v5314_v0 = vld [vmem:[#allocation8 + $0x1e8] sm:$0xf]  ;;  %v7159_v42 = vld [vmem:[#allocation8 + $0x67c] sm:$0xf0] }
  0x89   :  { %2276 = vmatpush.bf16.msra.mxu2 %v5839_v1  ;;  %v5723_v1 = vor.u32 %v7117_v57, %v5722_v56  ;;  %v5315_v9 = vor.u32 %v7015_v2, %v5314_v0  ;;  %v6988_v56 = vld [vmem:[#allocation8 + $0x12c] sm:$0xf]  ;;  %v5220_v57 = vld [vmem:[#allocation8 + $0x140] sm:$0xf0]  ;;  %v5962_v0 = vld [vmem:[#allocation8 + $0x6f8] sm:$0xf] }
  0x8a   :  { %2290 = vmatpush.bf16.msra.mxu3 %v6031_v4  ;;  %2249 = vmatmul.bf16.vlgmr.msra.gmra.mxu0 %v7867_v11  ;;  %v7063_v4 = vld [vmem:[#allocation8 + $0x37c] sm:$0xf0]  ;;  %v6154_v2 = vld [vmem:[#allocation8 + $0x878] sm:$0xf] }
  0x8b   :  { %2297 = vmatpush.bf16.msrb.mxu0 %v5243_v6  ;;  %2263 = vmatmul.bf16.vlgmr.msra.gmra.mxu1 %v7871_v23  ;;  %v5698_v6 = vld [vmem:[#allocation8 + $0x4e8] sm:$0xf]  ;;  %v5507_v10 = vor.u32 %v7063_v4, %v5506_v3  ;;  %v7225_v4 = vld [vmem:[#allocation8 + $0x88c] sm:$0xf0] }
  0x8c   :  { %2311 = vmatpush.bf16.msrb.mxu1 %v5435_v7  ;;  %2277 = vmatmul.bf16.vlgmr.msra.gmra.mxu2 %v7874_v35  ;;  %v7111_v7 = vld [vmem:[#allocation8 + $0x4fc] sm:$0xf0] }
  0x8d   :  { %2325 = vmatpush.bf16.msrb.mxu2 %v5627_v8  ;;  %2291 = vmatmul.bf16.vlgmr.msra.gmra.mxu3 %v7876_v39  ;;  %v5123_v8 = vor.u32 %v6967_v63, %v5122_v62  ;;  %v5699_v15 = vor.u32 %v7111_v7, %v5698_v6  ;;  %v6179_v62 = vor.u32 %v7231_v55, %v6178_v53  ;;  %v6982_v6 = vld [vmem:[#allocation8 + $0xfc] sm:$0xf]  ;;  %v5196_v7 = vld [vmem:[#allocation8 + $0x110] sm:$0xf0]  ;;  %v5866_v53 = vld [vmem:[#allocation8 + $0x638] sm:$0xf] }
  0x8e   :  { %2339 = vmatpush.bf16.msrb.mxu3 %v5819_v13  ;;  %v6961_v13 = vld [vmem:[#allocation8 + $0x4c] sm:$0xf0]  ;;  %v5223_v63 = vor.u32 %v6988_v56, %v5220_v57  ;;  %v6058_v55 = vld [vmem:[#allocation8 + $0x7b8] sm:$0xf] }
  0x8f   :  { %2298 = vmatpush.bf16.msrb.mxu0 %v5219_v19  ;;  %v5674_v19 = vld [vmem:[#allocation8 + $0x4b8] sm:$0xf]  ;;  %v7201_v57 = vld [vmem:[#allocation8 + $0x7cc] sm:$0xf0] }
  0x90   :  { %2312 = vmatpush.bf16.msrb.mxu1 %v5411_v20  ;;  %v7105_v20 = vld [vmem:[#allocation8 + $0x4cc] sm:$0xf0] }
  0x91   :  { %2326 = vmatpush.bf16.msrb.mxu2 %v5603_v21  ;;  %v5099_v21 = vor.u32 %v6961_v13, %v5098_v12  ;;  %v5675_v30 = vor.u32 %v7105_v20, %v5674_v19  ;;  %v6155_v12 = vor.u32 %v7225_v4, %v6154_v2  ;;  %v5199_v13 = vor.u32 %v6982_v6, %v5196_v7  ;;  %v6976_v19 = vld [vmem:[#allocation8 + $0xcc] sm:$0xf]  ;;  %v5172_v20 = vld [vmem:[#allocation8 + $0xe0] sm:$0xf0]  ;;  %v6034_v4 = vld [vmem:[#allocation8 + $0x788] sm:$0xf] }
  0x92   :  { %2340 = vmatpush.bf16.msrb.mxu3 %v5795_v26  ;;  %v5483_v26 = vor.u32 %v7057_v18, %v5482_v17  ;;  %v7219_v18 = vld [vmem:[#allocation8 + $0x85c] sm:$0xf0]  ;;  %v6059_v2 = vor.u32 %v7201_v57, %v6058_v55  ;;  %v6952_v7 = vld [vmem:[#allocation8 + $0xc] sm:$0xf] }
  0x93   :  { %2299 = vmatpush.bf16.msrb.mxu0 %v5195_v32  ;;  %v5650_v32 = vld [vmem:[#allocation8 + $0x488] sm:$0xf]  ;;  %v7195_v6 = vld [vmem:[#allocation8 + $0x79c] sm:$0xf0]  ;;  %v7072_v55 = vld [vmem:[#allocation8 + $0x3cc] sm:$0xf] }
  0x94   :  { %2313 = vmatpush.bf16.msrb.mxu1 %v5387_v33  ;;  %v7099_v33 = vld [vmem:[#allocation8 + $0x49c] sm:$0xf0]  ;;  %v7120_v57 = vld [vmem:[#allocation8 + $0x54c] sm:$0xf] }
  0x95   :  { %2327 = vmatpush.bf16.msrb.mxu2 %v5579_v34  ;;  %v6010_v34 = vld [vmem:[#allocation8 + $0x758] sm:$0xf] }
  0x96   :  { %2341 = vmatpush.bf16.msrb.mxu3 %v5771_v40  ;;  %v7237_v40 = vld [vmem:[#allocation8 + $0x8ec] sm:$0xf0] }
  0x97   :  { %2300 = vmatpush.bf16.msrb.mxu0 %v5171_v46  ;;  %v5436_v46 = vld [vmem:[#allocation8 + $0x2f0] sm:$0xf0]  ;;  %v6203_v49 = vor.u32 %v7237_v40, %v6202_v37  ;;  %v5915_v37 = vor.u32 %v7165_v28, %v5914_v27 }
  0x98   :  { %2314 = vmatpush.bf16.msrb.mxu1 %v5363_v47  ;;  %v5651_v47 = vor.u32 %v7099_v33, %v5650_v32  ;;  %v5439_v54 = vor.u32 %v7042_v45, %v5436_v46  ;;  %v6970_v32 = vld [vmem:[#allocation8 + $0x9c] sm:$0xf]  ;;  %v5148_v33 = vld [vmem:[#allocation8 + $0xb0] sm:$0xf0]  ;;  %v7207_v45 = vld [vmem:[#allocation8 + $0x7fc] sm:$0xf0] }
  0x99   :  { %2328 = vmatpush.bf16.msrb.mxu2 %v5555_v48  ;;  %v6011_v48 = vor.u32 %v7189_v36, %v6010_v34  ;;  %v7018_v34 = vld [vmem:[#allocation8 + $0x21c] sm:$0xf]  ;;  %v5340_v36 = vld [vmem:[#allocation8 + $0x230] sm:$0xf0]  ;;  %v5151_v40 = vor.u32 %v6970_v32, %v5148_v33  ;;  %v6964_v46 = vld [vmem:[#allocation8 + $0x6c] sm:$0xf] }
  0x9a   :  { %2342 = vmatpush.bf16.msrb.mxu3 %v5747_v52  ;;  %v7183_v52 = vld [vmem:[#allocation8 + $0x73c] sm:$0xf0]  ;;  %v5796_v33 = vld [vmem:[#allocation8 + $0x5c0] sm:$0xf0] }
  0x9b   :  { %2301 = vmatpush.bf16.msrb.mxu0 %v5147_v59  ;;  %v7036_v59 = vld [vmem:[#allocation8 + $0x2ac] sm:$0xf] }
  0x9c   :  { %2315 = vmatpush.bf16.msrb.mxu1 %v5339_v60  ;;  %v5412_v60 = vld [vmem:[#allocation8 + $0x2c0] sm:$0xf0] }
  0x9d   :  { %2329 = vmatpush.bf16.msrb.mxu2 %v5531_v61  ;;  %v5987_v61 = vor.u32 %v7183_v52, %v5986_v51  ;;  %v5415_v3 = vor.u32 %v7036_v59, %v5412_v60  ;;  %v6958_v59 = vld [vmem:[#allocation8 + $0x3c] sm:$0xf]  ;;  %v5100_v60 = vld [vmem:[#allocation8 + $0x50] sm:$0xf0] }
  0x9e   :  { %2343 = vmatpush.bf16.msrb.mxu3 %v5723_v1  ;;  %v7177_v1 = vld [vmem:[#allocation8 + $0x70c] sm:$0xf0] }
  0x9f   :  { %2302 = vmatpush.bf16.msrb.mxu0 %v5123_v8  ;;  %v7030_v8 = vld [vmem:[#allocation8 + $0x27c] sm:$0xf] }
  0xa0   :  { %2316 = vmatpush.bf16.msrb.mxu1 %v5315_v9  ;;  %v5388_v9 = vld [vmem:[#allocation8 + $0x290] sm:$0xf0] }
  0xa1   :  { %2330 = vmatpush.bf16.msrb.mxu2 %v5507_v10  ;;  %v5963_v10 = vor.u32 %v7177_v1, %v5962_v0  ;;  %v5391_v17 = vor.u32 %v7030_v8, %v5388_v9  ;;  %v5842_v0 = vld [vmem:[#allocation8 + $0x608] sm:$0xf]  ;;  %v7147_v1 = vld [vmem:[#allocation8 + $0x61c] sm:$0xf0]  ;;  %v5076_v9 = vld [vmem:[#allocation8 + $0x20] sm:$0xf0] }
  0xa2   :  { %2344 = vmatpush.bf16.msrb.mxu3 %v5699_v15  ;;  %v7171_v15 = vld [vmem:[#allocation8 + $0x6dc] sm:$0xf0] }
  0xa3   :  { %2303 = vmatpush.bf16.msrb.mxu0 %v5099_v21  ;;  %v7024_v21 = vld [vmem:[#allocation8 + $0x24c] sm:$0xf]  ;;  %v5939_v24 = vor.u32 %v7171_v15, %v5938_v14  ;;  %v5628_v14 = vld [vmem:[#allocation8 + $0x470] sm:$0xf0]  ;;  %v7138_v15 = vld [vmem:[#allocation8 + $0x5dc] sm:$0xf] }
  0xa4   :  { %2317 = vmatpush.bf16.msrb.mxu1 %v5291_v25  ;;  %v6131_v25 = vor.u32 %v7219_v18, %v6130_v16  ;;  %v5843_v16 = vor.u32 %v7147_v1, %v5842_v0  ;;  %v7186_v18 = vld [vmem:[#allocation8 + $0x75c] sm:$0xf]  ;;  %v6132_v0 = vld [vmem:[#allocation8 + $0x860] sm:$0xf0] }
  0xa5   :  { %2331 = vmatpush.bf16.msrb.mxu2 %v5483_v26  ;;  %v5175_v26 = vor.u32 %v6976_v19, %v5172_v20  ;;  %v6012_v19 = vld [vmem:[#allocation8 + $0x770] sm:$0xf0]  ;;  %v6035_v20 = vor.u32 %v7195_v6, %v6034_v4  ;;  %v7066_v4 = vld [vmem:[#allocation8 + $0x39c] sm:$0xf] }
  0xa6   :  { %2345 = vmatpush.bf16.msrb.mxu3 %v5675_v30  ;;  %v5367_v30 = vor.u32 %v7024_v21, %v5364_v22  ;;  %v5079_v21 = vor.u32 %v6952_v7, %v5076_v9  ;;  %v7234_v22 = vld [vmem:[#allocation8 + $0x8dc] sm:$0xf]  ;;  %v6015_v28 = vor.u32 %v7186_v18, %v6012_v19  ;;  %v5532_v6 = vld [vmem:[#allocation8 + $0x3b0] sm:$0xf0] }
  0xa7   :  { %2304 = vmatpush.bf16.msrb.mxu0 %v5075_v38  ;;  %v6107_v38 = vor.u32 %v7213_v31, %v6106_v29  ;;  %v7084_v29 = vld [vmem:[#allocation8 + $0x42c] sm:$0xf]  ;;  %v7114_v7 = vld [vmem:[#allocation8 + $0x51c] sm:$0xf]  ;;  %v5724_v9 = vld [vmem:[#allocation8 + $0x530] sm:$0xf0] }
  0xa8   :  { %2318 = vmatpush.bf16.msrb.mxu1 %v5267_v43  ;;  %v6082_v43 = vld [vmem:[#allocation8 + $0x7e8] sm:$0xf]  ;;  %v7132_v31 = vld [vmem:[#allocation8 + $0x5ac] sm:$0xf]  ;;  %v5727_v19 = vor.u32 %v7114_v7, %v5724_v9  ;;  %v7142_v9 = vld [vmem:[#allocation8 + $0x5f4] sm:$0xf0] }
  0xa9   :  { %2332 = vmatpush.bf16.msrb.mxu2 %v5459_v44  ;;  %v5343_v44 = vor.u32 %v7018_v34, %v5340_v36  ;;  %v6083_v51 = vor.u32 %v7207_v45, %v6082_v43  ;;  %v7180_v34 = vld [vmem:[#allocation8 + $0x72c] sm:$0xf]  ;;  %v5988_v36 = vld [vmem:[#allocation8 + $0x740] sm:$0xf0]  ;;  %v7078_v43 = vld [vmem:[#allocation8 + $0x3fc] sm:$0xf] }
  0xaa   :  { %2346 = vmatpush.bf16.msrb.mxu3 %v5651_v47  ;;  %2305 = vmatmul.bf16.vlgmr.msrb.gmra.mxu0 %v7862_v58  ;;  %v5124_v47 = vld [vmem:[#allocation8 + $0x80] sm:$0xf0]  ;;  %v7126_v45 = vld [vmem:[#allocation8 + $0x57c] sm:$0xf] }
  0xab   :  { %2353 = vmatpush.bf16.msra.mxu0 %v6011_v48  ;;  %2319 = vmatmul.bf16.vlgmr.msrb.gmra.mxu1 %v7865_v5  ;;  %v7012_v48 = vld [vmem:[#allocation8 + $0x1ec] sm:$0xf]  ;;  %v5127_v52 = vor.u32 %v6964_v46, %v5124_v47  ;;  %v5772_v47 = vld [vmem:[#allocation8 + $0x590] sm:$0xf0] }
  0xac   :  { %2367 = vmatpush.bf16.msra.mxu1 %v6203_v49  ;;  %2333 = vmatmul.bf16.vlgmr.msrb.gmra.mxu2 %v7867_v11  ;;  %v5316_v49 = vld [vmem:[#allocation8 + $0x200] sm:$0xf0] }
  0xad   :  { %2381 = vmatpush.bf16.msra.mxu2 %v5247_v50  ;;  %2347 = vmatmul.bf16.vlgmr.msrb.gmra.mxu3 %v7871_v23  ;;  %v5891_v50 = vor.u32 %v7159_v42, %v5890_v41  ;;  %v5319_v56 = vor.u32 %v7012_v48, %v5316_v49  ;;  %v5799_v41 = vor.u32 %v7132_v31, %v5796_v33  ;;  %v7174_v48 = vld [vmem:[#allocation8 + $0x6fc] sm:$0xf]  ;;  %v5964_v49 = vld [vmem:[#allocation8 + $0x710] sm:$0xf0] }
  0xae   :  { %2395 = vmatpush.bf16.msra.mxu3 %v5439_v54  ;;  %v7153_v54 = vld [vmem:[#allocation8 + $0x64c] sm:$0xf0]  ;;  %v5991_v42 = vor.u32 %v7180_v34, %v5988_v36  ;;  %v7054_v34 = vld [vmem:[#allocation8 + $0x33c] sm:$0xf]  ;;  %v5484_v36 = vld [vmem:[#allocation8 + $0x350] sm:$0xf0] }
  0xaf   :  { %2354 = vmatpush.bf16.msra.mxu0 %v5987_v61  ;;  %v7006_v61 = vld [vmem:[#allocation8 + $0x1bc] sm:$0xf] }
  0xb0   :  { %2368 = vmatpush.bf16.msra.mxu1 %v6179_v62  ;;  %v5292_v62 = vld [vmem:[#allocation8 + $0x1d0] sm:$0xf0] }
  0xb1   :  { %2382 = vmatpush.bf16.msra.mxu2 %v5223_v63  ;;  %v5867_v63 = vor.u32 %v7153_v54, %v5866_v53  ;;  %v5295_v8 = vor.u32 %v7006_v61, %v5292_v62  ;;  %v5775_v53 = vor.u32 %v7126_v45, %v5772_v47  ;;  %v5967_v54 = vor.u32 %v7174_v48, %v5964_v49  ;;  %v7168_v61 = vld [vmem:[#allocation8 + $0x6cc] sm:$0xf]  ;;  %v5940_v62 = vld [vmem:[#allocation8 + $0x6e0] sm:$0xf0]  ;;  %v6060_v45 = vld [vmem:[#allocation8 + $0x7d0] sm:$0xf0] }
  0xb2   :  { %2396 = vmatpush.bf16.msra.mxu3 %v5415_v3  ;;  %v5103_v3 = vor.u32 %v6958_v59, %v5100_v60  ;;  %v5748_v60 = vld [vmem:[#allocation8 + $0x560] sm:$0xf0]  ;;  %v5487_v47 = vor.u32 %v7054_v34, %v5484_v36  ;;  %v7048_v48 = vld [vmem:[#allocation8 + $0x30c] sm:$0xf]  ;;  %v7034_v34 = vld [vmem:[#allocation8 + $0x294] sm:$0xf0] }
  0xb3   :  { %2355 = vmatpush.bf16.msra.mxu0 %v5963_v10  ;;  %v7000_v10 = vld [vmem:[#allocation8 + $0x18c] sm:$0xf]  ;;  %v5460_v49 = vld [vmem:[#allocation8 + $0x320] sm:$0xf0]  ;;  %v5586_v36 = vld [vmem:[#allocation8 + $0x400] sm:$0xf] }
  0xb4   :  { %2369 = vmatpush.bf16.msra.mxu1 %v6155_v12  ;;  %v5268_v12 = vld [vmem:[#allocation8 + $0x1a0] sm:$0xf0] }
  0xb5   :  { %2383 = vmatpush.bf16.msra.mxu2 %v5199_v13  ;;  %v7090_v13 = vld [vmem:[#allocation8 + $0x45c] sm:$0xf] }
  0xb6   :  { %2397 = vmatpush.bf16.msra.mxu3 %v5391_v17  ;;  %v5820_v17 = vld [vmem:[#allocation8 + $0x5f0] sm:$0xf0] }
  0xb7   :  { %2356 = vmatpush.bf16.msra.mxu0 %v5939_v24  ;;  %v6204_v24 = vld [vmem:[#allocation8 + $0x8f0] sm:$0xf0]  ;;  %v5823_v27 = vor.u32 %v7138_v15, %v5820_v17  ;;  %v5535_v17 = vor.u32 %v7066_v4, %v5532_v6  ;;  %v7094_v4 = vld [vmem:[#allocation8 + $0x474] sm:$0xf0] }
  0xb8   :  { %2370 = vmatpush.bf16.msra.mxu1 %v6131_v25  ;;  %v5271_v25 = vor.u32 %v7000_v10, %v5268_v12  ;;  %v6207_v32 = vor.u32 %v7234_v22, %v6204_v24  ;;  %v7162_v10 = vld [vmem:[#allocation8 + $0x69c] sm:$0xf]  ;;  %v5916_v12 = vld [vmem:[#allocation8 + $0x6b0] sm:$0xf0]  ;;  %v5508_v22 = vld [vmem:[#allocation8 + $0x380] sm:$0xf0] }
  0xb9   :  { %2384 = vmatpush.bf16.msra.mxu2 %v5175_v26  ;;  %v5631_v26 = vor.u32 %v7090_v13, %v5628_v14  ;;  %v7210_v13 = vld [vmem:[#allocation8 + $0x81c] sm:$0xf]  ;;  %v6108_v14 = vld [vmem:[#allocation8 + $0x830] sm:$0xf0]  ;;  %v7108_v24 = vld [vmem:[#allocation8 + $0x4ec] sm:$0xf] }
  0xba   :  { %2398 = vmatpush.bf16.msra.mxu3 %v5367_v30  ;;  %v5604_v30 = vld [vmem:[#allocation8 + $0x440] sm:$0xf0] }
  0xbb   :  { %2357 = vmatpush.bf16.msra.mxu0 %v5915_v37  ;;  %v7228_v37 = vld [vmem:[#allocation8 + $0x8ac] sm:$0xf] }
  0xbc   :  { %2371 = vmatpush.bf16.msra.mxu1 %v6107_v38  ;;  %v6180_v38 = vld [vmem:[#allocation8 + $0x8c0] sm:$0xf0] }
  0xbd   :  { %2385 = vmatpush.bf16.msra.mxu2 %v5151_v40  ;;  %v5607_v40 = vor.u32 %v7084_v29, %v5604_v30  ;;  %v6183_v46 = vor.u32 %v7228_v37, %v6180_v38  ;;  %v7204_v29 = vld [vmem:[#allocation8 + $0x7ec] sm:$0xf]  ;;  %v6084_v30 = vld [vmem:[#allocation8 + $0x800] sm:$0xf0]  ;;  %v7102_v37 = vld [vmem:[#allocation8 + $0x4bc] sm:$0xf] }
  0xbe   :  { %2399 = vmatpush.bf16.msra.mxu3 %v5343_v44  ;;  %v5580_v44 = vld [vmem:[#allocation8 + $0x410] sm:$0xf0]  ;;  %v6087_v38 = vor.u32 %v7204_v29, %v6084_v30  ;;  %v5202_v30 = vld [vmem:[#allocation8 + $0x100] sm:$0xf] }
  0xbf   :  { %2358 = vmatpush.bf16.msra.mxu0 %v5891_v50  ;;  %v7222_v50 = vld [vmem:[#allocation8 + $0x87c] sm:$0xf] }
  0xc0   :  { %2372 = vmatpush.bf16.msra.mxu1 %v6083_v51  ;;  %v6156_v51 = vld [vmem:[#allocation8 + $0x890] sm:$0xf0] }
  0xc1   :  { %2386 = vmatpush.bf16.msra.mxu2 %v5127_v52  ;;  %v5583_v52 = vor.u32 %v7078_v43, %v5580_v44  ;;  %v6159_v59 = vor.u32 %v7222_v50, %v6156_v51  ;;  %v7198_v44 = vld [vmem:[#allocation8 + $0x7bc] sm:$0xf] }
  0xc2   :  { %2400 = vmatpush.bf16.msra.mxu3 %v5319_v56  ;;  %v5556_v56 = vld [vmem:[#allocation8 + $0x3e0] sm:$0xf0] }
  0xc3   :  { %2359 = vmatpush.bf16.msra.mxu0 %v5867_v63  ;;  %v7216_v63 = vld [vmem:[#allocation8 + $0x84c] sm:$0xf]  ;;  %v5559_v1 = vor.u32 %v7072_v55, %v5556_v56  ;;  %v6063_v55 = vor.u32 %v7198_v44, %v6060_v45  ;;  %v5844_v56 = vld [vmem:[#allocation8 + $0x620] sm:$0xf0]  ;;  %v5178_v44 = vld [vmem:[#allocation8 + $0xd0] sm:$0xf] }
  0xc4   :  { %2373 = vmatpush.bf16.msra.mxu1 %v6059_v2  ;;  %v5751_v2 = vor.u32 %v7120_v57, %v5748_v60  ;;  %v7192_v57 = vld [vmem:[#allocation8 + $0x78c] sm:$0xf]  ;;  %v6980_v45 = vld [vmem:[#allocation8 + $0xe4] sm:$0xf0] }
  0xc5   :  { %2387 = vmatpush.bf16.msra.mxu2 %v5103_v3  ;;  %v5943_v3 = vor.u32 %v7168_v61, %v5940_v62  ;;  %v5250_v61 = vld [vmem:[#allocation8 + $0x160] sm:$0xf]  ;;  %v6998_v62 = vld [vmem:[#allocation8 + $0x174] sm:$0xf0] }
  0xc6   :  { %2401 = vmatpush.bf16.msra.mxu3 %v5295_v8  ;;  %v6135_v8 = vor.u32 %v7216_v63, %v6132_v0  ;;  %v5442_v63 = vld [vmem:[#allocation8 + $0x2e0] sm:$0xf] }
  0xc7   :  { %2360 = vmatpush.bf16.msra.mxu0 %v5843_v16  ;;  %v2138_v15 = vpop.f32.mrf.mxu0 }
  0xc8   :  { %2374 = vmatpush.bf16.msra.mxu1 %v6035_v20  ;;  %v2152_v16 = vpop.f32.mrf.mxu1  ;;  %v5919_v20 = vor.u32 %v7162_v10, %v5916_v12  ;;  %v5251_v12 = vor.u32 %v6998_v62, %v5250_v61  ;;  %v5154_v62 = vld [vmem:[#allocation8 + $0xa0] sm:$0xf] }
  0xc9   :  { %2388 = vmatpush.bf16.msra.mxu2 %v5079_v21  ;;  %v2153_v18 = vadd.f32 %v2152_v16, %v2138_v15  ;;  %v7060_v21 = vld [vmem:[#allocation8 + $0x36c] sm:$0xf]  ;;  %v5226_v16 = vld [vmem:[#allocation8 + $0x130] sm:$0xf] }
  0xca   :  { %2402 = vmatpush.bf16.msra.mxu3 %v5271_v25  ;;  %2361 = vmatmul.bf16.vlgmr.msra.gmra.mxu0 %v7874_v35  ;;  %v6111_v25 = vor.u32 %v7210_v13, %v6108_v14  ;;  %v5511_v31 = vor.u32 %v7060_v21, %v5508_v22  ;;  %v5610_v21 = vld [vmem:[#allocation8 + $0x430] sm:$0xf]  ;;  %v7088_v22 = vld [vmem:[#allocation8 + $0x444] sm:$0xf0] }
  0xcb   :  { %2409 = vmatpush.bf16.msrb.mxu0 %v5631_v26  ;;  %2375 = vmatmul.bf16.vlgmr.msra.gmra.mxu1 %v7876_v39  ;;  %v5700_v26 = vld [vmem:[#allocation8 + $0x500] sm:$0xf0]  ;;  %v5611_v29 = vor.u32 %v7088_v22, %v5610_v21  ;;  %v5706_v21 = vld [vmem:[#allocation8 + $0x4f0] sm:$0xf]  ;;  %v7112_v22 = vld [vmem:[#allocation8 + $0x504] sm:$0xf0] }
  0xcc   :  { %2423 = vmatpush.bf16.msrb.mxu1 %v5823_v27  ;;  %2389 = vmatmul.bf16.vlgmr.msra.gmra.mxu2 %v7862_v58  ;;  %v7156_v27 = vld [vmem:[#allocation8 + $0x66c] sm:$0xf] }
  0xcd   :  { %2437 = vmatpush.bf16.msrb.mxu2 %v6015_v28  ;;  %2403 = vmatmul.bf16.vlgmr.msra.gmra.mxu3 %v7865_v5  ;;  %v5892_v28 = vld [vmem:[#allocation8 + $0x680] sm:$0xf0] }
  0xce   :  { %2451 = vmatpush.bf16.msrb.mxu3 %v6207_v32  ;;  %v5703_v32 = vor.u32 %v7108_v24, %v5700_v26  ;;  %v5895_v33 = vor.u32 %v7156_v27, %v5892_v28  ;;  %v5802_v24 = vld [vmem:[#allocation8 + $0x5b0] sm:$0xf] }
  0xcf   :  { %2410 = vmatpush.bf16.msrb.mxu0 %v5607_v40  ;;  %v5676_v40 = vld [vmem:[#allocation8 + $0x4d0] sm:$0xf0]  ;;  %v2166_v43 = vpop.f32.mrf.mxu2  ;;  %v7896_v15 = vpop.f32.mrf.mxu0 }
  0xd0   :  { %2424 = vmatpush.bf16.msrb.mxu1 %v5799_v41  ;;  %v7150_v41 = vld [vmem:[#allocation8 + $0x63c] sm:$0xf]  ;;  %v5679_v50 = vor.u32 %v7102_v37, %v5676_v40  ;;  %v2180_v60 = vpop.f32.mrf.mxu3  ;;  %v7898_v26 = vpop.f32.mrf.mxu1  ;;  %v7082_v37 = vld [vmem:[#allocation8 + $0x414] sm:$0xf0] }
  0xd1   :  { %2438 = vmatpush.bf16.msrb.mxu2 %v5991_v42  ;;  %v5868_v42 = vld [vmem:[#allocation8 + $0x650] sm:$0xf0]  ;;  %v7130_v40 = vld [vmem:[#allocation8 + $0x594] sm:$0xf0] }
  0xd2   :  { %2452 = vmatpush.bf16.msrb.mxu3 %v6183_v46  ;;  %v2167_v46 = vadd.f32 %v2166_v43, %v2153_v18  ;;  %v5871_v51 = vor.u32 %v7150_v41, %v5868_v42  ;;  %v5418_v18 = vld [vmem:[#allocation8 + $0x2b0] sm:$0xf]  ;;  %v5587_v43 = vor.u32 %v7082_v37, %v5586_v36  ;;  %v7010_v36 = vld [vmem:[#allocation8 + $0x1d4] sm:$0xf0]  ;;  %v5490_v37 = vld [vmem:[#allocation8 + $0x340] sm:$0xf] }
  0xd3   :  { %2411 = vmatpush.bf16.msrb.mxu0 %v5583_v52  ;;  %v7096_v52 = vld [vmem:[#allocation8 + $0x48c] sm:$0xf] }
  0xd4   :  { %2425 = vmatpush.bf16.msrb.mxu1 %v5775_v53  ;;  %v5652_v53 = vld [vmem:[#allocation8 + $0x4a0] sm:$0xf0]  ;;  %v7894_v0 = vadd.f32 %v2180_v60, %v2167_v46  ;;  %v5370_v46 = vld [vmem:[#allocation8 + $0x250] sm:$0xf] }
  0xd5   :  { %2439 = vmatpush.bf16.msrb.mxu2 %v5967_v54  ;;  %v7144_v54 = vld [vmem:[#allocation8 + $0x60c] sm:$0xf]  ;;  %v5655_v6 = vor.u32 %v7096_v52, %v5652_v53  ;;  %v5754_v53 = vld [vmem:[#allocation8 + $0x550] sm:$0xf] }
  0xd6   :  { %2453 = vmatpush.bf16.msrb.mxu3 %v6159_v59  ;;  %v6036_v59 = vld [vmem:[#allocation8 + $0x7a0] sm:$0xf0]  ;;  %v5847_v7 = vor.u32 %v7144_v54, %v5844_v56  ;;  %v7124_v54 = vld [vmem:[#allocation8 + $0x564] sm:$0xf0] }
  0xd7   :  { %2412 = vmatpush.bf16.msrb.mxu0 %v5559_v1  ;;  %v5463_v1 = vor.u32 %v7048_v48, %v5460_v49  ;;  %v6039_v10 = vor.u32 %v7192_v57, %v6036_v59  ;;  %v7028_v48 = vld [vmem:[#allocation8 + $0x264] sm:$0xf0]  ;;  %v5562_v49 = vld [vmem:[#allocation8 + $0x3d0] sm:$0xf]  ;;  %v5179_v57 = vor.u32 %v6980_v45, %v5178_v44 }
  0xd8   :  { %2426 = vmatpush.bf16.msrb.mxu1 %v5751_v2  ;;  %v7046_v2 = vld [vmem:[#allocation8 + $0x2f4] sm:$0xf0]  ;;  %v5371_v59 = vor.u32 %v7028_v48, %v5370_v46  ;;  %v6956_v44 = vld [vmem:[#allocation8 + $0x24] sm:$0xf0] }
  0xd9   :  { %2440 = vmatpush.bf16.msrb.mxu2 %v5943_v3  ;;  %v5634_v3 = vld [vmem:[#allocation8 + $0x460] sm:$0xf]  ;;  %v5443_v13 = vor.u32 %v7046_v2, %v5442_v63  ;;  %v6974_v63 = vld [vmem:[#allocation8 + $0xb4] sm:$0xf0]  ;;  %v5755_v2 = vor.u32 %v7124_v54, %v5754_v53  ;;  %v7004_v48 = vld [vmem:[#allocation8 + $0x1a4] sm:$0xf0] }
  0xda   :  { %2454 = vmatpush.bf16.msrb.mxu3 %v6135_v8  ;;  %v5826_v8 = vld [vmem:[#allocation8 + $0x5e0] sm:$0xf]  ;;  %v5635_v14 = vor.u32 %v7094_v4, %v5634_v3  ;;  %v7022_v4 = vld [vmem:[#allocation8 + $0x234] sm:$0xf0]  ;;  %v5658_v53 = vld [vmem:[#allocation8 + $0x490] sm:$0xf] }
  0xdb   :  { %2413 = vmatpush.bf16.msrb.mxu0 %v5535_v17  ;;  %v6992_v17 = vld [vmem:[#allocation8 + $0x144] sm:$0xf0] }
  0xdc   :  { %2427 = vmatpush.bf16.msrb.mxu1 %v5727_v19  ;;  %v5827_v19 = vor.u32 %v7142_v9, %v5826_v8  ;;  %v5227_v27 = vor.u32 %v6992_v17, %v5226_v16  ;;  %v5730_v8 = vld [vmem:[#allocation8 + $0x520] sm:$0xf]  ;;  %v7118_v9 = vld [vmem:[#allocation8 + $0x534] sm:$0xf0]  ;;  %v5322_v16 = vld [vmem:[#allocation8 + $0x1f0] sm:$0xf] }
  0xdd   :  { %2441 = vmatpush.bf16.msrb.mxu2 %v5919_v20  ;;  %v7040_v20 = vld [vmem:[#allocation8 + $0x2c4] sm:$0xf0]  ;;  %v5731_v17 = vor.u32 %v7118_v9, %v5730_v8 }
  0xde   :  { %2455 = vmatpush.bf16.msrb.mxu3 %v6111_v25  ;;  %v7136_v25 = vld [vmem:[#allocation8 + $0x5c4] sm:$0xf0]  ;;  %v5419_v28 = vor.u32 %v7040_v20, %v5418_v18 }
  0xdf   :  { %2414 = vmatpush.bf16.msrb.mxu0 %v5511_v31  ;;  %v6986_v31 = vld [vmem:[#allocation8 + $0x114] sm:$0xf0]  ;;  %v7016_v18 = vld [vmem:[#allocation8 + $0x204] sm:$0xf0] }
  0xe0   :  { %2428 = vmatpush.bf16.msrb.mxu1 %v5703_v32  ;;  %v5394_v32 = vld [vmem:[#allocation8 + $0x280] sm:$0xf]  ;;  %v5203_v41 = vor.u32 %v6986_v31, %v5202_v30  ;;  %v7064_v20 = vld [vmem:[#allocation8 + $0x384] sm:$0xf0] }
  0xe1   :  { %2442 = vmatpush.bf16.msrb.mxu2 %v5895_v33  ;;  %v5803_v33 = vor.u32 %v7136_v25, %v5802_v24  ;;  %v5395_v42 = vor.u32 %v7034_v34, %v5394_v32  ;;  %v5106_v31 = vld [vmem:[#allocation8 + $0x40] sm:$0xf]  ;;  %v6962_v32 = vld [vmem:[#allocation8 + $0x54] sm:$0xf0]  ;;  %v5707_v34 = vor.u32 %v7112_v22, %v5706_v21  ;;  %v7100_v54 = vld [vmem:[#allocation8 + $0x4a4] sm:$0xf0] }
  0xe2   :  { %2456 = vmatpush.bf16.msrb.mxu3 %v6087_v38  ;;  %v5778_v38 = vld [vmem:[#allocation8 + $0x580] sm:$0xf]  ;;  %v5420_v21 = vld [vmem:[#allocation8 + $0x2c8] sm:$0xf0] }
  0xe3   :  { %2415 = vmatpush.bf16.msrb.mxu0 %v5487_v47  ;;  %v5779_v47 = vor.u32 %v7130_v40, %v5778_v38  ;;  %v7058_v38 = vld [vmem:[#allocation8 + $0x354] sm:$0xf0]  ;;  %v5682_v40 = vld [vmem:[#allocation8 + $0x4c0] sm:$0xf] }
  0xe4   :  { %2429 = vmatpush.bf16.msrb.mxu1 %v5679_v50  ;;  %v7076_v50 = vld [vmem:[#allocation8 + $0x3e4] sm:$0xf0]  ;;  %v5491_v46 = vor.u32 %v7058_v38, %v5490_v37  ;;  %v7031_v37 = vld [vmem:[#allocation8 + $0x284] sm:$0xf]  ;;  %v5396_v38 = vld [vmem:[#allocation8 + $0x298] sm:$0xf0] }
  0xe5   :  { %2443 = vmatpush.bf16.msrb.mxu2 %v5871_v51  ;;  %v7904_v51 = vpop.f32.mrf.mxu2  ;;  %v5563_v60 = vor.u32 %v7076_v50, %v5562_v49  ;;  %v5466_v49 = vld [vmem:[#allocation8 + $0x310] sm:$0xf] }
  0xe6   :  { %2457 = vmatpush.bf16.msrb.mxu3 %v6063_v55  ;;  %v7906_v55 = vpop.f32.mrf.mxu3 }
  0xe7   :  { %2416 = vmatpush.bf16.msrb.mxu0 %v5463_v1  ;;  %v2194_v52 = vpop.f32.mrf.mxu0  ;;  %v5346_v1 = vld [vmem:[#allocation8 + $0x220] sm:$0xf] }
  0xe8   :  { %2430 = vmatpush.bf16.msrb.mxu1 %v5655_v6  ;;  %v2195_v56 = vadd.f32 %v2194_v52, %v7894_v0  ;;  %v2208_v61 = vpop.f32.mrf.mxu1  ;;  %v5538_v6 = vld [vmem:[#allocation8 + $0x3a0] sm:$0xf]  ;;  %v5155_v0 = vor.u32 %v6974_v63, %v5154_v62  ;;  %v7052_v52 = vld [vmem:[#allocation8 + $0x324] sm:$0xf0]  ;;  %v6995_v62 = vld [vmem:[#allocation8 + $0x164] sm:$0xf] }
  0xe9   :  { %2444 = vmatpush.bf16.msrb.mxu2 %v5847_v7  ;;  %v7070_v7 = vld [vmem:[#allocation8 + $0x3b4] sm:$0xf0]  ;;  %v5252_v63 = vld [vmem:[#allocation8 + $0x178] sm:$0xf0] }
  0xea   :  { %2458 = vmatpush.bf16.msrb.mxu3 %v6039_v10  ;;  %2417 = vmatmul.bf16.vlgmr.msrb.gmra.mxu0 %v7867_v11  ;;  %v7909_v3 = vadd.f32 %v2208_v61, %v2195_v56  ;;  %v5347_v10 = vor.u32 %v7022_v4, %v5346_v1  ;;  %v6018_v56 = vld [vmem:[#allocation8 + $0x760] sm:$0xf]  ;;  %v7238_v61 = vld [vmem:[#allocation8 + $0x8f4] sm:$0xf0]  ;;  %v7043_v4 = vld [vmem:[#allocation8 + $0x2e4] sm:$0xf] }
  0xeb   :  { %2465 = vmatpush.bf16.msra.mxu0 %v5251_v12  ;;  %2431 = vmatmul.bf16.vlgmr.msrb.gmra.mxu1 %v7871_v23  ;;  %v5539_v12 = vor.u32 %v7070_v7, %v5538_v6  ;;  %v5444_v6 = vld [vmem:[#allocation8 + $0x2f8] sm:$0xf0]  ;;  %v5659_v7 = vor.u32 %v7100_v54, %v5658_v53  ;;  %v7025_v54 = vld [vmem:[#allocation8 + $0x254] sm:$0xf] }
  0xec   :  { %2479 = vmatpush.bf16.msra.mxu1 %v5443_v13  ;;  %2445 = vmatmul.bf16.vlgmr.msrb.gmra.mxu2 %v7874_v35  ;;  %v5130_v13 = vld [vmem:[#allocation8 + $0x70] sm:$0xf] }
  0xed   :  { %2493 = vmatpush.bf16.msra.mxu2 %v5635_v14  ;;  %2459 = vmatmul.bf16.vlgmr.msrb.gmra.mxu3 %v7876_v39  ;;  %v6968_v14 = vld [vmem:[#allocation8 + $0x84] sm:$0xf0] }
  0xee   :  { %2507 = vmatpush.bf16.msra.mxu3 %v5827_v19  ;;  %v5514_v19 = vld [vmem:[#allocation8 + $0x370] sm:$0xf] }
  0xef   :  { %2466 = vmatpush.bf16.msra.mxu0 %v5227_v27  ;;  %v2222_v24 = vpop.f32.mrf.mxu2  ;;  %v5131_v27 = vor.u32 %v6968_v14, %v5130_v13  ;;  %v5515_v30 = vor.u32 %v7064_v20, %v5514_v19  ;;  %v6186_v13 = vld [vmem:[#allocation8 + $0x8b0] sm:$0xf]  ;;  %v5447_v14 = vor.u32 %v7043_v4, %v5444_v6  ;;  %v7913_v19 = vpop.f32.mrf.mxu0  ;;  %v7037_v20 = vld [vmem:[#allocation8 + $0x2b4] sm:$0xf] }
  0xf0   :  { %2480 = vmatpush.bf16.msra.mxu1 %v5419_v28  ;;  %v2236_v25 = vpop.f32.mrf.mxu3 }
  0xf1   :  { %2494 = vmatpush.bf16.msra.mxu2 %v5611_v29  ;;  %v7911_v28 = vadd.f32 %v2236_v25, %v2222_v24  ;;  %v5323_v29 = vor.u32 %v7016_v18, %v5322_v16  ;;  %v7232_v16 = vld [vmem:[#allocation8 + $0x8c4] sm:$0xf0]  ;;  %v5228_v18 = vld [vmem:[#allocation8 + $0x148] sm:$0xf0]  ;;  %v7915_v24 = vpop.f32.mrf.mxu1 }
  0xf2   :  { %2508 = vmatpush.bf16.msra.mxu3 %v5803_v33  ;;  %v5298_v33 = vld [vmem:[#allocation8 + $0x1c0] sm:$0xf]  ;;  %8842 = vst [vmem:[#allocation25_spill] sm:$0xff] %v7915_v24  ;;  %v6187_v25 = vor.u32 %v7232_v16, %v6186_v13  ;;  %v5898_v16 = vld [vmem:[#allocation8 + $0x670] sm:$0xf] }
  0xf3   :  { %2467 = vmatpush.bf16.msra.mxu0 %v5203_v41  ;;  %v7106_v41 = vld [vmem:[#allocation8 + $0x4d4] sm:$0xf0]  ;;  %v5299_v45 = vor.u32 %v7010_v36, %v5298_v33  ;;  %v5204_v36 = vld [vmem:[#allocation8 + $0x118] sm:$0xf0] }
  0xf4   :  { %2481 = vmatpush.bf16.msra.mxu1 %v5395_v42  ;;  %v5107_v42 = vor.u32 %v6962_v32, %v5106_v31  ;;  %v5683_v50 = vor.u32 %v7106_v41, %v5682_v40  ;;  %v6162_v31 = vld [vmem:[#allocation8 + $0x880] sm:$0xf]  ;;  %v5423_v32 = vor.u32 %v7037_v20, %v5420_v21  ;;  %v7226_v33 = vld [vmem:[#allocation8 + $0x894] sm:$0xf0] }
  0xf5   :  { %2495 = vmatpush.bf16.msra.mxu2 %v5587_v43  ;;  %v5082_v43 = vld [vmem:[#allocation8 + $0x10] sm:$0xf] }
  0xf6   :  { %2509 = vmatpush.bf16.msra.mxu3 %v5779_v47  ;;  %v5274_v47 = vld [vmem:[#allocation8 + $0x190] sm:$0xf] }
  0xf7   :  { %2468 = vmatpush.bf16.msra.mxu0 %v5179_v57  ;;  %v7190_v57 = vld [vmem:[#allocation8 + $0x774] sm:$0xf0]  ;;  %v5275_v1 = vor.u32 %v7004_v48, %v5274_v47  ;;  %v7920_v41 = vpop.f32.mrf.mxu2  ;;  %v6138_v47 = vld [vmem:[#allocation8 + $0x850] sm:$0xf]  ;;  %v5399_v48 = vor.u32 %v7031_v37, %v5396_v38 }
  0xf8   :  { %2482 = vmatpush.bf16.msra.mxu1 %v5371_v59  ;;  %v6210_v59 = vld [vmem:[#allocation8 + $0x8e0] sm:$0xf]  ;;  %v6019_v8 = vor.u32 %v7190_v57, %v6018_v56  ;;  %v5372_v56 = vld [vmem:[#allocation8 + $0x268] sm:$0xf0] }
  0xf9   :  { %2496 = vmatpush.bf16.msra.mxu2 %v5563_v60  ;;  %v5083_v60 = vor.u32 %v6956_v44, %v5082_v43  ;;  %v6211_v9 = vor.u32 %v7238_v61, %v6210_v59  ;;  %v7923_v44 = vpop.f32.mrf.mxu3  ;;  %v5375_v4 = vor.u32 %v7025_v54, %v5372_v56  ;;  %v5300_v54 = vld [vmem:[#allocation8 + $0x1d8] sm:$0xf0] }
  0xfa   :  { %2510 = vmatpush.bf16.msra.mxu3 %v5755_v2  ;;  %v5467_v2 = vor.u32 %v7052_v52, %v5466_v49  ;;  %v7220_v49 = vld [vmem:[#allocation8 + $0x864] sm:$0xf0]  ;;  %v5180_v52 = vld [vmem:[#allocation8 + $0xe8] sm:$0xf0] }
  0xfb   :  { %2469 = vmatpush.bf16.msra.mxu0 %v5155_v0  ;;  %v5255_v0 = vor.u32 %v6995_v62, %v5252_v63  ;;  %v5922_v63 = vld [vmem:[#allocation8 + $0x6a0] sm:$0xf] }
  0xfc   :  { %2483 = vmatpush.bf16.msra.mxu1 %v5347_v10  ;;  %v5994_v10 = vld [vmem:[#allocation8 + $0x730] sm:$0xf] }
  0xfd   :  { %2497 = vmatpush.bf16.msra.mxu2 %v5539_v12  ;;  %v7184_v12 = vld [vmem:[#allocation8 + $0x744] sm:$0xf0] }
  0xfe   :  { %2511 = vmatpush.bf16.msra.mxu3 %v5731_v17  ;;  %v6989_v17 = vld [vmem:[#allocation8 + $0x134] sm:$0xf]  ;;  %v5995_v22 = vor.u32 %v7184_v12, %v5994_v10  ;;  %v5348_v10 = vld [vmem:[#allocation8 + $0x238] sm:$0xf0] }
  0xff   :  { %2470 = vmatpush.bf16.msra.mxu0 %v5131_v27  ;;  %v5231_v27 = vor.u32 %v6989_v17, %v5228_v18  ;;  %v179_v12 = vld [vmem:[#allocation6] sm:$0xff]  ;;  %v7160_v17 = vld [vmem:[#allocation8 + $0x684] sm:$0xf0] }
 0x100   :  { %2484 = vmatpush.bf16.msra.mxu1 %v5323_v29  ;;  %v5970_v29 = vld [vmem:[#allocation8 + $0x700] sm:$0xf]  ;;  %v6090_v18 = vld [vmem:[#allocation8 + $0x7f0] sm:$0xf] }
 0x101   :  { %2498 = vmatpush.bf16.msra.mxu2 %v5515_v30  ;;  %v7178_v30 = vld [vmem:[#allocation8 + $0x714] sm:$0xf0] }
 0x102   :  { %2512 = vmatpush.bf16.msra.mxu3 %v5707_v34  ;;  %v6983_v34 = vld [vmem:[#allocation8 + $0x104] sm:$0xf]  ;;  %v5971_v40 = vor.u32 %v7178_v30, %v5970_v29  ;;  %v7926_v29 = vunpack.c.l.bf16 %v179_v12 }
 0x103   :  { %2471 = vmatpush.bf16.msra.mxu0 %v5107_v42  ;;  %v6163_v42 = vor.u32 %v7226_v33, %v6162_v31  ;;  %v5207_v43 = vor.u32 %v6983_v34, %v5204_v36  ;;  %v7928_v31 = vunpack.c.h.bf16 %v179_v12  ;;  %v7013_v33 = vld [vmem:[#allocation8 + $0x1f4] sm:$0xf]  ;;  %v5324_v34 = vld [vmem:[#allocation8 + $0x208] sm:$0xf0]  ;;  %v5899_v36 = vor.u32 %v7160_v17, %v5898_v16  ;;  %v5828_v12 = vld [vmem:[#allocation8 + $0x5f8] sm:$0xf0] }
 0x104   :  { %2485 = vmatpush.bf16.msra.mxu1 %v5299_v45  ;;  %v5946_v45 = vld [vmem:[#allocation8 + $0x6d0] sm:$0xf]  ;;  %v7235_v17 = vld [vmem:[#allocation8 + $0x8e4] sm:$0xf] }
 0x105   :  { %2499 = vmatpush.bf16.msra.mxu2 %v5491_v46  ;;  %v7172_v46 = vld [vmem:[#allocation8 + $0x6e4] sm:$0xf0]  ;;  %8843 = vst [vmem:[#allocation26_spill] sm:$0xff] %v7928_v31 }
 0x106   :  { %2513 = vmatpush.bf16.msra.mxu3 %v5683_v50  ;;  %v6977_v50 = vld [vmem:[#allocation8 + $0xd4] sm:$0xf]  ;;  %v5947_v59 = vor.u32 %v7172_v46, %v5946_v45  ;;  %v6066_v45 = vld [vmem:[#allocation8 + $0x7c0] sm:$0xf]  ;;  %v5327_v46 = vor.u32 %v7013_v33, %v5324_v34  ;;  %v5804_v34 = vld [vmem:[#allocation8 + $0x5c8] sm:$0xf0] }
 0x107   :  { %2472 = vmatpush.bf16.msra.mxu0 %v5083_v60  ;;  %v2250_v53 = vpop.f32.mrf.mxu0  ;;  %v6139_v60 = vor.u32 %v7220_v49, %v6138_v47  ;;  %v5183_v61 = vor.u32 %v6977_v50, %v5180_v52  ;;  %v7202_v47 = vld [vmem:[#allocation8 + $0x7d4] sm:$0xf0]  ;;  %v5108_v49 = vld [vmem:[#allocation8 + $0x58] sm:$0xf0]  ;;  %v2633_v50 = vmul.f32 %v7909_v3, %v7926_v29  ;;  %v5084_v3 = vld [vmem:[#allocation8 + $0x28] sm:$0xf0] }
 0x108   :  { %2486 = vmatpush.bf16.msra.mxu1 %v5275_v1  ;;  %v2251_v57 = vadd.f32 %v2250_v53, %v7911_v28  ;;  %v2264_v62 = vpop.f32.mrf.mxu1  ;;  %v7166_v1 = vld [vmem:[#allocation8 + $0x6b4] sm:$0xf0]  ;;  %v7007_v53 = vld [vmem:[#allocation8 + $0x1c4] sm:$0xf] }
 0x109   :  { %2500 = vmatpush.bf16.msra.mxu2 %v5467_v2  ;;  %v6114_v2 = vld [vmem:[#allocation8 + $0x820] sm:$0xf]  ;;  %v5923_v28 = vor.u32 %v7166_v1, %v5922_v63  ;;  %v6042_v63 = vld [vmem:[#allocation8 + $0x790] sm:$0xf]  ;;  %v7196_v1 = vld [vmem:[#allocation8 + $0x7a4] sm:$0xf0] }
 0x10a   :  { %2514 = vmatpush.bf16.msra.mxu3 %v5659_v7  ;;  %2473 = vmatmul.bf16.vlgmr.msra.gmra.mxu0 %v7862_v58  ;;  %v2265_v6 = vadd.f32 %v2264_v62, %v2251_v57  ;;  %v7214_v7 = vld [vmem:[#allocation8 + $0x834] sm:$0xf0]  ;;  %v5850_v57 = vld [vmem:[#allocation8 + $0x610] sm:$0xf] }
 0x10b   :  { %2521 = vmatpush.bf16.msrb.mxu0 %v6019_v8  ;;  %2487 = vmatmul.bf16.vlgmr.msra.gmra.mxu1 %v7865_v5  ;;  %v6971_v8 = vld [vmem:[#allocation8 + $0xa4] sm:$0xf]  ;;  %v6115_v13 = vor.u32 %v7214_v7, %v6114_v2  ;;  %v6953_v2 = vld [vmem:[#allocation8 + $0x14] sm:$0xf]  ;;  %v5276_v7 = vld [vmem:[#allocation8 + $0x1a8] sm:$0xf0] }
 0x10c   :  { %2535 = vmatpush.bf16.msrb.mxu1 %v6211_v9  ;;  %2501 = vmatmul.bf16.vlgmr.msra.gmra.mxu2 %v7867_v11  ;;  %v5156_v9 = vld [vmem:[#allocation8 + $0xb8] sm:$0xf0]  ;;  %v5087_v16 = vor.u32 %v6953_v2, %v5084_v3  ;;  %v5564_v2 = vld [vmem:[#allocation8 + $0x3e8] sm:$0xf0] }
 0x10d   :  { %2549 = vmatpush.bf16.msrb.mxu2 %v5255_v0  ;;  %2515 = vmatmul.bf16.vlgmr.msra.gmra.mxu3 %v7871_v23  ;;  %v7019_v0 = vld [vmem:[#allocation8 + $0x224] sm:$0xf] }
 0x10e   :  { %2563 = vmatpush.bf16.msrb.mxu3 %v5447_v14  ;;  %v5159_v14 = vor.u32 %v6971_v8, %v5156_v9  ;;  %v5351_v20 = vor.u32 %v7019_v0, %v5348_v10  ;;  %v7091_v8 = vld [vmem:[#allocation8 + $0x464] sm:$0xf]  ;;  %v5636_v9 = vld [vmem:[#allocation8 + $0x478] sm:$0xf0] }
 0x10f   :  { %2522 = vmatpush.bf16.msrb.mxu0 %v5995_v22  ;;  %v2278_v21 = vpop.f32.mrf.mxu2  ;;  %v7208_v22 = vld [vmem:[#allocation8 + $0x804] sm:$0xf0]  ;;  %v7139_v0 = vld [vmem:[#allocation8 + $0x5e4] sm:$0xf] }
 0x110   :  { %2536 = vmatpush.bf16.msrb.mxu1 %v6187_v25  ;;  %v6965_v25 = vld [vmem:[#allocation8 + $0x74] sm:$0xf]  ;;  %v2279_v30 = vadd.f32 %v2278_v21, %v2265_v6  ;;  %v6091_v38 = vor.u32 %v7208_v22, %v6090_v18  ;;  %v6212_v18 = vld [vmem:[#allocation8 + $0x8f8] sm:$0xf0]  ;;  %v5639_v21 = vor.u32 %v7091_v8, %v5636_v9  ;;  %v5831_v22 = vor.u32 %v7139_v0, %v5828_v12 }
 0x111   :  { %2550 = vmatpush.bf16.msrb.mxu2 %v5231_v27  ;;  %v5132_v27 = vld [vmem:[#allocation8 + $0x88] sm:$0xf0]  ;;  %v7001_v6 = vld [vmem:[#allocation8 + $0x194] sm:$0xf]  ;;  %v6215_v33 = vor.u32 %v7235_v17, %v6212_v18  ;;  %v5540_v17 = vld [vmem:[#allocation8 + $0x3b8] sm:$0xf0] }
 0x112   :  { %2564 = vmatpush.bf16.msrb.mxu3 %v5423_v32  ;;  %v2292_v32 = vpop.f32.mrf.mxu3  ;;  %v7169_v8 = vld [vmem:[#allocation8 + $0x6d4] sm:$0xf]  ;;  %v7115_v18 = vld [vmem:[#allocation8 + $0x524] sm:$0xf] }
 0x113   :  { %2523 = vmatpush.bf16.msrb.mxu0 %v5971_v40  ;;  %v2293_v37 = vadd.f32 %v2292_v32, %v2279_v30  ;;  %v5135_v40 = vor.u32 %v6965_v25, %v5132_v27  ;;  %v7085_v27 = vld [vmem:[#allocation8 + $0x434] sm:$0xf]  ;;  %v5612_v30 = vld [vmem:[#allocation8 + $0x448] sm:$0xf0] }
 0x114   :  { %2537 = vmatpush.bf16.msrb.mxu1 %v6163_v42  ;;  %v5874_v42 = vld [vmem:[#allocation8 + $0x640] sm:$0xf]  ;;  %v7133_v32 = vld [vmem:[#allocation8 + $0x5b4] sm:$0xf] }
 0x115   :  { %2551 = vmatpush.bf16.msrb.mxu2 %v5207_v43  ;;  %v7154_v43 = vld [vmem:[#allocation8 + $0x654] sm:$0xf0]  ;;  %v2634_v52 = vmul.f32 %v2293_v37, %v7928_v31  ;;  %v5996_v37 = vld [vmem:[#allocation8 + $0x748] sm:$0xf0]  ;;  %v7217_v0 = vld [vmem:[#allocation8 + $0x854] sm:$0xf] }
 0x116   :  { %2565 = vmatpush.bf16.msrb.mxu3 %v5399_v48  ;;  %v6959_v48 = vld [vmem:[#allocation8 + $0x44] sm:$0xf]  ;;  %v5875_v56 = vor.u32 %v7154_v43, %v5874_v42  ;;  %v7935_v42 = vpop.f32.mrf.mxu0  ;;  %v7937_v43 = vpop.f32.mrf.mxu1 }
 0x117   :  { %2524 = vmatpush.bf16.msrb.mxu0 %v5947_v59  ;;  %v7148_v59 = vld [vmem:[#allocation8 + $0x624] sm:$0xf0]  ;;  %v5111_v62 = vor.u32 %v6959_v48, %v5108_v49  ;;  %v7079_v48 = vld [vmem:[#allocation8 + $0x404] sm:$0xf]  ;;  %v5588_v49 = vld [vmem:[#allocation8 + $0x418] sm:$0xf0]  ;;  %v7943_v3 = vpop.f32.mrf.mxu2 }
 0x118   :  { %2538 = vmatpush.bf16.msrb.mxu1 %v6139_v60  ;;  %v7933_v60 = vadd.f32 %v2634_v52, %v2633_v50  ;;  %v5851_v10 = vor.u32 %v7148_v59, %v5850_v57  ;;  %v7127_v50 = vld [vmem:[#allocation8 + $0x584] sm:$0xf]  ;;  %v6164_v59 = vld [vmem:[#allocation8 + $0x898] sm:$0xf0] }
 0x119   :  { %2552 = vmatpush.bf16.msrb.mxu2 %v5183_v61  ;;  %v6067_v61 = vor.u32 %v7202_v47, %v6066_v45  ;;  %v5615_v45 = vor.u32 %v7085_v27, %v5612_v30  ;;  %v7223_v57 = vld [vmem:[#allocation8 + $0x884] sm:$0xf]  ;;  %v5924_v27 = vld [vmem:[#allocation8 + $0x6b8] sm:$0xf0] }
 0x11a   :  { %2566 = vmatpush.bf16.msrb.mxu3 %v5375_v4  ;;  %v5303_v4 = vor.u32 %v7007_v53, %v5300_v54  ;;  %v5780_v53 = vld [vmem:[#allocation8 + $0x598] sm:$0xf0]  ;;  %v7175_v54 = vld [vmem:[#allocation8 + $0x704] sm:$0xf]  ;;  %v7945_v9 = vpop.f32.mrf.mxu3 }
 0x11b   :  { %2525 = vmatpush.bf16.msrb.mxu0 %v5923_v28  ;;  %v7187_v28 = vld [vmem:[#allocation8 + $0x764] sm:$0xf]  ;;  %8844 = vst [vmem:[#allocation27_spill] sm:$0xff] %v7945_v9 }
 0x11c   :  { %2539 = vmatpush.bf16.msrb.mxu1 %v6115_v13  ;;  %v6020_v13 = vld [vmem:[#allocation8 + $0x778] sm:$0xf0]  ;;  %v7211_v30 = vld [vmem:[#allocation8 + $0x824] sm:$0xf] }
 0x11d   :  { %2553 = vmatpush.bf16.msrb.mxu2 %v5159_v14  ;;  %v6043_v14 = vor.u32 %v7196_v1, %v6042_v63  ;;  %v6023_v25 = vor.u32 %v7187_v28, %v6020_v13  ;;  %v7073_v1 = vld [vmem:[#allocation8 + $0x3d4] sm:$0xf] }
 0x11e   :  { %2567 = vmatpush.bf16.msrb.mxu3 %v5351_v20  ;;  %v5279_v20 = vor.u32 %v7001_v6, %v5276_v7  ;;  %v6167_v6 = vor.u32 %v7223_v57, %v6164_v59  ;;  %v5756_v7 = vld [vmem:[#allocation8 + $0x568] sm:$0xf0] }
 0x11f   :  { %2526 = vmatpush.bf16.msrb.mxu0 %v5899_v36  ;;  %v7181_v36 = vld [vmem:[#allocation8 + $0x734] sm:$0xf] }
 0x120   :  { %2540 = vmatpush.bf16.msrb.mxu1 %v6091_v38  ;;  %v7229_v38 = vld [vmem:[#allocation8 + $0x8b4] sm:$0xf]  ;;  %v5999_v47 = vor.u32 %v7181_v36, %v5996_v37 }
 0x121   :  { %2554 = vmatpush.bf16.msrb.mxu2 %v5135_v40  ;;  %v6188_v40 = vld [vmem:[#allocation8 + $0x8c8] sm:$0xf0]  ;;  %v7061_v37 = vld [vmem:[#allocation8 + $0x374] sm:$0xf] }
 0x122   :  { %2568 = vmatpush.bf16.msrb.mxu3 %v5327_v46  ;;  %v5807_v46 = vor.u32 %v7133_v32, %v5804_v34  ;;  %v6191_v52 = vor.u32 %v7229_v38, %v6188_v40  ;;  %v6116_v32 = vld [vmem:[#allocation8 + $0x838] sm:$0xf0]  ;;  %v5516_v38 = vld [vmem:[#allocation8 + $0x388] sm:$0xf0]  ;;  %v7109_v40 = vld [vmem:[#allocation8 + $0x4f4] sm:$0xf] }
 0x123   :  { %2527 = vmatpush.bf16.msrb.mxu0 %v5875_v56  ;;  %v5972_v56 = vld [vmem:[#allocation8 + $0x718] sm:$0xf0] }
 0x124   :  { %2541 = vmatpush.bf16.msrb.mxu1 %v6067_v61  ;;  %v5591_v61 = vor.u32 %v7079_v48, %v5588_v49  ;;  %v5975_v63 = vor.u32 %v7175_v54, %v5972_v56  ;;  %v5900_v48 = vld [vmem:[#allocation8 + $0x688] sm:$0xf0]  ;;  %v5519_v54 = vor.u32 %v7061_v37, %v5516_v38 }
 0x125   :  { %2555 = vmatpush.bf16.msrb.mxu2 %v5111_v62  ;;  %v5783_v62 = vor.u32 %v7127_v50, %v5780_v53  ;;  %v7205_v50 = vld [vmem:[#allocation8 + $0x7f4] sm:$0xf] }
 0x126   :  { %2569 = vmatpush.bf16.msrb.mxu3 %v5303_v4  ;;  %v7121_v4 = vld [vmem:[#allocation8 + $0x554] sm:$0xf] }
 0x127   :  { %2528 = vmatpush.bf16.msrb.mxu0 %v5851_v10  ;;  %v6140_v10 = vld [vmem:[#allocation8 + $0x868] sm:$0xf0]  ;;  %v2306_v12 = vpop.f32.mrf.mxu0  ;;  %v5759_v13 = vor.u32 %v7121_v4, %v5756_v7  ;;  %v5684_v4 = vld [vmem:[#allocation8 + $0x4d8] sm:$0xf0] }
 0x128   :  { %2542 = vmatpush.bf16.msrb.mxu1 %v6043_v14  ;;  %v2320_v28 = vpop.f32.mrf.mxu1  ;;  %v5876_v7 = vld [vmem:[#allocation8 + $0x658] sm:$0xf0] }
 0x129   :  { %2556 = vmatpush.bf16.msrb.mxu2 %v5087_v16  ;;  %v7067_v16 = vld [vmem:[#allocation8 + $0x3a4] sm:$0xf] }
 0x12a   :  { %2570 = vmatpush.bf16.msrb.mxu3 %v5279_v20  ;;  %2529 = vmatmul.bf16.vlgmr.msrb.gmra.mxu0 %v7874_v35  ;;  %v2321_v20 = vadd.f32 %v2320_v28, %v2306_v12  ;;  %v7049_v12 = vld [vmem:[#allocation8 + $0x314] sm:$0xf]  ;;  %v5468_v28 = vld [vmem:[#allocation8 + $0x328] sm:$0xf0] }
 0x12b   :  { %2577 = vmatpush.bf16.msra.mxu0 %v5639_v21  ;;  %2543 = vmatmul.bf16.vlgmr.msrb.gmra.mxu1 %v7876_v39  ;;  %v6143_v21 = vor.u32 %v7217_v0, %v6140_v10 }
 0x12c   :  { %2591 = vmatpush.bf16.msra.mxu1 %v5831_v22  ;;  %2557 = vmatmul.bf16.vlgmr.msrb.gmra.mxu2 %v7862_v58  ;;  %v5948_v58 = vld [vmem:[#allocation8 + $0x6e8] sm:$0xf0]  ;;  %v5732_v22 = vld [vmem:[#allocation8 + $0x538] sm:$0xf0] }
 0x12d   :  { %2605 = vmatpush.bf16.msra.mxu2 %v6023_v25  ;;  %2571 = vmatmul.bf16.vlgmr.msrb.gmra.mxu3 %v7865_v5  ;;  %v5567_v5 = vor.u32 %v7073_v1, %v5564_v2  ;;  %v5951_v14 = vor.u32 %v7169_v8, %v5948_v58  ;;  %v7163_v25 = vld [vmem:[#allocation8 + $0x6a4] sm:$0xf]  ;;  %v5735_v34 = vor.u32 %v7115_v18, %v5732_v22  ;;  %v6068_v58 = vld [vmem:[#allocation8 + $0x7d8] sm:$0xf0]  ;;  %v5852_v18 = vld [vmem:[#allocation8 + $0x628] sm:$0xf0] }
 0x12e   :  { %2619 = vmatpush.bf16.msra.mxu3 %v6215_v33  ;;  %v5543_v33 = vor.u32 %v7067_v16, %v5540_v17  ;;  %v5927_v36 = vor.u32 %v7163_v25, %v5924_v27  ;;  %v7199_v8 = vld [vmem:[#allocation8 + $0x7c4] sm:$0xf]  ;;  %v5660_v16 = vld [vmem:[#allocation8 + $0x4a8] sm:$0xf0]  ;;  %v7145_v17 = vld [vmem:[#allocation8 + $0x614] sm:$0xf]  ;;  %v5471_v22 = vor.u32 %v7049_v12, %v5468_v28 }
 0x12f   :  { %2578 = vmatpush.bf16.msra.mxu0 %v5615_v45  ;;  %v6119_v45 = vor.u32 %v7211_v30, %v6116_v32  ;;  %v2334_v49 = vpop.f32.mrf.mxu2  ;;  %v5855_v27 = vor.u32 %v7145_v17, %v5852_v18  ;;  %v7947_v32 = vpop.f32.mrf.mxu0 }
 0x130   :  { %2592 = vmatpush.bf16.msra.mxu1 %v5807_v46  ;;  %v5708_v46 = vld [vmem:[#allocation8 + $0x508] sm:$0xf0]  ;;  %v2335_v53 = vadd.f32 %v2334_v49, %v2321_v20  ;;  %v2348_v56 = vpop.f32.mrf.mxu3  ;;  %v7193_v20 = vld [vmem:[#allocation8 + $0x794] sm:$0xf] }
 0x131   :  { %2606 = vmatpush.bf16.msra.mxu2 %v5999_v47  ;;  %v7157_v47 = vld [vmem:[#allocation8 + $0x674] sm:$0xf]  ;;  %v5711_v57 = vor.u32 %v7109_v40, %v5708_v46 }
 0x132   :  { %2620 = vmatpush.bf16.msra.mxu3 %v6191_v52  ;;  %v6092_v52 = vld [vmem:[#allocation8 + $0x808] sm:$0xf0]  ;;  %v5903_v59 = vor.u32 %v7157_v47, %v5900_v48  ;;  %v2349_v1 = vadd.f32 %v2348_v56, %v2335_v53  ;;  %v286_v53 = vmul.f32 %v7928_v31, %v7928_v31 }
 0x133   :  { %2579 = vmatpush.bf16.msra.mxu0 %v5591_v61  ;;  %v7055_v61 = vld [vmem:[#allocation8 + $0x344] sm:$0xf]  ;;  %v6095_v2 = vor.u32 %v7205_v50, %v6092_v52  ;;  %v174_v50 = vld [vmem:[#allocation3 + $0x8] sm:$0xff]  ;;  %v285_v52 = vmul.f32 %v7926_v29, %v7926_v29 }
 0x134   :  { %2593 = vmatpush.bf16.msra.mxu1 %v5783_v62  ;;  %v5492_v62 = vld [vmem:[#allocation8 + $0x358] sm:$0xf0] }
 0x135   :  { %2607 = vmatpush.bf16.msra.mxu2 %v5975_v63  ;;  %v7103_v63 = vld [vmem:[#allocation8 + $0x4c4] sm:$0xf]  ;;  %v5495_v0 = vor.u32 %v7055_v61, %v5492_v62 }
 0x136   :  { %2621 = vmatpush.bf16.msra.mxu3 %v6167_v6  ;;  %v7151_v6 = vld [vmem:[#allocation8 + $0x644] sm:$0xf]  ;;  %v5687_v10 = vor.u32 %v7103_v63, %v5684_v4  ;;  %v182_v4 = vld [vmem:[#allocation6 + $0x18] sm:$0xff] }
 0x137   :  { %2580 = vmatpush.bf16.msra.mxu0 %v5567_v5  ;;  %v5879_v5 = vor.u32 %v7151_v6, %v5876_v7  ;;  %v7961_v48 = vpop.f32.mrf.mxu2  ;;  %v181_v61 = vld [vmem:[#allocation6 + $0x10] sm:$0xff]  ;;  %v8003_v17 = vunpack.c.h.bf16 %v182_v4 }
 0x138   :  { %2594 = vmatpush.bf16.msra.mxu1 %v5759_v13  ;;  %v7097_v13 = vld [vmem:[#allocation8 + $0x494] sm:$0xf]  ;;  %v7985_v6 = vunpack.c.l.bf16 %v181_v61  ;;  %v7987_v7 = vunpack.c.h.bf16 %v181_v61 }
 0x139   :  { %2608 = vmatpush.bf16.msra.mxu2 %v5951_v14  ;;  %v6071_v14 = vor.u32 %v7199_v8, %v6068_v58  ;;  %v5663_v25 = vor.u32 %v7097_v13, %v5660_v16  ;;  %v7989_v8 = vunpack.c.h.bf16 %v174_v50  ;;  %v8001_v16 = vunpack.c.l.bf16 %v182_v4 }
 0x13a   :  { %2622 = vmatpush.bf16.msra.mxu3 %v6143_v21  ;;  %v6044_v21 = vld [vmem:[#allocation8 + $0x7a8] sm:$0xf0]  ;;  %v289_v28 = vmul.f32 %v7985_v6, %v7985_v6 }
 0x13b   :  { %2581 = vmatpush.bf16.msra.mxu0 %v5543_v33  ;;  %v6047_v30 = vor.u32 %v7193_v20, %v6044_v21  ;;  %v7949_v33 = vpop.f32.mrf.mxu1  ;;  %v290_v20 = vmul.f32 %v7987_v7, %v7987_v7 }
 0x13c   :  { %2595 = vmatpush.bf16.msra.mxu1 %v5735_v34  ;;  %v180_v34 = vld [vmem:[#allocation6 + $0x8] sm:$0xff] }
 0x13d   :  { %2609 = vmatpush.bf16.msra.mxu2 %v5927_v36  ;;  %v7955_v38 = vunpack.c.l.bf16 %v180_v34  ;;  %v7969_v49 = vunpack.c.h.bf16 %v180_v34 }
 0x13e   :  { %2623 = vmatpush.bf16.msra.mxu3 %v6119_v45 }
 0x13f   :  { %2582 = vmatpush.bf16.msra.mxu0 %v5519_v54  ;;  %8845 = vst [vmem:[#allocation28_spill] sm:$0xff] %v7955_v38  ;;  %v287_v62 = vmul.f32 %v7955_v38, %v7955_v38  ;;  %v288_v63 = vmul.f32 %v7969_v49, %v7969_v49 }
 0x140   :  { %2596 = vmatpush.bf16.msra.mxu1 %v5711_v57  ;;  %8846 = vst [vmem:[#allocation29_spill] sm:$0xff] %v7969_v49 }
 0x141   :  { %2610 = vmatpush.bf16.msra.mxu2 %v5903_v59 }
 0x142   :  { %2624 = vmatpush.bf16.msra.mxu3 %v6095_v2  ;;  %v175_v2 = vld [vmem:[#allocation3 + $0x10] sm:$0xff] }
 0x143   :  { %2583 = vmatpush.bf16.msra.mxu0 %v5495_v0  ;;  %v7991_v58 = vunpack.c.l.bf16 %v175_v2  ;;  %v183_v0 = vld [vmem:[#allocation6 + $0x20] sm:$0xff]  ;;  %v7997_v13 = vunpack.c.h.bf16 %v175_v2 }
 0x144   :  { %2597 = vmatpush.bf16.msra.mxu1 %v5687_v10  ;;  %v8013_v34 = vunpack.c.h.bf16 %v183_v0 }
 0x145   :  { %2611 = vmatpush.bf16.msra.mxu2 %v5879_v5 }
 0x146   :  { %2625 = vmatpush.bf16.msra.mxu3 %v6071_v14  ;;  %v238_v14 = vmul.f32 %v7989_v8, %v7989_v8  ;;  %v294_v2 = vmul.f32 %v8013_v34, %v8013_v34 }
 0x147   :  { %2584 = vmatpush.bf16.msra.mxu0 %v5471_v22  ;;  %v2362_v36 = vpop.f32.mrf.mxu0  ;;  %v184_v22 = vld [vmem:[#allocation6 + $0x28] sm:$0xff] }
 0x148   :  { %2598 = vmatpush.bf16.msra.mxu1 %v5663_v25  ;;  %v2363_v37 = vadd.f32 %v2362_v36, %v2349_v1  ;;  %v2376_v40 = vpop.f32.mrf.mxu1  ;;  %v297_v1 = vadd.f32 %v286_v53, %v285_v52  ;;  %v8009_v25 = vunpack.c.l.bf16 %v183_v0  ;;  %v8023_v52 = vunpack.c.l.bf16 %v184_v22  ;;  %v178_v0 = vld [vmem:[#allocation3 + $0x28] sm:$0xff] }
 0x149   :  { %2612 = vmatpush.bf16.msra.mxu2 %v5855_v27  ;;  %v239_v27 = vmul.f32 %v7991_v58, %v7991_v58 }
 0x14a   :  { %2626 = vmatpush.bf16.msra.mxu3 %v6047_v30  ;;  %2585 = vmatmul.bf16.vlgmr.msra.gmra.mxu0 %v7867_v11  ;;  %v2377_v45 = vadd.f32 %v2376_v40, %v2363_v37  ;;  %v7963_v11 = vpop.f32.mrf.mxu3  ;;  %v298_v10 = vadd.f32 %v297_v1, %v287_v62  ;;  %v291_v37 = vmul.f32 %v8001_v16, %v8001_v16  ;;  %v8027_v62 = vunpack.c.h.bf16 %v184_v22 }
 0x14b   :  { %2599 = vmatmul.bf16.vlgmr.msra.gmra.mxu1 %v7871_v23  ;;  %v173_v23 = vld [vmem:[#allocation3] sm:$0xff]  ;;  %v292_v40 = vmul.f32 %v8003_v17, %v8003_v17  ;;  %v293_v53 = vmul.f32 %v8009_v25, %v8009_v25  ;;  %v8045_v22 = vunpack.c.l.bf16 %v178_v0 }
 0x14c   :  { %2613 = vmatmul.bf16.vlgmr.msra.gmra.mxu2 %v7874_v35  ;;  %v2635_v46 = vmul.f32 %v2377_v45, %v7955_v38  ;;  %v7965_v35 = vunpack.c.l.bf16 %v173_v23  ;;  %v299_v21 = vadd.f32 %v298_v10, %v288_v63  ;;  %v176_v45 = vld [vmem:[#allocation3 + $0x18] sm:$0xff] }
 0x14d   :  { %2627 = vmatmul.bf16.vlgmr.msra.gmra.mxu3 %v7876_v39  ;;  %v7967_v39 = vunpack.c.h.bf16 %v173_v23  ;;  %v240_v23 = vmul.f32 %v7997_v13, %v7997_v13  ;;  %v304_v4 = vadd.f32 %v292_v40, %v291_v37  ;;  %v8033_v10 = vunpack.c.l.bf16 %v176_v45 }
 0x14e   :  { %v7959_v47 = vadd.f32 %v7933_v60, %v2635_v46  ;;  %v7975_v60 = vunpack.c.l.bf16 %v174_v50  ;;  %v235_v54 = vmul.f32 %v7965_v35, %v7965_v35  ;;  %v300_v36 = vadd.f32 %v299_v21, %v289_v28 }
 0x14f   :  { %v2390_v56 = vpop.f32.mrf.mxu2  ;;  %v236_v57 = vmul.f32 %v7967_v39, %v7967_v39  ;;  %v8005_v18 = vpop.f32.mrf.mxu0  ;;  %v296_v40 = vmul.f32 %v8027_v62, %v8027_v62  ;;  %7430 = vtanh.f32 %v7965_v35 }
 0x150   :  { %v237_v5 = vmul.f32 %v7975_v60, %v7975_v60  ;;  %8847 = vst [vmem:[#allocation30_spill] sm:$0xff] %v8005_v18  ;;  %v8019_v46 = vpop.f32.mrf.mxu1  ;;  %v301_v61 = vadd.f32 %v300_v36, %v290_v20  ;;  %v305_v20 = vadd.f32 %v304_v4, %v293_v53  ;;  %v245_v4 = vmul.f32 %v8045_v22, %v8045_v22 }
 0x151   :  { %v247_v12 = vadd.f32 %v236_v57, %v235_v54  ;;  %8848 = vst [vmem:[#allocation31_spill] sm:$0xff] %v8019_v46  ;;  %v177_v54 = vld [vmem:[#allocation3 + $0x20] sm:$0xff]  ;;  %7432 = vtanh.f32 %v7967_v39 }
 0x152   :  { %v2404_v59 = vpop.f32.mrf.mxu3  ;;  %302 = vadd.xlane.f32.xlu1 %v301_v61  ;;  %v8039_v28 = vunpack.c.l.bf16 %v177_v54  ;;  %7434 = vtanh.f32 %v8033_v10 }
 0x153   :  { %v248_v30 = vadd.f32 %v247_v12, %v237_v5  ;;  %v2405_v57 = vadd.f32 %v2404_v59, %v2390_v56  ;;  %v8037_v12 = vunpack.c.h.bf16 %v176_v45  ;;  %v8041_v56 = vunpack.c.h.bf16 %v177_v54 }
 0x154   :  { %v243_v36 = vmul.f32 %v8039_v28, %v8039_v28  ;;  %v306_v45 = vadd.f32 %v305_v20, %v294_v2 }
 0x155   :  { %v249_v50 = vadd.f32 %v248_v30, %v238_v14  ;;  %v295_v14 = vmul.f32 %v8023_v52, %v8023_v52  ;;  %v242_v30 = vmul.f32 %v8037_v12, %v8037_v12  ;;  %7436 = vtanh.f32 %v8037_v12 }
 0x156   :  { %7438 = vtanh.f32 %v7975_v60 }
 0x157   :  { %v8029_v63 = vpop.f32.mrf.mxu2  ;;  %v250_v1 = vadd.f32 %v249_v50, %v239_v27  ;;  %v241_v27 = vmul.f32 %v8033_v10, %v8033_v10  ;;  %v244_v50 = vmul.f32 %v8041_v56, %v8041_v56  ;;  %v307_v61 = vadd.f32 %v306_v45, %v295_v14 }
 0x158   :  { %7440 = vtanh.f32 %v7989_v8 }
 0x159   :  { %v251_v59 = vadd.f32 %v250_v1, %v240_v23  ;;  %v8055_v23 = vunpack.c.h.bf16 %v178_v0  ;;  %v254_v53 = vadd.f32 %v242_v30, %v241_v27  ;;  %v308_v24 = vadd.f32 %v307_v61, %v296_v40 }
 0x15a   :  { %v8035_v5 = vpop.f32.mrf.mxu3  ;;  %v209_v30 = vmul.f32 %v7926_v29, %v7965_v35  ;;  %v217_v61 = vmul.f32 %v8009_v25, %v8039_v28  ;;  %7442 = vtanh.f32 %v8041_v56 }
 0x15b   :  { %252 = vadd.xlane.f32.xlu0 %v251_v59  ;;  %v255_v46 = vadd.f32 %v254_v53, %v243_v36  ;;  %309 = vadd.xlane.f32.xlu1 %v308_v24  ;;  %v210_v36 = vmul.f32 %v7928_v31, %v7967_v39  ;;  %v211_v24 = vmul.f32 %v7955_v38, %v7975_v60  ;;  %7444 = vtanh.f32 %v8039_v28  ;;  %v6306_v60 = vld [vmem:[#allocation14 + $0x30] sm:$0xf] }
 0x15c   :  { %v216_v53 = vmul.f32 %v8003_v17, %v8037_v12  ;;  %7446 = vtanh.f32 %v7991_v58 }
 0x15d   :  { %v256_v59 = vadd.f32 %v255_v46, %v244_v50  ;;  %v221_v46 = vadd.f32 %v210_v36, %v209_v30  ;;  %v215_v50 = vmul.f32 %v8001_v16, %v8033_v10  ;;  %7448 = vtanh.f32 %v7997_v13 }
 0x15e   :  { %7450 = vtanh.f32 %v8045_v22 }
 0x15f   :  { %v257_v20 = vadd.f32 %v256_v59, %v245_v4  ;;  %v222_v40 = vadd.f32 %v221_v46, %v211_v24  ;;  %v218_v4 = vmul.f32 %v8013_v34, %v8041_v56  ;;  %v219_v59 = vmul.f32 %v8023_v52, %v8045_v22  ;;  %v6359_v22 = vld [vmem:[#allocation14 + $0x9c] sm:$0xf0] }
 0x160   :  { %7452 = vtanh.f32 %v8055_v23 }
 0x167   :  { %v2418_v21 = vpop.f32.mrf.mxu0 }
 0x168   :  { %v2419_v37 = vadd.f32 %v2418_v21, %v2405_v57  ;;  %v2432_v54 = vpop.f32.mrf.mxu1  ;;  %v246_v57 = vmul.f32 %v8055_v23, %v8055_v23 }
 0x16a   :  { %v2433_v1 = vadd.f32 %v2432_v54, %v2419_v37  ;;  %v258_v18 = vadd.f32 %v257_v20, %v246_v57  ;;  %v212_v37 = vmul.f32 %v7969_v49, %v7989_v8  ;;  %v7262_v8 = vld [vmem:[#allocation14 + $0x38] sm:$0xf0] }
 0x16c   :  { %259 = vadd.xlane.f32.xlu0 %v258_v18  ;;  %v223_v18 = vadd.f32 %v222_v40, %v212_v37 }
 0x16f   :  { %v2446_v21 = vpop.f32.mrf.mxu2 }
 0x170   :  { %v2447_v2 = vadd.f32 %v2446_v21, %v2433_v1  ;;  %v2460_v0 = vpop.f32.mrf.mxu3  ;;  %v228_v1 = vadd.f32 %v216_v53, %v215_v50  ;;  %v2434_v30 = vpop.f32.mrf.mxu1 }
 0x172   :  { %v2461_v9 = vadd.f32 %v2460_v0, %v2447_v2  ;;  %v229_v57 = vadd.f32 %v228_v1, %v217_v61  ;;  %v220_v2 = vmul.f32 %v8027_v62, %v8055_v23 }
 0x174   :  { %v2636_v27 = vmul.f32 %v2461_v9, %v7969_v49  ;;  %v213_v9 = vmul.f32 %v7985_v6, %v7991_v58  ;;  %v230_v21 = vadd.f32 %v229_v57, %v218_v4 }
 0x176   :  { %v8065_v14 = vadd.f32 %v7959_v47, %v2636_v27  ;;  %v214_v47 = vmul.f32 %v7987_v7, %v7997_v13  ;;  %v224_v45 = vadd.f32 %v223_v18, %v213_v9  ;;  %v231_v0 = vadd.f32 %v230_v21, %v219_v59  ;;  %v2420_v27 = vpop.f32.mrf.mxu0 }
 0x177   :  { %v2448_v46 = vpop.f32.mrf.mxu2 }
 0x178   :  { %v225_v54 = vadd.f32 %v224_v45, %v214_v47  ;;  %v232_v20 = vadd.f32 %v231_v0, %v220_v2  ;;  %v8091_v36 = vpop.f32.mrf.mxu3  ;;  %v7431_v45 = vpop.eup %7430 }
 0x179   :  { %v7433_v53 = vpop.eup %7432 }
 0x17a   :  { %226 = vadd.xlane.f32.xlu2 %v225_v54  ;;  %v7435_v61 = vpop.eup %7434  ;;  %v8097_v4 = vpack.c.bf16 %v7433_v53, %v7431_v45  ;;  %v2155_v53 = vadd.f32 %v7898_v26, %v7896_v15 }
 0x17b   :  { %v7437_v57 = vpop.eup %7436 }
 0x17c   :  { %v8099_v59 = vpack.c.bf16 %v7437_v57, %v7435_v61  ;;  %v2937_v35 = vunpack.c.l.b16 %v8097_v4  ;;  %v2323_v61 = vadd.f32 %v7949_v33, %v7947_v32  ;;  %v2239_v57 = vadd.f32 %v7923_v44, %v7920_v41 }
 0x17e   :  { %v2938_v39 = vunpack.c.l.b16 %v8099_v59  ;;  %v2337_v49 = vadd.f32 %v7961_v48, %v2323_v61  ;;  %v8851_v61 = vld [vmem:[#allocation25_spill] sm:$0xff] }
 0x180   :  { %v8103_v10 = vpack.c.b16 %v2938_v39, %v2937_v35  ;;  %v2169_v39 = vadd.f32 %v7904_v51, %v2155_v53 }
 0x182   :  { %233 = vadd.xlane.f32.xlu2 %v232_v20  ;;  %v2183_v44 = vadd.f32 %v7906_v55, %v2169_v39 }
 0x187   :  { %v2474_v24 = vpop.f32.mrf.mxu0 }
 0x188   :  { %v2488_v37 = vpop.f32.mrf.mxu1 }
 0x189   :  { %v2489_v2 = vadd.f32 %v2488_v37, %v2474_v24  ;;  %v2253_v37 = vadd.f32 %v7935_v42, %v2239_v57  ;;  %v2351_v42 = vadd.f32 %v7963_v11, %v2337_v49  ;;  %v8852_v57 = vld [vmem:[#allocation31_spill] sm:$0xff] }
 0x18b   :  { %v2267_v15 = vadd.f32 %v7937_v43, %v2253_v37 }
 0x18d   :  { %v2281_v51 = vadd.f32 %v7943_v3, %v2267_v15 }
 0x18f   :  { %v2502_v9 = vpop.f32.mrf.mxu2  ;;  %v2476_v18 = vpop.f32.mrf.mxu0 }
 0x190   :  { %v2516_v40 = vpop.f32.mrf.mxu3  ;;  %v2490_v47 = vpop.f32.mrf.mxu1  ;;  %v2503_v20 = vadd.f32 %v2502_v9, %v2489_v2  ;;  %v2407_v9 = vadd.f32 %v8035_v5, %v8029_v63  ;;  %v8849_v63 = vld [vmem:[#allocation30_spill] sm:$0xff] }
 0x191   :  { %v2491_v2 = vadd.f32 %v2490_v47, %v2476_v18  ;;  %v2365_v5 = vadd.f32 %v8849_v63, %v2351_v42 }
 0x192   :  { %v2517_v35 = vadd.f32 %v2516_v40, %v2503_v20  ;;  %v2421_v26 = vadd.f32 %v2420_v27, %v2407_v9  ;;  %v2197_v20 = vadd.f32 %v7913_v19, %v2183_v44  ;;  %v8850_v27 = vld [vmem:[#allocation27_spill] sm:$0xff] }
 0x193   :  { %v2379_v11 = vadd.f32 %v8852_v57, %v2365_v5  ;;  %v7259_v57 = vld [vmem:[#allocation14 + $0x20] sm:$0xf0] }
 0x194   :  { %v2435_v47 = vadd.f32 %v2434_v30, %v2421_v26  ;;  %v2211_v55 = vadd.f32 %v8851_v61, %v2197_v20  ;;  %v7265_v20 = vld [vmem:[#allocation14 + $0x50] sm:$0xf0] }
 0x197   :  { %v2504_v54 = vpop.f32.mrf.mxu2 }
 0x198   :  { %v2518_v50 = vpop.f32.mrf.mxu3  ;;  %v2505_v40 = vadd.f32 %v2504_v54, %v2491_v2  ;;  %v2641_v2 = vmul.f32 %v2379_v11, %v8009_v25  ;;  %v6307_v11 = vor.u32 %v7262_v8, %v6306_v60  ;;  %v6347_v8 = vld [vmem:[#allocation14 + $0x84] sm:$0xf0] }
 0x19a   :  { %3095 = vrot.lane.b32.xlu2 %v8103_v10, %s7761_s10 }
 0x1a7   :  { %v2530_v1 = vpop.f32.mrf.mxu0 }
 0x1a8   :  { %v2544_v21 = vpop.f32.mrf.mxu1  ;;  %v2531_v32 = vadd.f32 %v2530_v1, %v2517_v35  ;;  %v2295_v1 = vadd.f32 %v8850_v27, %v2281_v51 }
 0x1aa   :  { %v2545_v43 = vadd.f32 %v2544_v21, %v2531_v32  ;;  %v2640_v30 = vmul.f32 %v2295_v1, %v8003_v17 }
 0x1ac   :  { %v2637_v3 = vmul.f32 %v2545_v43, %v7985_v6  ;;  %v7439_v43 = vpop.eup %7438 }
 0x1ad   :  { %v7441_v27 = vpop.eup %7440 }
 0x1ae   :  { %v2648_v32 = vadd.f32 %v8065_v14, %v2637_v3  ;;  %v7443_v1 = vpop.eup %7442  ;;  %v8143_v61 = vpack.c.bf16 %v7441_v27, %v7439_v43 }
 0x1af   :  { %v2558_v12 = vpop.f32.mrf.mxu2  ;;  %v2532_v45 = vpop.f32.mrf.mxu0 }
 0x1b0   :  { %v2572_v0 = vpop.f32.mrf.mxu3  ;;  %v2546_v24 = vpop.f32.mrf.mxu1  ;;  %v3546_v28 = vunpack.c.l.b16 %v8143_v61 }
 0x1b1   :  { %v2573_v33 = vadd.f32 %v2572_v0, %v2558_v12  ;;  %v2449_v12 = vadd.f32 %v2448_v46, %v2435_v47  ;;  %v2519_v0 = vadd.f32 %v2518_v50, %v2505_v40  ;;  %v2639_v50 = vmul.f32 %v2211_v55, %v8001_v16  ;;  %v6294_v55 = vld [vmem:[#allocation14 + $0x18] sm:$0xf] }
 0x1b3   :  { %v2533_v54 = vadd.f32 %v2532_v45, %v2519_v0  ;;  %v2463_v21 = vadd.f32 %v8091_v36, %v2449_v12  ;;  %v3242_v12 = vunpack.c.h.b16 %v8097_v4  ;;  %v3243_v0 = vunpack.c.h.b16 %v8099_v59  ;;  %v7256_v59 = vld [vmem:[#allocation14 + $0x8] sm:$0xf0] }
 0x1b4   :  { %v6295_v4 = vor.u32 %v7259_v57, %v6294_v55  ;;  %v3850_v57 = vunpack.c.h.b16 %v8143_v61  ;;  %v7245_v61 = vld [vmem:[%s8833_s6 + $0x30] sm:$0xff] }
 0x1b5   :  { %v2547_v15 = vadd.f32 %v2546_v24, %v2533_v54  ;;  %v6282_v54 = vld [vmem:[#allocation14] sm:$0xf] }
 0x1b7   :  { %v2560_v38 = vpop.f32.mrf.mxu2  ;;  %v2643_v36 = vmul.f32 %v2547_v15, %v8023_v52 }
 0x1b8   :  { %v2574_v31 = vpop.f32.mrf.mxu3 }
 0x1b9   :  { %v2575_v37 = vadd.f32 %v2574_v31, %v2560_v38  ;;  %v2652_v31 = vadd.f32 %v2640_v30, %v2639_v50  ;;  %v2642_v38 = vmul.f32 %v2463_v21, %v8013_v34  ;;  %v6283_v21 = vor.u32 %v7256_v59, %v6282_v54  ;;  %v6314_v50 = vld [vmem:[#allocation14 + $0x38] sm:$0xf]  ;;  %v7277_v59 = vld [vmem:[#allocation14 + $0xb0] sm:$0xf0] }
 0x1bb   :  { %v2653_v42 = vadd.f32 %v2652_v31, %v2641_v2  ;;  %v7263_v2 = vld [vmem:[#allocation14 + $0x40] sm:$0xf0]  ;;  %v7260_v31 = vld [vmem:[#allocation14 + $0x28] sm:$0xf0] }
 0x1bd   :  { %v2654_v63 = vadd.f32 %v2653_v42, %v2642_v38  ;;  %v7261_v38 = vld [vmem:[#allocation14 + $0x34] sm:$0xf]  ;;  %v6296_v42 = vld [vmem:[#allocation14 + $0x24] sm:$0xf0] }
 0x1c5   :  { %v8155_v15 = vpop.xlane.xlu1 %302 }
 0x1c6   :  { %7454 = vrsqrt.f32 %v8155_v15  ;;  %vm318_vm1 = vcmp.eq.f32.partialorder %v8155_v15, inf  ;;  %vm320_vm3 = vcmp.eq.f32.partialorder %v8155_v15, 0.0 }
 0x1c7   :  { %v2586_v41 = vpop.f32.mrf.mxu0 }
 0x1c8   :  { %v2587_v48 = vadd.f32 %v2586_v41, %v2573_v33  ;;  %v2600_v18 = vpop.f32.mrf.mxu1 }
 0x1ca   :  { %v2601_v53 = vadd.f32 %v2600_v18, %v2587_v48  ;;  %v6318_v48 = vld [vmem:[#allocation14 + $0x48] sm:$0xf]  ;;  %v2655_v18 = vadd.f32 %v2654_v63, %v2643_v36 }
 0x1cb   :  { %v6319_v5 = vor.u32 %v7265_v20, %v6318_v48  ;;  %v7276_v20 = vld [vmem:[#allocation14 + $0xac] sm:$0xf] }
 0x1cd   :  { %3012 = vmatpush.bf16.msrb.mxu2 %v6319_v5 }
 0x1ce   :  { %v8169_v5 = vpop.xlane.xlu1 %309 }
 0x1cf   :  { %v2614_v49 = vpop.f32.mrf.mxu2  ;;  %v2588_v39 = vpop.f32.mrf.mxu0  ;;  %vm330_vm5 = vcmp.eq.f32.partialorder %v8169_v5, inf  ;;  %vm332_vm7 = vcmp.eq.f32.partialorder %v8169_v5, 0.0 }
 0x1d0   :  { %v2615_v19 = vadd.f32 %v2614_v49, %v2601_v53  ;;  %v2628_v35 = vpop.f32.mrf.mxu3  ;;  %v2589_v46 = vadd.f32 %v2588_v39, %v2575_v37  ;;  %v2602_v45 = vpop.f32.mrf.mxu1  ;;  %v8148_v49 = vpack.c.b16 %v3243_v0, %v3242_v12  ;;  %v7264_v37 = vld [vmem:[#allocation14 + $0x4c] sm:$0xf]  ;;  %v6320_v39 = vld [vmem:[#allocation14 + $0x54] sm:$0xf0]  ;;  %v6284_v12 = vld [vmem:[#allocation14 + $0xc] sm:$0xf0] }
 0x1d1   :  { %v7445_v53 = vpop.eup %7444  ;;  %3013 = vmatpush.bf16.msrb.mxu2 %v6307_v11  ;;  %v7246_v0 = vld [vmem:[%s8833_s6 + $0x38] sm:$0xff] }
 0x1d2   :  { %v2629_v9 = vadd.f32 %v2628_v35, %v2615_v19  ;;  %v2603_v33 = vadd.f32 %v2602_v45, %v2589_v46  ;;  %v8145_v56 = vpack.c.bf16 %v7443_v1, %v7445_v53  ;;  %v6326_v19 = vld [vmem:[#allocation14 + $0x50] sm:$0xf]  ;;  %v7266_v35 = vld [vmem:[#allocation14 + $0x58] sm:$0xf0]  ;;  %v6302_v45 = vld [vmem:[#allocation14 + $0x20] sm:$0xf]  ;;  %v7447_v63 = vpop.eup %7446  ;;  %2851 = vmatpush.bf16.msrb.mxu0 %v7246_v0 }
 0x1d3   :  { %v6327_v46 = vor.u32 %v7266_v35, %v6326_v19  ;;  %v6303_v36 = vor.u32 %v7260_v31, %v6302_v45  ;;  %v7255_v1 = vld [vmem:[#allocation14 + $0x4] sm:$0xf]  ;;  %v7270_v53 = vld [vmem:[#allocation14 + $0x7c] sm:$0xf]  ;;  %v7254_v11 = vld [vmem:[%s8833_s6 + $0x78] sm:$0xff] }
 0x1d4   :  { %v2638_v26 = vmul.f32 %v2629_v9, %v7987_v7  ;;  %v3547_v3 = vunpack.c.l.b16 %v8145_v56  ;;  %v6323_v9 = vor.u32 %v7264_v37, %v6320_v39  ;;  %v6287_v55 = vor.u32 %v7255_v1, %v6284_v12  ;;  %2865 = vmatpush.bf16.msrb.mxu1 %v7254_v11  ;;  %v7268_v1 = vld [vmem:[#allocation14 + $0x68] sm:$0xf0]  ;;  %v7283_v11 = vld [vmem:[#allocation14 + $0xe0] sm:$0xf0] }
 0x1d5   :  { %3014 = vmatpush.bf16.msrb.mxu2 %v6295_v4  ;;  %v3851_v4 = vunpack.c.h.b16 %v8145_v56  ;;  %v6350_v19 = vor.u32 %v7270_v53, %v6347_v8 }
 0x1d6   :  { %v2649_v41 = vadd.f32 %v2648_v32, %v2638_v26  ;;  %v8151_v30 = vpack.c.b16 %v3547_v3, %v3546_v28  ;;  %3026 = vmatpush.bf16.msrb.mxu3 %v6323_v9  ;;  %v6315_v26 = vor.u32 %v7263_v2, %v6314_v50  ;;  %v8157_v32 = vpop.xlane.xlu0 %252  ;;  %v6369_v3 = vld [vmem:[#allocation14 + $0xa8] sm:$0xf]  ;;  %v7274_v9 = vld [vmem:[#allocation14 + $0x98] sm:$0xf0]  ;;  %v7267_v50 = vld [vmem:[#allocation14 + $0x64] sm:$0xf]  ;;  %2852 = vmatpush.bf16.msrb.mxu0 %v7245_v61 }
 0x1d7   :  { %v2616_v44 = vpop.f32.mrf.mxu2  ;;  %7456 = vrsqrt.f32 %v8157_v32  ;;  %v6370_v35 = vor.u32 %v7277_v59, %v6369_v3  ;;  %v8194_v39 = vpack.c.b16 %v3851_v4, %v3850_v57  ;;  %v6335_v2 = vld [vmem:[#allocation14 + $0x6c] sm:$0xf0]  ;;  %v6396_v57 = vld [vmem:[#allocation14 + $0xd8] sm:$0xf]  ;;  %vm268_vm2 = vcmp.eq.f32.partialorder %v8157_v32, inf }
 0x1d8   :  { %v2617_v51 = vadd.f32 %v2616_v44, %v2603_v33  ;;  %2650 = vadd.xlane.f32.xlu0 %v2649_v41  ;;  %v2630_v40 = vpop.f32.mrf.mxu3  ;;  %v6308_v33 = vld [vmem:[#allocation14 + $0x3c] sm:$0xf0]  ;;  %v7258_v44 = vld [vmem:[#allocation14 + $0x1c] sm:$0xf]  ;;  %7458 = vrsqrt.f32 %v8169_v5  ;;  %vm270_vm4 = vcmp.eq.f32.partialorder %v8157_v32, 0.0 }
 0x1d9   :  { %3015 = vmatpush.bf16.msrb.mxu2 %v6283_v21  ;;  %v6311_v41 = vor.u32 %v7261_v38, %v6308_v33  ;;  %v6299_v48 = vor.u32 %v7258_v44, %v6296_v42  ;;  %v6357_v21 = vld [vmem:[#allocation14 + $0x90] sm:$0xf]  ;;  %4005 = vrot.lane.b32.xlu2 %v8194_v39, %s7761_s10  ;;  %v6420_v38 = vld [vmem:[#allocation14 + $0x108] sm:$0xf]  ;;  %v7289_v33 = vld [vmem:[#allocation14 + $0x110] sm:$0xf0] }
 0x1da   :  { %v2631_v24 = vadd.f32 %v2630_v40, %v2617_v51  ;;  %v6290_v51 = vld [vmem:[#allocation14 + $0x8] sm:$0xf]  ;;  %v7257_v40 = vld [vmem:[#allocation14 + $0x10] sm:$0xf0]  ;;  %v6358_v42 = vor.u32 %v7274_v9, %v6357_v21  ;;  %v6384_v9 = vld [vmem:[#allocation14 + $0xc0] sm:$0xf] }
 0x1db   :  { %3027 = vmatpush.bf16.msrb.mxu3 %v6311_v41  ;;  %v6291_v58 = vor.u32 %v7257_v40, %v6290_v51  ;;  %v6338_v51 = vor.u32 %v7267_v50, %v6335_v2  ;;  %v6345_v40 = vld [vmem:[#allocation14 + $0x78] sm:$0xf] }
 0x1dc   :  { %v2644_v14 = vmul.f32 %v2631_v24, %v8027_v62  ;;  %6328 = vmatmul.msk.bf16.vlgmr.msrb.gmra.mxu2 %vm3004_vm0, %v8103_v10  ;;  %v6371_v24 = vld [vmem:[#allocation14 + $0xb4] sm:$0xf0] }
 0x1dd   :  { %3040 = vmatpush.bf16.msra.mxu2 %v6327_v46  ;;  %v6374_v13 = vor.u32 %v7276_v20, %v6371_v24 }
 0x1de   :  { %v2656_v47 = vadd.f32 %v2655_v18, %v2644_v14  ;;  %v7273_v14 = vld [vmem:[#allocation14 + $0x94] sm:$0xf]  ;;  %v7449_v18 = vpop.eup %7448 }
 0x1df   :  { %3028 = vmatpush.bf16.msrb.mxu3 %v6299_v48  ;;  %v7451_v23 = vpop.eup %7450  ;;  %v6362_v27 = vor.u32 %v7273_v14, %v6359_v22  ;;  %v8187_v54 = vpack.c.bf16 %v7449_v18, %v7447_v63  ;;  %v7271_v48 = vld [vmem:[#allocation14 + $0x80] sm:$0xf0]  ;;  %v6408_v14 = vld [vmem:[#allocation14 + $0xf0] sm:$0xf]  ;;  %v7286_v22 = vld [vmem:[#allocation14 + $0xf8] sm:$0xf0] }
 0x1e0   :  { %2657 = vadd.xlane.f32.xlu1 %v2656_v47  ;;  %v8171_v47 = vpop.xlane.xlu0 %259  ;;  %v7453_v43 = vpop.eup %7452  ;;  %v6346_v18 = vor.u32 %v7271_v48, %v6345_v40  ;;  %v6409_v53 = vor.u32 %v7286_v22, %v6408_v14 }
 0x1e1   :  { %3041 = vmatpush.bf16.msra.mxu2 %v6315_v26  ;;  %v8177_v60 = vpop.eup %7454  ;;  %7460 = vrsqrt.f32 %v8171_v47  ;;  %v8189_v37 = vpack.c.bf16 %v7453_v43, %v7451_v23  ;;  %v4154_v26 = vunpack.c.l.b16 %v8187_v54  ;;  %v7244_v23 = vld [vmem:[%s8833_s6 + $0x28] sm:$0xff]  ;;  %vm280_vm6 = vcmp.eq.f32.partialorder %v8171_v47, inf }
 0x1e2   :  { %v8184_v28 = vpop.eup %7456  ;;  %v312_v56 = vmul.f32 %v8177_v60, %v8155_v15  ;;  %v7252_v43 = vld [vmem:[%s8833_s6 + $0x68] sm:$0xff]  ;;  %2853 = vmatpush.bf16.msrb.mxu0 %v7244_v23  ;;  %vm282_vm8 = vcmp.eq.f32.partialorder %v8171_v47, 0.0  ;;  %7462 = vtanh.f32 %v7926_v29  ;;  %v7251_v29 = vld [vmem:[%s8833_s6 + $0x60] sm:$0xff] }
 0x1e3   :  { %3029 = vmatpush.bf16.msrb.mxu3 %v6287_v55  ;;  %v262_v46 = vmul.f32 %v8184_v28, %v8157_v32  ;;  %v4155_v45 = vunpack.c.l.b16 %v8189_v37  ;;  %v8204_v31 = vpop.eup %7458  ;;  %7464 = vtanh.f32 %v8001_v16 }
 0x1e4   :  { %v313_v20 = vmul.f32 %v8177_v60, %v312_v56  ;;  %v7280_v56 = vld [vmem:[#allocation14 + $0xc8] sm:$0xf0] }
 0x1e5   :  { %3042 = vmatpush.bf16.msra.mxu2 %v6303_v36  ;;  %v8212_v36 = vpack.c.b16 %v4155_v45, %v4154_v26  ;;  %v263_v24 = vmul.f32 %v8184_v28, %v262_v46  ;;  %v6385_v46 = vor.u32 %v7280_v56, %v6384_v9 }
 0x1e6   :  { %6329 = vmatmul.msk.bf16.vlgmr.msrb.gmra.mxu3 %vm3004_vm0, %v8103_v10  ;;  %v314_v12 = vmul.f32 0.5, %v313_v20 }
 0x1e7   :  { %v7461_v41 = vpop.eup %7460  ;;  %3168 = vmatpush.bf16.msra.mxu3 %v6370_v35  ;;  %v264_v0 = vmul.f32 0.5, %v263_v24 }
 0x1e8   :  { %v274_v63 = vmul.f32 %v7461_v41, %v8171_v47  ;;  %v315_v59 = vsub.f32 1.5, %v314_v12  ;;  %v7463_v16 = vpop.eup %7462  ;;  %v7288_v12 = vld [vmem:[#allocation14 + $0x10c] sm:$0xf] }
 0x1e9   :  { %3043 = vmatpush.bf16.msra.mxu2 %v6291_v58  ;;  %v6421_v58 = vor.u32 %v7289_v33, %v6420_v38  ;;  %v265_v61 = vsub.f32 1.5, %v264_v0  ;;  %v6422_v0 = vld [vmem:[#allocation14 + $0x114] sm:$0xf0] }
 0x1ea   :  { %v275_v55 = vmul.f32 %v7461_v41, %v274_v63  ;;  %v316_v50 = vmul.f32 %v8177_v60, %v315_v59  ;;  %v321_v60 = vand.u32 2147483648, %v8155_v15  ;;  %v7250_v59 = vld [vmem:[%s8833_s6 + $0x58] sm:$0xff] }
 0x1eb   :  { %3169 = vmatpush.bf16.msra.mxu3 %v6358_v42  ;;  %v266_v2 = vmul.f32 %v8184_v28, %v265_v61  ;;  %v271_v28 = vand.u32 2147483648, %v8157_v32 }
 0x1ec   :  { %3397 = vrot.lane.b32.xlu0 %v8148_v49, %s7761_s10  ;;  %6330 = vmatmul.msk.bf16.vlgmr.msra.gmra.mxu2 %vm3004_vm0, %v8103_v10  ;;  %v7253_v10 = vld [vmem:[%s8833_s6 + $0x70] sm:$0xff]  ;;  %v276_v21 = vmul.f32 0.5, %v275_v55  ;;  %v317_v38 = vmul.f32 %v316_v50, %v8155_v15  ;;  %v6461_v50 = vld [vmem:[#allocation14 + $0x15c] sm:$0xf0] }
 0x1ed   :  { %3182 = vmatpush.bf16.msrb.mxu2 %v6374_v13  ;;  %v8210_v44 = vpop.xlane.xlu2 %226  ;;  %v324_v13 = vmul.f32 %v8204_v31, %v8169_v5  ;;  %2866 = vmatpush.bf16.msrb.mxu1 %v7253_v10  ;;  %v267_v33 = vmul.f32 %v266_v2, %v8157_v32 }
 0x1ee   :  { %v277_v45 = vsub.f32 1.5, %v276_v21  ;;  %v6410_v21 = vld [vmem:[#allocation14 + $0xfc] sm:$0xf0] }
 0x1ef   :  { %v325_v8 = vmul.f32 %v8204_v31, %v324_v13  ;;  %3170 = vmatpush.bf16.msra.mxu3 %v6346_v18  ;;  %v283_v13 = vand.u32 2147483648, %v8171_v47 }
 0x1f1   :  { %3183 = vmatpush.bf16.msrb.mxu2 %v6362_v27  ;;  %v6333_v27 = vld [vmem:[#allocation14 + $0x60] sm:$0xf]  ;;  %2867 = vmatpush.bf16.msrb.mxu1 %v7252_v43  ;;  %v326_v35 = vmul.f32 0.5, %v325_v8  ;;  %v6425_v8 = vor.u32 %v7288_v12, %v6422_v0 }
 0x1f2   :  { %v6334_v3 = vor.u32 %v7268_v1, %v6333_v27  ;;  %v8853_v1 = vld [vmem:[#allocation26_spill] sm:$0xff] }
 0x1f3   :  { %v327_v26 = vsub.f32 1.5, %v326_v35  ;;  %7466 = vtanh.f32 %v8853_v1  ;;  %v7285_v35 = vld [vmem:[#allocation14 + $0xf4] sm:$0xf] }
 0x1f4   :  { %4311 = vrot.lane.b32.xlu0 %v8212_v36, %s7761_s10  ;;  %3171 = vmatpush.bf16.msra.mxu3 %v6334_v3  ;;  %v7242_v3 = vld [vmem:[%s8833_s6 + $0x18] sm:$0xff]  ;;  %v6413_v9 = vor.u32 %v7285_v35, %v6410_v21  ;;  %v6506_v21 = vld [vmem:[#allocation14 + $0x1a0] sm:$0xf] }
 0x1f5   :  { %3184 = vmatpush.bf16.msrb.mxu2 %v6350_v19  ;;  %v8231_v4 = vpop.xlane.xlu2 %233  ;;  %v6397_v19 = vor.u32 %v7283_v11, %v6396_v57  ;;  %v328_v42 = vmul.f32 %v8204_v31, %v327_v26  ;;  %v319_v31 = vsel %vm318_vm1, %v8155_v15, %v317_v38  ;;  %2868 = vmatpush.bf16.msrb.mxu1 %v7251_v29  ;;  %v7300_v57 = vld [vmem:[#allocation14 + $0x16c] sm:$0xf]  ;;  %v8292_v26 = vld [vmem:[#allocation9] sm:$0x77]  ;;  %v7249_v38 = vld [vmem:[%s8833_s6 + $0x50] sm:$0xff] }
 0x1f6   :  { %v322_v20 = vsel %vm320_vm3, %v321_v60, %v319_v31  ;;  %v7282_v60 = vld [vmem:[#allocation14 + $0xdc] sm:$0xf]  ;;  %v2666_v1 = vperm.slane %v8292_v26, 4  ;;  %v6386_v29 = vld [vmem:[#allocation14 + $0xcc] sm:$0xf0] }
 0x1f7   :  { %v329_v48 = vmul.f32 %v328_v42, %v8169_v5 }
 0x1f8   :  { %3330 = vmatpush.bf16.msrb.mxu3 %v6425_v8  ;;  %v2675_v8 = vperm.slane %v8292_v26, 1 }
 0x1f9   :  { %3703 = vrot.lane.b32.xlu1 %v8151_v30, %s7761_s10  ;;  %3185 = vmatpush.bf16.msrb.mxu2 %v6338_v51  ;;  %v278_v51 = vmul.f32 %v7461_v41, %v277_v45  ;;  %v269_v41 = vsel %vm268_vm2, %v8157_v32, %v267_v33  ;;  %v331_v63 = vsel %vm330_vm5, %v8169_v5, %v329_v48  ;;  %v337_v32 = vadd.f32 1e-13, %v322_v20  ;;  %v7241_v45 = vld [vmem:[%s8833_s6 + $0x10] sm:$0xff] }
 0x1fa   :  { %v272_v24 = vsel %vm270_vm4, %v271_v28, %v269_v41  ;;  %2869 = vmatpush.bf16.msrb.mxu1 %v7250_v59  ;;  %v6398_v28 = vld [vmem:[#allocation14 + $0xe4] sm:$0xf0] }
 0x1fb   :  { %v279_v10 = vmul.f32 %v278_v51, %v8171_v47  ;;  %v335_v14 = vadd.f32 1e-13, %v272_v24  ;;  %v6401_v41 = vor.u32 %v7282_v60, %v6398_v28  ;;  %v2665_v24 = vperm.slane %v8292_v26, 0  ;;  %v7278_v60 = vld [vmem:[#allocation14 + $0xb8] sm:$0xf0] }
 0x1fc   :  { %3331 = vmatpush.bf16.msrb.mxu3 %v6413_v9  ;;  %v6530_v28 = vld [vmem:[#allocation14 + $0x1d0] sm:$0xf]  ;;  %v7305_v9 = vld [vmem:[#allocation14 + $0x190] sm:$0xf0] }
 0x1fd   :  { %3316 = vmatpush.bf16.msra.mxu2 %v6421_v58  ;;  %v8238_v40 = vpop.permute.xlu2 %3095  ;;  %v333_v58 = vand.u32 2147483648, %v8169_v5  ;;  %v281_v15 = vsel %vm280_vm6, %v8171_v47, %v279_v10  ;;  %v8262_v27 = vmul.f32 %v337_v32, %v335_v14  ;;  %v7243_v47 = vld [vmem:[%s8833_s6 + $0x20] sm:$0xff]  ;;  %v7248_v32 = vld [vmem:[%s8833_s6 + $0x48] sm:$0xff] }
 0x1fe   :  { %6380 = vmatmul.msk.bf16.vlgmr.msrb.gmra.mxu2 %vm3004_vm0, %v8238_v40  ;;  %6379 = vmatmul.msk.bf16.vlgmr.msra.gmra.mxu3 %vm3004_vm0, %v8238_v40  ;;  %v284_v18 = vsel %vm282_vm8, %v283_v13, %v281_v15  ;;  %v7294_v13 = vld [vmem:[#allocation14 + $0x13c] sm:$0xf] }
 0x1ff   :  { %v334_v22 = vsel %vm332_vm7, %v333_v58, %v331_v63  ;;  %v336_v43 = vadd.f32 1e-13, %v284_v18  ;;  %7468 = vrcp.f32 %v8262_v27  ;;  %2854 = vmatpush.bf16.msrb.mxu0 %v7243_v47  ;;  %v350_v31 = vand.u32 2147483647, %v8262_v27  ;;  %2870 = vmatpush.bf16.msrb.mxu1 %v7249_v38  ;;  %v6449_v63 = vld [vmem:[#allocation14 + $0x144] sm:$0xf0] }
 0x200   :  { %v338_v23 = vadd.f32 1e-13, %v334_v22  ;;  %7470 = vtanh.f32 %v8003_v17  ;;  %v6473_v17 = vld [vmem:[#allocation14 + $0x174] sm:$0xf0]  ;;  %3332 = vmatpush.bf16.msrb.mxu3 %v6401_v41  ;;  %v7240_v15 = vld [vmem:[%s8833_s6 + $0x8] sm:$0xff]  ;;  %v6452_v22 = vor.u32 %v7294_v13, %v6449_v63  ;;  %vm346_vm9 = vweird.f32 %v8262_v27 }
 0x201   :  { %3317 = vmatpush.bf16.msra.mxu2 %v6409_v53  ;;  %v7465_v53 = vpop.eup %7464  ;;  %v6476_v61 = vor.u32 %v7300_v57, %v6473_v17  ;;  %v7279_v47 = vld [vmem:[#allocation14 + $0xc4] sm:$0xf]  ;;  %v6437_v57 = vld [vmem:[#allocation14 + $0x12c] sm:$0xf0]  ;;  %v2676_v17 = vperm.slane %v8292_v26, 5  ;;  %vm8343_vm14 = vcmp.eq.f32.partialorder %v350_v31, 8.507059e+37  ;;  %v4458_v13 = vunpack.c.h.b16 %v8187_v54 }
 0x202   :  { %v8270_v5 = vmul.f32 %v338_v23, %v336_v43  ;;  %v7467_v55 = vpop.eup %7466  ;;  %v352_v43 = vand.u32 2147483648, %v8262_v27  ;;  %v6389_v12 = vor.u32 %v7279_v47, %v6386_v29  ;;  %v2689_v38 = vperm.slane %v8292_v26, 2  ;;  %v7275_v47 = vld [vmem:[#allocation14 + $0xa0] sm:$0xf0] }
 0x203   :  { %2855 = vmatpush.bf16.msrb.mxu0 %v7242_v3  ;;  %v2913_v42 = vpack.c.bf16 %v7467_v55, %v7463_v16  ;;  %2871 = vmatpush.bf16.msrb.mxu1 %v7248_v32  ;;  %v7291_v55 = vld [vmem:[#allocation14 + $0x124] sm:$0xf]  ;;  %v4459_v63 = vunpack.c.h.b16 %v8189_v37 }
 0x204   :  { %7472 = vrcp.f32 %v8270_v5  ;;  %v367_v16 = vand.u32 2147483648, %v8270_v5  ;;  %vm361_vm11 = vweird.f32 %v8270_v5  ;;  %v365_v59 = vand.u32 2147483647, %v8270_v5  ;;  %3333 = vmatpush.bf16.msrb.mxu3 %v6389_v12  ;;  %v7311_v12 = vld [vmem:[#allocation14 + $0x1c0] sm:$0xf0] }
 0x205   :  { %3318 = vmatpush.bf16.msra.mxu2 %v6397_v19  ;;  %v8280_v11 = vpop.eup %7468  ;;  %v3052_v48 = vunpack.c.l.b16 %v2913_v42  ;;  %v3354_v18 = vunpack.c.h.b16 %v2913_v42  ;;  %v6440_v35 = vor.u32 %v7291_v55, %v6437_v57  ;;  %v8369_v29 = vpack.c.b16 %v4459_v63, %v4458_v13  ;;  %v6416_v55 = vld [vmem:[#allocation14 + $0xf8] sm:$0xf]  ;;  %v7287_v57 = vld [vmem:[#allocation14 + $0x100] sm:$0xf0]  ;;  %v6494_v13 = vld [vmem:[#allocation14 + $0x188] sm:$0xf] }
 0x206   :  { %v7471_v19 = vpop.eup %7470  ;;  %v342_v56 = vmul.f32 %v8280_v11, %v8262_v27  ;;  %vm347_vm10 = vweird.f32 %v8280_v11  ;;  %v8355_v27 = vor.u32 1.1754944e-38, %v367_v16  ;;  %vm8363_vm1 = vcmp.eq.f32.partialorder %v365_v59, 8.507059e+37  ;;  %v6518_v16 = vld [vmem:[#allocation14 + $0x1b8] sm:$0xf] }
 0x207   :  { %v2916_v51 = vpack.c.bf16 %v7471_v19, %v7465_v53  ;;  %2856 = vmatpush.bf16.msrb.mxu0 %v7241_v45  ;;  %v7247_v19 = vld [vmem:[%s8833_s6 + $0x40] sm:$0xff]  ;;  %vm8339_vm13 = vmor %vm346_vm9, %vm347_vm10  ;;  %v6519_v37 = vor.u32 %v7311_v12, %v6518_v16  ;;  %4613 = vrot.lane.b32.xlu2 %v8369_v29, %s7761_s10  ;;  %v2680_v16 = vperm.slane %v2676_v17, 1 }
 0x208   :  { %v343_v20 = vsub.f32 1.0, %v342_v56  ;;  %v353_v56 = vor.u32 1.1754944e-38, %v352_v43  ;;  %2872 = vmatpush.bf16.msrb.mxu1 %v7247_v19  ;;  %v7296_v19 = vld [vmem:[#allocation14 + $0x148] sm:$0xf0]  ;;  %v7325_v45 = vld [vmem:[#allocation14 + $0x230] sm:$0xf0] }
 0x209   :  { %3319 = vmatpush.bf16.msra.mxu2 %v6385_v46  ;;  %v7297_v46 = vld [vmem:[#allocation14 + $0x154] sm:$0xf]  ;;  %v3053_v10 = vunpack.c.l.b16 %v2916_v51  ;;  %v3355_v23 = vunpack.c.h.b16 %v2916_v51 }
 0x20a   :  { %v8290_v2 = vpop.eup %7472  ;;  %v6464_v33 = vor.u32 %v7297_v46, %v6461_v50  ;;  %v344_v53 = vmul.f32 %v8280_v11, %v343_v20  ;;  %v6479_v46 = vld [vmem:[#allocation14 + $0x170] sm:$0xf]  ;;  %v7302_v50 = vld [vmem:[#allocation14 + $0x178] sm:$0xf0] }
 0x20b   :  { %v357_v58 = vmul.f32 %v8290_v2, %v8270_v5  ;;  %v8310_v14 = vpack.c.b16 %v3053_v10, %v3052_v48  ;;  %2857 = vmatpush.bf16.msrb.mxu0 %v7240_v15  ;;  %v8317_v0 = vpack.c.b16 %v3355_v23, %v3354_v18  ;;  %vm362_vm12 = vweird.f32 %v8290_v2  ;;  %v6377_v5 = vld [vmem:[#allocation14 + $0xb0] sm:$0xf]  ;;  %v7314_v10 = vld [vmem:[#allocation14 + $0x1d8] sm:$0xf0]  ;;  %v7299_v18 = vld [vmem:[#allocation14 + $0x160] sm:$0xf0] }
 0x20c   :  { %vm8351_vm15 = vmor %vm361_vm11, %vm362_vm12  ;;  %v6480_v42 = vor.u32 %v7302_v50, %v6479_v46  ;;  %v345_v51 = vadd.f32 %v8280_v11, %v344_v53  ;;  %v6378_v48 = vor.u32 %v7278_v60, %v6377_v5  ;;  %v6428_v20 = vld [vmem:[#allocation14 + $0x110] sm:$0xf]  ;;  %v6531_v15 = vor.u32 %v7314_v10, %v6530_v28  ;;  %v6365_v23 = vld [vmem:[#allocation14 + $0x98] sm:$0xf] }
 0x20d   :  { %3484 = vmatpush.bf16.msrb.mxu2 %v6476_v61  ;;  %3055 = vrot.lane.b32.xlu1 %v8310_v14, %s7761_s10  ;;  %v358_v3 = vsub.f32 1.0, %v357_v58  ;;  %v7239_v61 = vld [vmem:[%s8833_s6] sm:$0xff]  ;;  %v7290_v58 = vld [vmem:[#allocation14 + $0x118] sm:$0xf0]  ;;  %v6366_v54 = vor.u32 %v7275_v47, %v6365_v23  ;;  %v7272_v46 = vld [vmem:[#allocation14 + $0x88] sm:$0xf0] }
 0x20e   :  { %6430 = vmatmul.msk.bf16.vlgmr.msra.gmra.mxu2 %vm3004_vm0, %v8148_v49  ;;  %3357 = vrot.lane.b32.xlu0 %v8317_v0, %s7761_s10  ;;  %v6429_v32 = vor.u32 %v7290_v58, %v6428_v20  ;;  %v349_v53 = vsel %vm8339_vm13, %v8280_v11, %v345_v51  ;;  %v7308_v11 = vld [vmem:[#allocation14 + $0x1a8] sm:$0xf0]  ;;  %v6443_v28 = vld [vmem:[#allocation14 + $0x128] sm:$0xf]  ;;  %v7269_v58 = vld [vmem:[#allocation14 + $0x70] sm:$0xf0] }
 0x20f   :  { %2858 = vmatpush.bf16.msrb.mxu0 %v7239_v61  ;;  %6431 = vmatmul.msk.bf16.vlgmr.msrb.gmra.mxu3 %vm3004_vm0, %v8148_v49  ;;  %v359_v31 = vmul.f32 %v8290_v2, %v358_v3  ;;  %v6455_v3 = vld [vmem:[#allocation14 + $0x140] sm:$0xf]  ;;  %v6417_v61 = vor.u32 %v7287_v57, %v6416_v55  ;;  %v354_v51 = vsel %vm8343_vm14, %v353_v56, %v349_v53  ;;  %v7284_v60 = vld [vmem:[#allocation14 + $0xe8] sm:$0xf0]  ;;  %v6341_v20 = vld [vmem:[#allocation14 + $0x68] sm:$0xf] }
 0x210   :  { %3498 = vmatpush.bf16.msra.mxu3 %v6480_v42  ;;  %3196 = vmatpush.bf16.msra.mxu1 %v6378_v48  ;;  %v6456_v50 = vor.u32 %v7296_v19, %v6455_v3  ;;  %v6404_v42 = vld [vmem:[#allocation14 + $0xe0] sm:$0xf]  ;;  %v6507_v48 = vor.u32 %v7308_v11, %v6506_v21  ;;  %v6392_v56 = vld [vmem:[#allocation14 + $0xc8] sm:$0xf]  ;;  %v355_v23 = vmul.f32 %v354_v51, %v8210_v44  ;;  %v2693_v53 = vperm.slane %v2689_v38, 2 }
 0x211   :  { %3485 = vmatpush.bf16.msrb.mxu2 %v6464_v33  ;;  %v2690_v33 = vperm.slane %v8292_v26, 6  ;;  %v360_v59 = vadd.f32 %v8290_v2, %v359_v31  ;;  %v7293_v31 = vld [vmem:[#allocation14 + $0x130] sm:$0xf0]  ;;  %v6405_v10 = vor.u32 %v7284_v60, %v6404_v42  ;;  %v6573_v47 = vld [vmem:[#allocation14 + $0x228] sm:$0xf]  ;;  %v6342_v12 = vor.u32 %v7269_v58, %v6341_v20 }
 0x212   :  { %v8862_v51 = vld [vmem:[#allocation28_spill] sm:$0xff]  ;;  %v7319_v58 = vld [vmem:[#allocation14 + $0x200] sm:$0xf0] }
 0x213   :  { %3344 = vmatpush.bf16.msra.mxu0 %v6429_v32  ;;  %v364_v63 = vsel %vm8351_vm15, %v8290_v2, %v360_v59  ;;  %v7281_v32 = vld [vmem:[#allocation14 + $0xd0] sm:$0xf0]  ;;  %v2670_v2 = vperm.slane %v2666_v1, 0  ;;  %v2694_v1 = vperm.slane %v2690_v33, 2  ;;  %7474 = vtanh.f32 %v8862_v51  ;;  %v7310_v51 = vld [vmem:[#allocation14 + $0x1b8] sm:$0xf0] }
 0x214   :  { %3197 = vmatpush.bf16.msra.mxu1 %v6366_v54  ;;  %v6393_v55 = vor.u32 %v7281_v32, %v6392_v56  ;;  %7476 = vtanh.f32 %v8009_v25  ;;  %v6537_v32 = vld [vmem:[#allocation14 + $0x1e0] sm:$0xf] }
 0x215   :  { %3486 = vmatpush.bf16.msrb.mxu2 %v6452_v22  ;;  %v6467_v22 = vld [vmem:[#allocation14 + $0x158] sm:$0xf]  ;;  %v2672_v41 = vmul.f32 %v2670_v2, %v8210_v44  ;;  %v2674_v33 = vmul.f32 %v2670_v2, %v8231_v4  ;;  %v6471_v2 = vld [vmem:[#allocation14 + $0x168] sm:$0xf] }
 0x216   :  { %v6468_v43 = vor.u32 %v7299_v18, %v6467_v22  ;;  %v2669_v22 = vperm.slane %v2665_v24, 0  ;;  %v2679_v18 = vperm.slane %v2675_v8, 1  ;;  %v6574_v24 = vor.u32 %v7325_v45, %v6573_v47 }
 0x217   :  { %3345 = vmatpush.bf16.msra.mxu0 %v6417_v61  ;;  %v369_v8 = vsel %vm8363_vm1, %v8355_v27, %v364_v63  ;;  %v2682_v27 = vmul.f32 %v2680_v16, %v355_v23  ;;  %v2703_v61 = vld [vmem:[#allocation11] sm:$0x3] }
 0x218   :  { %3499 = vmatpush.bf16.msra.mxu3 %v6468_v43  ;;  %v2660_v43 = vstv %s8830_s3  ;;  %v2671_v17 = vmul.f32 %v2669_v22, %v8210_v44  ;;  %v2681_v3 = vmul.f32 %v2679_v18, %v355_v23  ;;  %v370_v59 = vmul.f32 %v369_v8, %v8231_v4  ;;  %s7762_s3 = smov [#allocation18]  }
 0x219   :  { %3487 = vmatpush.bf16.msrb.mxu2 %v6440_v35  ;;  %v6353_v35 = vld [vmem:[#allocation14 + $0x80] sm:$0xf]  ;;  %v2673_v26 = vmul.f32 %v2669_v22, %v8231_v4  ;;  %v2686_v21 = vadd.f32 %v2682_v27, %v2672_v41  ;;  %v8863_v4 = vld [vmem:[#allocation29_spill] sm:$0xff] }
 0x21a   :  { %v6354_v5 = vor.u32 %v7272_v46, %v6353_v35  ;;  %v2685_v35 = vadd.f32 %v2681_v3, %v2671_v17  ;;  %v6561_v46 = vld [vmem:[#allocation14 + $0x210] sm:$0xf]  ;;  %v2683_v11 = vmul.f32 %v2679_v18, %v370_v59  ;;  %v2684_v42 = vmul.f32 %v2680_v16, %v370_v59  ;;  %v7316_v18 = vld [vmem:[#allocation14 + $0x1e8] sm:$0xf0]  ;;  %v7301_v16 = vld [vmem:[#allocation14 + $0x170] sm:$0xf0] }
 0x21b   :  { %3346 = vmatpush.bf16.msra.mxu0 %v6405_v10  ;;  %7478 = vtanh.f32 %v8863_v4  ;;  %v6538_v45 = vor.u32 %v7316_v18, %v6537_v32  ;;  %v7295_v4 = vld [vmem:[#allocation14 + $0x140] sm:$0xf0]  ;;  %v6498_v32 = vld [vmem:[#allocation14 + $0x198] sm:$0xf]  ;;  %v7330_v18 = vld [vmem:[#allocation14 + $0x25c] sm:$0xf] }
 0x21c   :  { %3500 = vmatpush.bf16.msra.mxu3 %v6456_v50  ;;  %3198 = vmatpush.bf16.msra.mxu1 %v6354_v5  ;;  %v7322_v50 = vld [vmem:[#allocation14 + $0x218] sm:$0xf0]  ;;  %v2705_v5 = vperm.slane %v2703_v61, 0  ;;  %v2687_v63 = vadd.f32 %v2683_v11, %v2673_v26  ;;  %7480 = vtanh.f32 %v8013_v34  ;;  %v6626_v34 = vld [vmem:[#allocation14 + $0x294] sm:$0xf0] }
 0x21d   :  { %3648 = vmatpush.bf16.msra.mxu2 %v6531_v15  ;;  %v6444_v15 = vor.u32 %v7293_v31, %v6443_v28  ;;  %v6562_v44 = vor.u32 %v7322_v50, %v6561_v46  ;;  %v6549_v31 = vld [vmem:[#allocation14 + $0x1f8] sm:$0xf]  ;;  %v7298_v50 = vld [vmem:[#allocation14 + $0x158] sm:$0xf0]  ;;  %7482 = vtanh.f32 %v7985_v6  ;;  %v7329_v6 = vld [vmem:[#allocation14 + $0x250] sm:$0xf0] }
 0x21e   :  { %v7334_v11 = vld [vmem:[#allocation14 + $0x278] sm:$0xf0]  ;;  %7484 = vtanh.f32 %v7987_v7  ;;  %v7364_v7 = vld [vmem:[#allocation14 + $0x368] sm:$0xf0] }
 0x21f   :  { %3347 = vmatpush.bf16.msra.mxu0 %v6393_v55  ;;  %7486 = vtanh.f32 %v8023_v52  ;;  %v7349_v52 = vld [vmem:[#allocation14 + $0x2f0] sm:$0xf0] }
 0x220   :  { %3501 = vmatpush.bf16.msra.mxu3 %v6444_v15  ;;  %3199 = vmatpush.bf16.msra.mxu1 %v6342_v12  ;;  %v2688_v15 = vadd.f32 %v2684_v42, %v2674_v33  ;;  %7488 = vtanh.f32 %v8027_v62 }
 0x221   :  { %3649 = vmatpush.bf16.msra.mxu2 %v6519_v37  ;;  %v6495_v37 = vor.u32 %v7305_v9, %v6494_v13  ;;  %v6550_v13 = vor.u32 %v7319_v58, %v6549_v31 }
 0x224   :  { %3776 = vmatpush.bf16.msrb.mxu3 %v6574_v24 }
 0x225   :  { %3650 = vmatpush.bf16.msra.mxu2 %v6507_v48  ;;  %v2706_v48 = vperm.slane %v2703_v61, 1 }
 0x228   :  { %3777 = vmatpush.bf16.msrb.mxu3 %v6562_v44  ;;  %v6510_v44 = vld [vmem:[#allocation14 + $0x1b0] sm:$0xf] }
 0x229   :  { %3651 = vmatpush.bf16.msra.mxu2 %v6495_v37  ;;  %v7337_v37 = vld [vmem:[#allocation14 + $0x290] sm:$0xf0]  ;;  %v6511_v58 = vor.u32 %v7310_v51, %v6510_v44  ;;  %v6665_v51 = vld [vmem:[#allocation14 + $0x2dc] sm:$0xf0] }
 0x22a   :  { %v7345_v44 = vld [vmem:[#allocation14 + $0x2d4] sm:$0xf] }
 0x22c   :  { %3778 = vmatpush.bf16.msrb.mxu3 %v6550_v13  ;;  %v6600_v13 = vld [vmem:[#allocation14 + $0x258] sm:$0xf] }
 0x230   :  { %3779 = vmatpush.bf16.msrb.mxu3 %v6538_v45 }
 0x24b   :  { %v2651_v54 = vpop.xlane.xlu0 %2650 }
 0x24c   :  { %v2661_v57 = vadd.f32 %v2660_v43, %v2651_v54  ;;  %v6624_v54 = vld [vmem:[#allocation14 + $0x288] sm:$0xf] }
 0x24d   :  { %v6625_v61 = vor.u32 %v7337_v37, %v6624_v54  ;;  %v7304_v37 = vld [vmem:[#allocation14 + $0x188] sm:$0xf0] }
 0x24e   :  { %v2695_v38 = vmul.f32 %v2693_v53, %v2661_v57  ;;  %v2696_v19 = vmul.f32 %v2694_v1, %v2661_v57  ;;  %v7336_v57 = vld [vmem:[#allocation14 + $0x28c] sm:$0xf] }
 0x24f   :  { %v6629_v42 = vor.u32 %v7336_v57, %v6626_v34  ;;  %v7312_v34 = vld [vmem:[#allocation14 + $0x1cc] sm:$0xf] }
 0x250   :  { %v2699_v60 = vadd.f32 %v2695_v38, %v2685_v35  ;;  %v2700_v10 = vadd.f32 %v2696_v19, %v2686_v21  ;;  %v6472_v38 = vor.u32 %v7301_v16, %v6471_v2  ;;  %v6459_v19 = vld [vmem:[#allocation14 + $0x150] sm:$0xf]  ;;  %v7292_v2 = vld [vmem:[#allocation14 + $0x128] sm:$0xf0] }
 0x251   :  { %v6612_v21 = vld [vmem:[#allocation14 + $0x270] sm:$0xf] }
 0x252   :  { %v2709_v22 = vadd.f32 %v2705_v5, %v2699_v60  ;;  %v2710_v23 = vadd.f32 %v2706_v48, %v2700_v10  ;;  %v6613_v31 = vor.u32 %v7334_v11, %v6612_v21  ;;  %v7333_v10 = vld [vmem:[#allocation14 + $0x274] sm:$0xf] }
 0x253   :  { %v2658_v28 = vpop.xlane.xlu1 %2657  ;;  %v7309_v21 = vld [vmem:[#allocation14 + $0x1b4] sm:$0xf] }
 0x254   :  { %v2662_v20 = vadd.f32 %v2660_v43, %v2658_v28  ;;  %v7475_v43 = vpop.eup %7474  ;;  %v2713_v17 = vmax.f32 %v2709_v22, 0.0  ;;  %v2714_v3 = vmax.f32 %v2710_v23, 0.0  ;;  %v6460_v28 = vor.u32 %v7298_v50, %v6459_v19  ;;  %v7307_v22 = vld [vmem:[#allocation14 + $0x1a0] sm:$0xf0]  ;;  %v6602_v23 = vld [vmem:[#allocation14 + $0x264] sm:$0xf0] }
 0x255   :  { %v7477_v12 = vpop.eup %7476  ;;  %v6499_v16 = vor.u32 %v7307_v22, %v6498_v32  ;;  %v6605_v54 = vor.u32 %v7330_v18, %v6602_v23  ;;  %v6683_v19 = vld [vmem:[#allocation14 + $0x2f0] sm:$0xf]  ;;  %v7318_v22 = vld [vmem:[#allocation14 + $0x1fc] sm:$0xf]  ;;  %v6551_v18 = vld [vmem:[#allocation14 + $0x204] sm:$0xf0] }
 0x256   :  { %v2697_v9 = vmul.f32 %v2693_v53, %v2662_v20  ;;  %v2698_v56 = vmul.f32 %v2694_v1, %v2662_v20  ;;  %v6522_v53 = vld [vmem:[#allocation14 + $0x1c8] sm:$0xf]  ;;  %v7479_v55 = vpop.eup %7478  ;;  %v7313_v1 = vld [vmem:[#allocation14 + $0x1d0] sm:$0xf0]  ;;  %v6614_v20 = vld [vmem:[#allocation14 + $0x27c] sm:$0xf0] }
 0x257   :  { %v7481_v59 = vpop.eup %7480  ;;  %v6523_v46 = vor.u32 %v7313_v1, %v6522_v53  ;;  %v7327_v53 = vld [vmem:[#allocation14 + $0x244] sm:$0xf]  ;;  %v7344_v23 = vld [vmem:[#allocation14 + $0x2c8] sm:$0xf0] }
 0x258   :  { %v2701_v47 = vadd.f32 %v2697_v9, %v2687_v63  ;;  %v2702_v25 = vadd.f32 %v2698_v56, %v2688_v15  ;;  %v8418_v60 = vpack.c.bf16 %v7481_v59, %v7477_v12  ;;  %v7331_v63 = vld [vmem:[#allocation14 + $0x260] sm:$0xf0]  ;;  %v6617_v15 = vor.u32 %v7333_v10, %v6614_v20  ;;  %v6588_v12 = vld [vmem:[#allocation14 + $0x240] sm:$0xf]  ;;  %v7324_v59 = vld [vmem:[#allocation14 + $0x22c] sm:$0xf] }
 0x259   :  { %v6601_v45 = vor.u32 %v7331_v63, %v6600_v13  ;;  %v6668_v20 = vor.u32 %v7345_v44, %v6665_v51  ;;  %v7347_v13 = vld [vmem:[#allocation14 + $0x2e0] sm:$0xf0]  ;;  %v6722_v44 = vld [vmem:[#allocation14 + $0x338] sm:$0xf] }
 0x25a   :  { %v2711_v24 = vadd.f32 %v2705_v5, %v2701_v47  ;;  %v2712_v8 = vadd.f32 %v2706_v48, %v2702_v25  ;;  %v8416_v5 = vpack.c.bf16 %v7479_v55, %v7475_v43  ;;  %v6447_v48 = vld [vmem:[#allocation14 + $0x138] sm:$0xf]  ;;  %v3963_v56 = vunpack.c.h.b16 %v8418_v60  ;;  %v6435_v43 = vld [vmem:[#allocation14 + $0x120] sm:$0xf]  ;;  %v6590_v55 = vld [vmem:[#allocation14 + $0x24c] sm:$0xf0] }
 0x25b   :  { %v6448_v25 = vor.u32 %v7295_v4, %v6447_v48  ;;  %v6436_v1 = vor.u32 %v7292_v2, %v6435_v43  ;;  %v6563_v48 = vld [vmem:[#allocation14 + $0x21c] sm:$0xf0]  ;;  %v6671_v4 = vld [vmem:[#allocation14 + $0x2d8] sm:$0xf]  ;;  %v6488_v43 = vld [vmem:[#allocation14 + $0x18c] sm:$0xf0]  ;;  %v6554_v2 = vor.u32 %v7318_v22, %v6551_v18 }
 0x25c   :  { %v2715_v41 = vmax.f32 %v2711_v24, 0.0  ;;  %v2716_v27 = vmax.f32 %v2712_v8, 0.0  ;;  %v3962_v9 = vunpack.c.h.b16 %v8416_v5  ;;  %v7328_v24 = vld [vmem:[#allocation14 + $0x248] sm:$0xf0]  ;;  %v6486_v8 = vld [vmem:[#allocation14 + $0x180] sm:$0xf]  ;;  %v6672_v32 = vor.u32 %v7347_v13, %v6671_v4 }
 0x25d   :  { %v6589_v57 = vor.u32 %v7328_v24, %v6588_v12  ;;  %v6641_v12 = vld [vmem:[#allocation14 + $0x2ac] sm:$0xf0]  ;;  %v7315_v24 = vld [vmem:[#allocation14 + $0x1e4] sm:$0xf]  ;;  %v6710_v22 = vld [vmem:[#allocation14 + $0x320] sm:$0xf] }
 0x25e   :  { %v8410_v35 = vpop.permute.xlu0 %3397  ;;  %v2717_v26 = vpack.c.bf16 %v2715_v41, %v2713_v17  ;;  %v2718_v33 = vpack.c.bf16 %v2716_v27, %v2714_v3  ;;  %v8422_v47 = vpack.c.b16 %v3963_v56, %v3962_v9  ;;  %v6524_v17 = vld [vmem:[#allocation14 + $0x1d4] sm:$0xf0]  ;;  %v6487_v3 = vor.u32 %v7304_v37, %v6486_v8  ;;  %v7348_v41 = vld [vmem:[#allocation14 + $0x2ec] sm:$0xf]  ;;  %v7342_v9 = vld [vmem:[#allocation14 + $0x2bc] sm:$0xf] }
 0x25f   :  { %6482 = vmatmul.msk.bf16.vlgmr.msrb.gmra.mxu2 %vm3004_vm0, %v8410_v35  ;;  %6483 = vmatmul.msk.bf16.vlgmr.msra.gmra.mxu3 %vm3004_vm0, %v8410_v35  ;;  %v6677_v27 = vld [vmem:[#allocation14 + $0x2f4] sm:$0xf0]  ;;  %v6653_v56 = vld [vmem:[#allocation14 + $0x2c4] sm:$0xf0]  ;;  %v6539_v37 = vld [vmem:[#allocation14 + $0x1ec] sm:$0xf0] }
 0x260   :  { %2859 = vmatmul.bf16.vlgmr.msrb.gmra.mxu0 %v2717_v26  ;;  %2873 = vmatmul.bf16.vlgmr.msrb.gmra.mxu1 %v2718_v33  ;;  %v7350_v26 = vld [vmem:[#allocation14 + $0x2f8] sm:$0xf0]  ;;  %v6680_v50 = vor.u32 %v7348_v41, %v6677_v27  ;;  %v6734_v41 = vld [vmem:[#allocation14 + $0x350] sm:$0xf]  ;;  %v7359_v51 = vld [vmem:[#allocation14 + $0x340] sm:$0xf0] }
 0x261   :  { %3470 = vmatpush.bf16.msrb.mxu1 %v6472_v38  ;;  %3924 = vmatpush.bf16.msrb.mxu2 %v6625_v61  ;;  %v6593_v38 = vor.u32 %v7327_v53, %v6590_v55  ;;  %v6575_v61 = vld [vmem:[#allocation14 + $0x234] sm:$0xf0]  ;;  %v6647_v53 = vld [vmem:[#allocation14 + $0x2a8] sm:$0xf]  ;;  %v7341_v55 = vld [vmem:[#allocation14 + $0x2b0] sm:$0xf0]  ;;  %v6723_v13 = vor.u32 %v7359_v51, %v6722_v44 }
 0x262   :  { %3620 = vmatpush.bf16.msrb.mxu0 %v6523_v46  ;;  %3938 = vmatpush.bf16.msra.mxu3 %v6629_v42  ;;  %v6527_v46 = vor.u32 %v7312_v34, %v6524_v17  ;;  %v6578_v11 = vor.u32 %v7324_v59, %v6575_v61  ;;  %v6512_v42 = vld [vmem:[#allocation14 + $0x1bc] sm:$0xf0]  ;;  %v6581_v34 = vld [vmem:[#allocation14 + $0x230] sm:$0xf]  ;;  %v7326_v17 = vld [vmem:[#allocation14 + $0x238] sm:$0xf0] }
 0x263   :  { %3965 = vrot.lane.b32.xlu1 %v8422_v47, %s7761_s10  ;;  %v6515_v10 = vor.u32 %v7309_v21, %v6512_v42  ;;  %v7362_v27 = vld [vmem:[#allocation14 + $0x358] sm:$0xf0]  ;;  %v6632_v59 = vld [vmem:[#allocation14 + $0x290] sm:$0xf]  ;;  %v6569_v21 = vld [vmem:[#allocation14 + $0x218] sm:$0xf] }
 0x264   :  { %v7338_v61 = vld [vmem:[#allocation14 + $0x298] sm:$0xf0]  ;;  %v7323_v42 = vld [vmem:[#allocation14 + $0x220] sm:$0xf0]  ;;  %v6663_v44 = vld [vmem:[#allocation14 + $0x2d0] sm:$0xf] }
 0x265   :  { %3471 = vmatpush.bf16.msrb.mxu1 %v6460_v28  ;;  %3925 = vmatpush.bf16.msrb.mxu2 %v6613_v31  ;;  %v6684_v28 = vor.u32 %v7350_v26, %v6683_v19  ;;  %v7321_v31 = vld [vmem:[#allocation14 + $0x214] sm:$0xf]  ;;  %v6777_v19 = vld [vmem:[#allocation14 + $0x3a8] sm:$0xf]  ;;  %v6570_v4 = vor.u32 %v7323_v42, %v6569_v21 }
 0x266   :  { %3621 = vmatpush.bf16.msrb.mxu0 %v6511_v58  ;;  %3939 = vmatpush.bf16.msra.mxu3 %v6617_v15  ;;  %v7306_v58 = vld [vmem:[#allocation14 + $0x19c] sm:$0xf]  ;;  %v6566_v63 = vor.u32 %v7321_v31, %v6563_v48  ;;  %v6500_v15 = vld [vmem:[#allocation14 + $0x1a4] sm:$0xf0]  ;;  %v7373_v26 = vld [vmem:[#allocation14 + $0x3b0] sm:$0xf0] }
 0x267   :  { %v6620_v48 = vld [vmem:[#allocation14 + $0x278] sm:$0xf] }
 0x269   :  { %3472 = vmatpush.bf16.msrb.mxu1 %v6448_v25  ;;  %3926 = vmatpush.bf16.msrb.mxu2 %v6601_v45  ;;  %v6656_v25 = vor.u32 %v7342_v9, %v6653_v56  ;;  %v7303_v45 = vld [vmem:[#allocation14 + $0x184] sm:$0xf]  ;;  %v6765_v9 = vld [vmem:[#allocation14 + $0x390] sm:$0xf]  ;;  %v7370_v56 = vld [vmem:[#allocation14 + $0x398] sm:$0xf0] }
 0x26a   :  { %3622 = vmatpush.bf16.msrb.mxu0 %v6499_v16  ;;  %3940 = vmatpush.bf16.msra.mxu3 %v6605_v54  ;;  %v7339_v16 = vld [vmem:[#allocation14 + $0x2a4] sm:$0xf]  ;;  %v8436_v54 = vpop.f32.mrf.mxu2  ;;  %v6766_v18 = vor.u32 %v7370_v56, %v6765_v9 }
 0x26b   :  { %v8426_v33 = vpop.permute.xlu1 %3703 }
 0x26d   :  { %3473 = vmatpush.bf16.msrb.mxu1 %v6436_v1  ;;  %3927 = vmatpush.bf16.msrb.mxu2 %v6589_v57  ;;  %v6491_v1 = vor.u32 %v7303_v45, %v6488_v43  ;;  %v6644_v57 = vor.u32 %v7339_v16, %v6641_v12  ;;  %v6545_v43 = vld [vmem:[#allocation14 + $0x1e8] sm:$0xf] }
 0x26e   :  { %3623 = vmatpush.bf16.msrb.mxu0 %v6487_v3  ;;  %3941 = vmatpush.bf16.msra.mxu3 %v6593_v38  ;;  %v6542_v3 = vor.u32 %v7315_v24, %v6539_v37  ;;  %v6648_v38 = vor.u32 %v7341_v55, %v6647_v53  ;;  %v6698_v12 = vld [vmem:[#allocation14 + $0x308] sm:$0xf]  ;;  %v7353_v24 = vld [vmem:[#allocation14 + $0x310] sm:$0xf0]  ;;  %v6741_v53 = vld [vmem:[#allocation14 + $0x360] sm:$0xf] }
 0x26f   :  { %6534 = vmatmul.msk.bf16.vlgmr.msra.gmra.mxu2 %vm3004_vm0, %v8151_v30  ;;  %6583 = vmatmul.msk.bf16.vlgmr.msrb.gmra.mxu3 %vm3004_vm0, %v8426_v33 }
 0x270   :  { %6381 = vmatmul.msk.bf16.vlgmr.msra.gmra.mxu1 %vm3004_vm0, %v8238_v40  ;;  %6432 = vmatmul.msk.bf16.vlgmr.msra.gmra.mxu0 %vm3004_vm0, %v8148_v49  ;;  %v6659_v40 = vld [vmem:[#allocation14 + $0x2c0] sm:$0xf]  ;;  %v6503_v49 = vor.u32 %v7306_v58, %v6500_v15  ;;  %v3661_v58 = vunpack.c.l.b16 %v8418_v60  ;;  %v7356_v60 = vld [vmem:[#allocation14 + $0x328] sm:$0xf0] }
 0x271   :  { %3634 = vmatpush.bf16.msra.mxu1 %v6527_v46  ;;  %4092 = vmatpush.bf16.msra.mxu2 %v6680_v50  ;;  %v6660_v8 = vor.u32 %v7344_v23, %v6659_v40  ;;  %v6582_v46 = vor.u32 %v7326_v17, %v6581_v34  ;;  %v6735_v50 = vor.u32 %v7362_v27, %v6734_v41  ;;  %v7332_v40 = vld [vmem:[#allocation14 + $0x268] sm:$0xf0]  ;;  %v6753_v23 = vld [vmem:[#allocation14 + $0x378] sm:$0xf]  ;;  %v6675_v34 = vld [vmem:[#allocation14 + $0x2e8] sm:$0xf]  ;;  %v7483_v17 = vpop.eup %7482 }
 0x272   :  { %3790 = vmatpush.bf16.msra.mxu0 %v6578_v11  ;;  %4106 = vmatpush.bf16.msrb.mxu3 %v6684_v28  ;;  %v6633_v11 = vor.u32 %v7338_v61, %v6632_v59  ;;  %v6778_v28 = vor.u32 %v7373_v26, %v6777_v19  ;;  %v8438_v31 = vpop.f32.mrf.mxu2  ;;  %v6711_v45 = vor.u32 %v7356_v60, %v6710_v22  ;;  %v6828_v41 = vld [vmem:[#allocation14 + $0x408] sm:$0xf]  ;;  %v7385_v27 = vld [vmem:[#allocation14 + $0x410] sm:$0xf0]  ;;  %v7485_v62 = vpop.eup %7484  ;;  %v7384_v19 = vld [vmem:[#allocation14 + $0x40c] sm:$0xf] }
 0x273   :  { %v6726_v59 = vld [vmem:[#allocation14 + $0x348] sm:$0xf]  ;;  %v7361_v61 = vld [vmem:[#allocation14 + $0x350] sm:$0xf0]  ;;  %v6830_v26 = vld [vmem:[#allocation14 + $0x414] sm:$0xf0]  ;;  %v6829_v42 = vor.u32 %v7385_v27, %v6828_v41 }
 0x274   :  { %v6727_v51 = vor.u32 %v7361_v61, %v6726_v59  ;;  %v7381_v22 = vld [vmem:[#allocation14 + $0x3f4] sm:$0xf]  ;;  %v6818_v60 = vld [vmem:[#allocation14 + $0x3fc] sm:$0xf0]  ;;  %v6794_v41 = vld [vmem:[#allocation14 + $0x3cc] sm:$0xf0] }
 0x275   :  { %3635 = vmatpush.bf16.msra.mxu1 %v6515_v10  ;;  %4093 = vmatpush.bf16.msra.mxu2 %v6668_v20  ;;  %v7335_v10 = vld [vmem:[#allocation14 + $0x280] sm:$0xf0]  ;;  %v3660_v20 = vunpack.c.l.b16 %v8416_v5  ;;  %v7320_v5 = vld [vmem:[#allocation14 + $0x208] sm:$0xf0] }
 0x276   :  { %3791 = vmatpush.bf16.msra.mxu0 %v6566_v63  ;;  %4107 = vmatpush.bf16.msrb.mxu3 %v6672_v32  ;;  %v6557_v63 = vld [vmem:[#allocation14 + $0x200] sm:$0xf]  ;;  %v6621_v32 = vor.u32 %v7335_v10, %v6620_v48  ;;  %v6816_v48 = vld [vmem:[#allocation14 + $0x3f0] sm:$0xf]  ;;  %v7382_v10 = vld [vmem:[#allocation14 + $0x3f8] sm:$0xf0] }
 0x277   :  { %v8450_v15 = vpack.c.b16 %v3661_v58, %v3660_v20  ;;  %v6833_v20 = vor.u32 %v7384_v19, %v6830_v26  ;;  %v6714_v58 = vld [vmem:[#allocation14 + $0x330] sm:$0xf]  ;;  %v7396_v19 = vld [vmem:[#allocation14 + $0x46c] sm:$0xf]  ;;  %v6881_v26 = vld [vmem:[#allocation14 + $0x474] sm:$0xf0] }
 0x279   :  { %3636 = vmatpush.bf16.msra.mxu1 %v6503_v49  ;;  %4094 = vmatpush.bf16.msra.mxu2 %v6656_v25  ;;  %v7367_v49 = vld [vmem:[#allocation14 + $0x380] sm:$0xf0]  ;;  %v6558_v25 = vor.u32 %v7320_v5, %v6557_v63  ;;  %v8472_v63 = vpack.c.bf16 %v7485_v62, %v7483_v17  ;;  %v6651_v5 = vld [vmem:[#allocation14 + $0x2b8] sm:$0xf]  ;;  %v7352_v17 = vld [vmem:[#allocation14 + $0x308] sm:$0xf0] }
 0x27a   :  { %3792 = vmatpush.bf16.msra.mxu0 %v6554_v2  ;;  %4108 = vmatpush.bf16.msrb.mxu3 %v6660_v8  ;;  %v7317_v2 = vld [vmem:[#allocation14 + $0x1f0] sm:$0xf0]  ;;  %v6596_v8 = vld [vmem:[#allocation14 + $0x248] sm:$0xf]  ;;  %v6754_v37 = vor.u32 %v7367_v49, %v6753_v23  ;;  %v8458_v55 = vpop.f32.mrf.mxu2  ;;  %v6821_v49 = vor.u32 %v7381_v22, %v6818_v60  ;;  %v6728_v62 = vld [vmem:[#allocation14 + $0x354] sm:$0xf0] }
 0x27b   :  { %3663 = vrot.lane.b32.xlu2 %v8450_v15, %s7761_s10  ;;  %v7369_v60 = vld [vmem:[#allocation14 + $0x394] sm:$0xf] }
 0x27d   :  { %3637 = vmatpush.bf16.msra.mxu1 %v6491_v1  ;;  %4095 = vmatpush.bf16.msra.mxu2 %v6644_v57  ;;  %v6546_v1 = vor.u32 %v7317_v2, %v6545_v43  ;;  %v6699_v57 = vor.u32 %v7353_v24, %v6698_v12  ;;  %v6702_v43 = vld [vmem:[#allocation14 + $0x318] sm:$0xf]  ;;  %v7355_v2 = vld [vmem:[#allocation14 + $0x320] sm:$0xf0]  ;;  %v6806_v12 = vld [vmem:[#allocation14 + $0x3e4] sm:$0xf0] }
 0x27e   :  { %3793 = vmatpush.bf16.msra.mxu0 %v6542_v3  ;;  %4109 = vmatpush.bf16.msrb.mxu3 %v6648_v38  ;;  %v6597_v3 = vor.u32 %v7329_v6, %v6596_v8  ;;  %v6742_v38 = vor.u32 %v7364_v7, %v6741_v53  ;;  %v6639_v6 = vld [vmem:[#allocation14 + $0x2a0] sm:$0xf]  ;;  %v7340_v53 = vld [vmem:[#allocation14 + $0x2a8] sm:$0xf0]  ;;  %v6703_v7 = vor.u32 %v7355_v2, %v6702_v43  ;;  %v7390_v2 = vld [vmem:[#allocation14 + $0x43c] sm:$0xf] }
 0x27f   :  { %6634 = vmatmul.msk.bf16.vlgmr.msrb.gmra.mxu2 %vm3004_vm0, %v8194_v39  ;;  %6635 = vmatmul.msk.bf16.vlgmr.msra.gmra.mxu3 %vm3004_vm0, %v8194_v39  ;;  %v6640_v27 = vor.u32 %v7340_v53, %v6639_v6  ;;  %v7392_v6 = vld [vmem:[#allocation14 + $0x448] sm:$0xf0] }
 0x280   :  { %6481 = vmatmul.msk.bf16.vlgmr.msrb.gmra.mxu1 %vm3004_vm0, %v8410_v35  ;;  %6532 = vmatmul.msk.bf16.vlgmr.msrb.gmra.mxu0 %vm3004_vm0, %v8151_v30  ;;  %v6608_v35 = vld [vmem:[#allocation14 + $0x260] sm:$0xf] }
 0x281   :  { %3804 = vmatpush.bf16.msrb.mxu1 %v6582_v46  ;;  %4256 = vmatpush.bf16.msrb.mxu2 %v6735_v50  ;;  %v6609_v16 = vor.u32 %v7332_v40, %v6608_v35  ;;  %v7487_v46 = vpop.eup %7486  ;;  %v8460_v50 = vpop.permute.xlu2 %4005  ;;  %v7343_v35 = vld [vmem:[#allocation14 + $0x2c0] sm:$0xf0] }
 0x282   :  { %3952 = vmatpush.bf16.msrb.mxu0 %v6633_v11  ;;  %4384 = vmatpush.bf16.msra.mxu3 %v6778_v28  ;;  %v7489_v21 = vpop.eup %7488  ;;  %v6676_v11 = vor.u32 %v7349_v52, %v6675_v34  ;;  %v7346_v28 = vld [vmem:[#allocation14 + $0x2d8] sm:$0xf0]  ;;  %v7379_v40 = vld [vmem:[#allocation14 + $0x3e0] sm:$0xf0]  ;;  %v8476_v23 = vpop.f32.mrf.mxu2  ;;  %v6652_v8 = vor.u32 %v7343_v35, %v6651_v5  ;;  %v6690_v34 = vld [vmem:[#allocation14 + $0x300] sm:$0xf] }
 0x283   :  { %v8474_v9 = vpack.c.bf16 %v7489_v21, %v7487_v46  ;;  %v6664_v56 = vor.u32 %v7346_v28, %v6663_v44  ;;  %v6691_v61 = vor.u32 %v7352_v17, %v6690_v34  ;;  %v7372_v46 = vld [vmem:[#allocation14 + $0x3ac] sm:$0xf]  ;;  %v6887_v44 = vld [vmem:[#allocation14 + $0x470] sm:$0xf]  ;;  %v8486_v28 = vpop.permute.xlu0 %4311  ;;  %v6869_v5 = vld [vmem:[#allocation14 + $0x45c] sm:$0xf0] }
 0x284   :  { %v6875_v35 = vld [vmem:[#allocation14 + $0x458] sm:$0xf]  ;;  %v6692_v34 = vld [vmem:[#allocation14 + $0x30c] sm:$0xf0]  ;;  %v7387_v17 = vld [vmem:[#allocation14 + $0x424] sm:$0xf] }
 0x285   :  { %3805 = vmatpush.bf16.msrb.mxu1 %v6570_v4  ;;  %4257 = vmatpush.bf16.msrb.mxu2 %v6723_v13  ;;  %v7358_v4 = vld [vmem:[#allocation14 + $0x338] sm:$0xf0]  ;;  %v8470_v13 = vpop.f32.mrf.mxu3 }
 0x286   :  { %3953 = vmatpush.bf16.msrb.mxu0 %v6621_v32  ;;  %4385 = vmatpush.bf16.msra.mxu3 %v6766_v18  ;;  %v6817_v32 = vor.u32 %v7382_v10, %v6816_v48  ;;  %v6715_v18 = vor.u32 %v7358_v4, %v6714_v58  ;;  %v7357_v58 = vld [vmem:[#allocation14 + $0x334] sm:$0xf] }
 0x289   :  { %3806 = vmatpush.bf16.msrb.mxu1 %v6558_v25  ;;  %4258 = vmatpush.bf16.msrb.mxu2 %v6711_v45  ;;  %v4268_v25 = vunpack.c.l.b16 %v8472_v63  ;;  %v4269_v45 = vunpack.c.l.b16 %v8474_v9 }
 0x28a   :  { %3954 = vmatpush.bf16.msrb.mxu0 %v6609_v16  ;;  %4386 = vmatpush.bf16.msra.mxu3 %v6754_v37  ;;  %v7378_v16 = vld [vmem:[#allocation14 + $0x3dc] sm:$0xf]  ;;  %v8488_v48 = vpop.f32.mrf.mxu2 }
 0x28b   :  { %v8480_v24 = vpack.c.b16 %v4269_v45, %v4268_v25  ;;  %v6809_v52 = vor.u32 %v7378_v16, %v6806_v12  ;;  %v6704_v25 = vld [vmem:[#allocation14 + $0x324] sm:$0xf0]  ;;  %v7395_v45 = vld [vmem:[#allocation14 + $0x460] sm:$0xf0]  ;;  %v7366_v12 = vld [vmem:[#allocation14 + $0x37c] sm:$0xf] }
 0x28c   :  { %v6857_v16 = vld [vmem:[#allocation14 + $0x444] sm:$0xf0] }
 0x28d   :  { %3807 = vmatpush.bf16.msrb.mxu1 %v6546_v1  ;;  %4259 = vmatpush.bf16.msrb.mxu2 %v6699_v57  ;;  %v6792_v1 = vld [vmem:[#allocation14 + $0x3c0] sm:$0xf]  ;;  %v7376_v57 = vld [vmem:[#allocation14 + $0x3c8] sm:$0xf0] }
 0x28e   :  { %3955 = vmatpush.bf16.msrb.mxu0 %v6597_v3  ;;  %4387 = vmatpush.bf16.msra.mxu3 %v6742_v38  ;;  %v7375_v3 = vld [vmem:[#allocation14 + $0x3c4] sm:$0xf]  ;;  %v6793_v59 = vor.u32 %v7376_v57, %v6792_v1  ;;  %v7360_v38 = vld [vmem:[#allocation14 + $0x34c] sm:$0xf]  ;;  %v6860_v1 = vor.u32 %v7390_v2, %v6857_v16  ;;  %v6761_v16 = vld [vmem:[#allocation14 + $0x380] sm:$0xf] }
 0x28f   :  { %6686 = vmatmul.msk.bf16.vlgmr.msra.gmra.mxu2 %vm3004_vm0, %v8460_v50  ;;  %6687 = vmatmul.msk.bf16.vlgmr.msrb.gmra.mxu3 %vm3004_vm0, %v8460_v50  ;;  %v6797_v21 = vor.u32 %v7375_v3, %v6794_v41  ;;  %v6731_v10 = vor.u32 %v7360_v38, %v6728_v62  ;;  %v7351_v57 = vld [vmem:[#allocation14 + $0x304] sm:$0xf]  ;;  %v6845_v3 = vld [vmem:[#allocation14 + $0x42c] sm:$0xf0]  ;;  %v6851_v38 = vld [vmem:[#allocation14 + $0x428] sm:$0xf] }
 0x290   :  { %6533 = vmatmul.msk.bf16.vlgmr.msra.gmra.mxu1 %vm3004_vm0, %v8151_v30  ;;  %6584 = vmatmul.msk.bf16.vlgmr.msra.gmra.mxu0 %vm3004_vm0, %v8426_v33  ;;  %v6804_v30 = vld [vmem:[#allocation14 + $0x3d8] sm:$0xf]  ;;  %v7363_v41 = vld [vmem:[#allocation14 + $0x364] sm:$0xf]  ;;  %v7389_v62 = vld [vmem:[#allocation14 + $0x430] sm:$0xf0] }
 0x291   :  { %4078 = vmatpush.bf16.msra.mxu1 %v6676_v11  ;;  %4532 = vmatpush.bf16.msra.mxu2 %v6829_v42  ;;  %v6805_v37 = vor.u32 %v7379_v40, %v6804_v30  ;;  %v8484_v11 = vpop.f32.mrf.mxu3  ;;  %v6779_v42 = vld [vmem:[#allocation14 + $0x3b4] sm:$0xf0] }
 0x292   :  { %4228 = vmatpush.bf16.msra.mxu0 %v6727_v51  ;;  %4546 = vmatpush.bf16.msrb.mxu3 %v6833_v20  ;;  %v7398_v51 = vld [vmem:[#allocation14 + $0x478] sm:$0xf0]  ;;  %v6884_v20 = vor.u32 %v7396_v19, %v6881_v26  ;;  %v6782_v4 = vor.u32 %v7372_v46, %v6779_v42  ;;  %v8498_v53 = vpop.f32.mrf.mxu2  ;;  %v6848_v19 = vor.u32 %v7387_v17, %v6845_v3  ;;  %v6785_v26 = vld [vmem:[#allocation14 + $0x3b0] sm:$0xf] }
 0x293   :  { %4271 = vrot.lane.b32.xlu0 %v8480_v24, %s7761_s10  ;;  %v6888_v22 = vor.u32 %v7398_v51, %v6887_v44  ;;  %v6836_v42 = vld [vmem:[#allocation14 + $0x410] sm:$0xf]  ;;  %v7386_v44 = vld [vmem:[#allocation14 + $0x418] sm:$0xf0]  ;;  %v6852_v51 = vor.u32 %v7389_v62, %v6851_v38  ;;  %v7365_v62 = vld [vmem:[#allocation14 + $0x370] sm:$0xf0] }
 0x295   :  { %4079 = vmatpush.bf16.msra.mxu1 %v6664_v56  ;;  %4533 = vmatpush.bf16.msra.mxu2 %v6817_v32  ;;  %v6716_v56 = vld [vmem:[#allocation14 + $0x33c] sm:$0xf0]  ;;  %v7393_v32 = vld [vmem:[#allocation14 + $0x454] sm:$0xf] }
 0x296   :  { %4229 = vmatpush.bf16.msra.mxu0 %v6715_v18  ;;  %4547 = vmatpush.bf16.msrb.mxu3 %v6821_v49  ;;  %v6767_v18 = vld [vmem:[#allocation14 + $0x39c] sm:$0xf0]  ;;  %v6719_v30 = vor.u32 %v7357_v58, %v6716_v56  ;;  %v6872_v40 = vor.u32 %v7393_v32, %v6869_v5  ;;  %v7354_v49 = vld [vmem:[#allocation14 + $0x31c] sm:$0xf]  ;;  %v6837_v56 = vor.u32 %v7386_v44, %v6836_v42  ;;  %v6824_v32 = vld [vmem:[#allocation14 + $0x3f8] sm:$0xf] }
 0x297   :  { %v6770_v43 = vor.u32 %v7369_v60, %v6767_v18  ;;  %v7383_v5 = vld [vmem:[#allocation14 + $0x400] sm:$0xf0]  ;;  %v6879_v42 = vld [vmem:[#allocation14 + $0x468] sm:$0xf]  ;;  %v7397_v44 = vld [vmem:[#allocation14 + $0x470] sm:$0xf0] }
 0x298   :  { %v6825_v2 = vor.u32 %v7383_v5, %v6824_v32  ;;  %v7391_v32 = vld [vmem:[#allocation14 + $0x440] sm:$0xf0] }
 0x299   :  { %4080 = vmatpush.bf16.msra.mxu1 %v6652_v8  ;;  %4534 = vmatpush.bf16.msra.mxu2 %v6805_v37  ;;  %v6876_v8 = vor.u32 %v7395_v45, %v6875_v35  ;;  %v6755_v37 = vld [vmem:[#allocation14 + $0x384] sm:$0xf0]  ;;  %v8509_v35 = vpop.permute.xlu0 %3357 }
 0x29a   :  { %4230 = vmatpush.bf16.msra.mxu0 %v6703_v7  ;;  %4548 = vmatpush.bf16.msrb.mxu3 %v6809_v52  ;;  %v6707_v7 = vor.u32 %v7354_v49, %v6704_v25  ;;  %v6758_v52 = vor.u32 %v7366_v12, %v6755_v37  ;;  %v3321_v58 = vpop.f32.mrf.mxu2  ;;  %v8531_v12 = vsel %vm3004_vm0, %v8317_v0, %v8509_v35  ;;  %v4571_v37 = vunpack.c.h.b16 %v8474_v9 }
 0x29d   :  { %4081 = vmatpush.bf16.msra.mxu1 %v6640_v27  ;;  %4535 = vmatpush.bf16.msra.mxu2 %v6793_v59  ;;  %v6743_v59 = vld [vmem:[#allocation14 + $0x36c] sm:$0xf0] }
 0x29e   :  { %4231 = vmatpush.bf16.msra.mxu0 %v6691_v61  ;;  %4549 = vmatpush.bf16.msrb.mxu3 %v6797_v21  ;;  %v6695_v61 = vor.u32 %v7351_v57, %v6692_v34  ;;  %v6746_v46 = vor.u32 %v7363_v41, %v6743_v59  ;;  %v7374_v21 = vld [vmem:[#allocation14 + $0x3b8] sm:$0xf0] }
 0x29f   :  { %6738 = vmatmul.msk.bf16.vlgmr.msrb.gmra.mxu2 %vm3004_vm0, %v8212_v36  ;;  %6787 = vmatmul.msk.bf16.vlgmr.msra.gmra.mxu3 %vm3004_vm0, %v8486_v28 }
 0x2a0   :  { %6585 = vmatmul.msk.bf16.vlgmr.msrb.gmra.mxu1 %vm3004_vm0, %v8426_v33  ;;  %6636 = vmatmul.msk.bf16.vlgmr.msrb.gmra.mxu0 %vm3004_vm0, %v8194_v39  ;;  %v6863_v33 = vld [vmem:[#allocation14 + $0x440] sm:$0xf]  ;;  %v8500_v39 = vpop.f32.mrf.mxu3 }
 0x2a1   :  { %4242 = vmatpush.bf16.msrb.mxu1 %v6731_v10  ;;  %4700 = vmatpush.bf16.msrb.mxu2 %v6884_v20  ;;  %v6864_v27 = vor.u32 %v7392_v6, %v6863_v33  ;;  %v6773_v10 = vld [vmem:[#allocation14 + $0x398] sm:$0xf]  ;;  %v7371_v20 = vld [vmem:[#allocation14 + $0x3a0] sm:$0xf0]  ;;  %v7368_v33 = vld [vmem:[#allocation14 + $0x388] sm:$0xf0] }
 0x2a2   :  { %4398 = vmatpush.bf16.msrb.mxu0 %v6782_v4  ;;  %4714 = vmatpush.bf16.msra.mxu3 %v6888_v22  ;;  %v6786_v4 = vor.u32 %v7374_v21, %v6785_v26  ;;  %v8502_v22 = vpop.permute.xlu1 %3055  ;;  %v6774_v60 = vor.u32 %v7371_v20, %v6773_v10  ;;  %v6812_v6 = vld [vmem:[#allocation14 + $0x3e0] sm:$0xf]  ;;  %v6762_v3 = vor.u32 %v7368_v33, %v6761_v16  ;;  %v3323_v41 = vpop.f32.mrf.mxu2  ;;  %v6867_v20 = vld [vmem:[#allocation14 + $0x450] sm:$0xf]  ;;  %v6930_v16 = vld [vmem:[#allocation14 + $0x4c8] sm:$0xf] }
 0x2a3   :  { %v8507_v18 = vsel %vm3004_vm0, %v8310_v14, %v8502_v22  ;;  %v6880_v10 = vor.u32 %v7397_v44, %v6879_v42  ;;  %v6938_v33 = vld [vmem:[#allocation14 + $0x4d0] sm:$0xf] }
 0x2a4   :  { %v3062_v49 = vunpack.c.l.bf16 %v8507_v18  ;;  %v3064_v25 = vunpack.c.h.bf16 %v8507_v18 }
 0x2a5   :  { %4243 = vmatpush.bf16.msrb.mxu1 %v6719_v30  ;;  %4701 = vmatpush.bf16.msrb.mxu2 %v6872_v40  ;;  %v8514_v40 = vsel %vm3004_vm0, %v8502_v22, %v8310_v14 }
 0x2a6   :  { %4399 = vmatpush.bf16.msrb.mxu0 %v6770_v43  ;;  %4715 = vmatpush.bf16.msra.mxu3 %v6876_v8  ;;  %v3209_v45 = vunpack.c.l.bf16 %v8514_v40  ;;  %v3211_v43 = vunpack.c.h.bf16 %v8514_v40  ;;  %v4570_v8 = vunpack.c.h.b16 %v8472_v63  ;;  %v3366_v63 = vunpack.c.h.bf16 %v8531_v12  ;;  %v6914_v40 = vld [vmem:[#allocation14 + $0x4a0] sm:$0xf] }
 0x2a7   :  { %v3066_v17 = vmul.f32 %v3062_v49, %v8436_v54 }
 0x2a8   :  { %v3175_v30 = vpop.f32.mrf.mxu3  ;;  %v8544_v34 = vpack.c.b16 %v4571_v37, %v4570_v8  ;;  %v7409_v8 = vld [vmem:[#allocation14 + $0x4d0] sm:$0xf0] }
 0x2a9   :  { %4244 = vmatpush.bf16.msrb.mxu1 %v6707_v7  ;;  %4702 = vmatpush.bf16.msrb.mxu2 %v6860_v1  ;;  %v7380_v7 = vld [vmem:[#allocation14 + $0x3e8] sm:$0xf0]  ;;  %v3213_v1 = vmul.f32 %v3209_v45, %v8500_v39  ;;  %v3216_v57 = vmul.f32 %v3211_v43, %v3175_v30  ;;  %v6749_v39 = vld [vmem:[#allocation14 + $0x368] sm:$0xf]  ;;  %v6931_v37 = vor.u32 %v7409_v8, %v6930_v16 }
 0x2aa   :  { %4400 = vmatpush.bf16.msrb.mxu0 %v6758_v52  ;;  %4716 = vmatpush.bf16.msra.mxu3 %v6864_v27  ;;  %v3364_v52 = vunpack.c.l.bf16 %v8531_v12  ;;  %v3371_v27 = vmul.f32 %v3366_v63, %v3323_v41  ;;  %v6926_v41 = vld [vmem:[#allocation14 + $0x4b8] sm:$0xf]  ;;  %v6896_v12 = vld [vmem:[#allocation14 + $0x48c] sm:$0xf0] }
 0x2ab   :  { %4573 = vrot.lane.b32.xlu2 %v8544_v34, %s7761_s10  ;;  %v3219_v38 = vadd.f32 %v3213_v1, %v3066_v17  ;;  %v6932_v1 = vld [vmem:[#allocation14 + $0x4d4] sm:$0xf0]  ;;  %v3067_v17 = vmul.f32 %v3062_v49, %v8470_v13  ;;  %v3070_v13 = vmul.f32 %v3064_v25, %v8484_v11  ;;  %v6920_v49 = vld [vmem:[#allocation14 + $0x4bc] sm:$0xf0] }
 0x2ac   :  { %v3368_v59 = vmul.f32 %v3364_v52, %v3321_v58  ;;  %v7394_v58 = vld [vmem:[#allocation14 + $0x458] sm:$0xf0] }
 0x2ad   :  { %4245 = vmatpush.bf16.msrb.mxu1 %v6695_v61  ;;  %4703 = vmatpush.bf16.msrb.mxu2 %v6848_v19  ;;  %v6800_v61 = vld [vmem:[#allocation14 + $0x3c8] sm:$0xf]  ;;  %v7377_v19 = vld [vmem:[#allocation14 + $0x3d0] sm:$0xf0] }
 0x2ae   :  { %4401 = vmatpush.bf16.msrb.mxu0 %v6746_v46  ;;  %4717 = vmatpush.bf16.msra.mxu3 %v6852_v51  ;;  %v8556_v54 = vadd.f32 %v3368_v59, %v3219_v38  ;;  %v6750_v46 = vor.u32 %v7365_v62, %v6749_v39  ;;  %v6801_v21 = vor.u32 %v7377_v19, %v6800_v61  ;;  %v8558_v51 = vpop.permute.xlu2 %4613  ;;  %v7407_v39 = vld [vmem:[#allocation14 + $0x4c0] sm:$0xf0]  ;;  %v7405_v19 = vld [vmem:[#allocation14 + $0x4b4] sm:$0xf] }
 0x2af   :  { %6838 = vmatmul.msk.bf16.vlgmr.msra.gmra.mxu2 %vm3004_vm0, %v8369_v29  ;;  %6839 = vmatmul.msk.bf16.vlgmr.msrb.gmra.mxu3 %vm3004_vm0, %v8369_v29  ;;  %v6927_v38 = vor.u32 %v7407_v39, %v6926_v41  ;;  %v6923_v18 = vor.u32 %v7405_v19, %v6920_v49  ;;  %v3365_v41 = vunpack.c.l.bf16 %v8317_v0 }
 0x2b0   :  { %6685 = vmatmul.msk.bf16.vlgmr.msra.gmra.mxu1 %vm3004_vm0, %v8460_v50  ;;  %6736 = vmatmul.msk.bf16.vlgmr.msra.gmra.mxu0 %vm3004_vm0, %v8212_v36  ;;  %v3069_v50 = vmul.f32 %v3064_v25, %v8438_v31  ;;  %v6813_v31 = vor.u32 %v7380_v7, %v6812_v6  ;;  %v3335_v30 = vpop.f32.mrf.mxu3  ;;  %v7410_v6 = vld [vmem:[#allocation14 + $0x4d8] sm:$0xf0] }
 0x2b1   :  { %4412 = vmatpush.bf16.msra.mxu1 %v6786_v4  ;;  %v6868_v4 = vor.u32 %v7394_v58, %v6867_v20  ;;  %v6939_v7 = vor.u32 %v7410_v6, %v6938_v33  ;;  %v7402_v25 = vld [vmem:[#allocation14 + $0x49c] sm:$0xf]  ;;  %v6894_v20 = vld [vmem:[#allocation14 + $0x480] sm:$0xf]  ;;  %v7400_v58 = vld [vmem:[#allocation14 + $0x488] sm:$0xf0] }
 0x2b2   :  { %4560 = vmatpush.bf16.msra.mxu0 %v6837_v56  ;;  %v3222_v9 = vadd.f32 %v3216_v57, %v3069_v50  ;;  %v6855_v56 = vld [vmem:[#allocation14 + $0x438] sm:$0xf]  ;;  %v7408_v50 = vld [vmem:[#allocation14 + $0x4cc] sm:$0xf]  ;;  %v6918_v57 = vld [vmem:[#allocation14 + $0x4b0] sm:$0xf] }
 0x2b3   :  { %v6856_v5 = vor.u32 %v7391_v32, %v6855_v56  ;;  %4864 = vmatpush.bf16.msra.mxu2 %v6939_v7  ;;  %v6935_v61 = vor.u32 %v7408_v50, %v6932_v1  ;;  %v6902_v56 = vld [vmem:[#allocation14 + $0x488] sm:$0xf] }
 0x2b4   :  { %v8554_v26 = vadd.f32 %v3371_v27, %v3222_v9  ;;  %v7406_v9 = vld [vmem:[#allocation14 + $0x4b8] sm:$0xf0]  ;;  %v3217_v27 = vmul.f32 %v3211_v43, %v8498_v53  ;;  %v7404_v53 = vld [vmem:[#allocation14 + $0x4a8] sm:$0xf0] }
 0x2b5   :  { %4413 = vmatpush.bf16.msra.mxu1 %v6774_v60  ;;  %v6843_v60 = vld [vmem:[#allocation14 + $0x420] sm:$0xf]  ;;  %v6919_v59 = vor.u32 %v7406_v9, %v6918_v57  ;;  %v6915_v42 = vor.u32 %v7404_v53, %v6914_v40 }
 0x2b6   :  { %4561 = vmatpush.bf16.msra.mxu0 %v6825_v2  ;;  %v7388_v2 = vld [vmem:[#allocation14 + $0x428] sm:$0xf0]  ;;  %v3223_v43 = vadd.f32 %v3217_v27, %v3070_v13 }
 0x2b7   :  { %4865 = vmatpush.bf16.msra.mxu2 %v6927_v38  ;;  %v3512_v38 = vunpack.c.l.bf16 %v8509_v35 }
 0x2b9   :  { %4414 = vmatpush.bf16.msra.mxu1 %v6762_v3  ;;  %v3214_v3 = vmul.f32 %v3209_v45, %v8488_v48  ;;  %v6906_v48 = vld [vmem:[#allocation14 + $0x498] sm:$0xf]  ;;  %v7403_v45 = vld [vmem:[#allocation14 + $0x4a0] sm:$0xf0] }
 0x2ba   :  { %4562 = vmatpush.bf16.msra.mxu0 %v6813_v31  ;;  %v3369_v31 = vmul.f32 %v3364_v52, %v3335_v30  ;;  %v8589_v30 = vsel %vm3004_vm0, %v8509_v35, %v8317_v0 }
 0x2bb   :  { %v3220_v62 = vadd.f32 %v3214_v3, %v3067_v17  ;;  %4866 = vmatpush.bf16.msra.mxu2 %v6915_v42  ;;  %v3513_v9 = vunpack.c.h.bf16 %v8589_v30  ;;  %v3063_v3 = vunpack.c.l.bf16 %v8310_v14  ;;  %v3367_v42 = vunpack.c.h.bf16 %v8317_v0 }
 0x2bc   :  { %v3673_v0 = vunpack.c.h.bf16 %v8450_v15 }
 0x2bd   :  { %4415 = vmatpush.bf16.msra.mxu1 %v6750_v46  ;;  %v3375_v52 = vadd.f32 %v3369_v31, %v3220_v62  ;;  %v3337_v46 = vpop.f32.mrf.mxu3  ;;  %v3068_v13 = vmul.f32 %v3063_v3, %v8458_v55 }
 0x2be   :  { %4563 = vmatpush.bf16.msra.mxu0 %v6801_v21  ;;  %v6907_v21 = vor.u32 %v7403_v45, %v6906_v48  ;;  %v3372_v11 = vmul.f32 %v3366_v63, %v3337_v46 }
 0x2bf   :  { %6890 = vmatmul.msk.bf16.vlgmr.msrb.gmra.mxu2 %vm3004_vm0, %v8558_v51  ;;  %6891 = vmatmul.msk.bf16.vlgmr.msra.gmra.mxu3 %vm3004_vm0, %v8558_v51 }
 0x2c0   :  { %6737 = vmatmul.msk.bf16.vlgmr.msrb.gmra.mxu1 %vm3004_vm0, %v8212_v36  ;;  %6788 = vmatmul.msk.bf16.vlgmr.msrb.gmra.mxu0 %vm3004_vm0, %v8486_v28  ;;  %v6844_v36 = vor.u32 %v7388_v2, %v6843_v60  ;;  %v3378_v44 = vadd.f32 %v3372_v11, %v3223_v43  ;;  %v7428_v60 = vld [vmem:[#allocation12] ss:$0 sm:$0xff]  ;;  %v3065_v43 = vunpack.c.h.bf16 %v8310_v14 }
 0x2c1   :  { %4686 = vmatpush.bf16.msrb.mxu1 %v6880_v10  ;;  %v6908_v10 = vld [vmem:[#allocation14 + $0x4a4] sm:$0xf0] }
 0x2c2   :  { %4836 = vmatpush.bf16.msrb.mxu0 %v6931_v37  ;;  %v3511_v37 = vunpack.c.l.bf16 %v8589_v30  ;;  %v3071_v14 = vmul.f32 %v3065_v43, %v8476_v23 }
 0x2c5   :  { %4687 = vmatpush.bf16.msrb.mxu1 %v6868_v4  ;;  %v6895_v4 = vor.u32 %v7400_v58, %v6894_v20 }
 0x2c6   :  { %4837 = vmatpush.bf16.msrb.mxu0 %v6919_v59 }
 0x2c9   :  { %4688 = vmatpush.bf16.msrb.mxu1 %v6856_v5  ;;  %v7399_v5 = vld [vmem:[#allocation14 + $0x484] sm:$0xf] }
 0x2ca   :  { %4838 = vmatpush.bf16.msrb.mxu0 %v6907_v21  ;;  %v6899_v63 = vor.u32 %v7399_v5, %v6896_v12 }
 0x2cd   :  { %4689 = vmatpush.bf16.msrb.mxu1 %v6844_v36 }
 0x2ce   :  { %4839 = vmatpush.bf16.msrb.mxu0 %v6895_v4  ;;  %v3514_v4 = vunpack.c.h.bf16 %v8509_v35 }
 0x2d0   :  { %6789 = vmatmul.msk.bf16.vlgmr.msra.gmra.mxu1 %vm3004_vm0, %v8486_v28  ;;  %6840 = vmatmul.msk.bf16.vlgmr.msra.gmra.mxu0 %vm3004_vm0, %v8369_v29  ;;  %v7401_v28 = vld [vmem:[#allocation14 + $0x490] sm:$0xf0]  ;;  %v6911_v29 = vor.u32 %v7402_v25, %v6908_v10  ;;  %v3212_v25 = vunpack.c.h.bf16 %v8502_v22 }
 0x2d1   :  { %4850 = vmatpush.bf16.msra.mxu1 %v6935_v61  ;;  %v6903_v32 = vor.u32 %v7401_v28, %v6902_v56 }
 0x2d3   :  { %4867 = vmatpush.bf16.msra.mxu2 %v6903_v32 }
 0x2d5   :  { %4851 = vmatpush.bf16.msra.mxu1 %v6923_v18  ;;  %v8613_v56 = vpop.permute.xlu2 %3663 }
 0x2d6   :  { %v3668_v35 = vsel %vm3004_vm0, %v8450_v15, %v8613_v56 }
 0x2d9   :  { %4852 = vmatpush.bf16.msra.mxu1 %v6911_v29 }
 0x2dd   :  { %v2860_v2 = vpop.f32.mrf.mxu0  ;;  %v2874_v16 = vpop.f32.mrf.mxu1  ;;  %4853 = vmatpush.bf16.msra.mxu1 %v6899_v63 }
 0x2de   :  { %v2861_v8 = vadd.f32 %v7428_v60, %v2860_v2 }
 0x2e0   :  { %6889 = vmatmul.msk.bf16.vlgmr.msrb.gmra.mxu1 %vm3004_vm0, %v8558_v51  ;;  %v2875_v33 = vadd.f32 %v2874_v16, %v2861_v8  ;;  %v3210_v51 = vunpack.c.l.bf16 %v8502_v22  ;;  %v3670_v16 = vunpack.c.l.bf16 %v3668_v35 }
 0x2e2   :  { %v3489_v6 = vpop.f32.mrf.mxu2  ;;  %7490 = vtanh.f32 %v2875_v33  ;;  %v3503_v39 = vpop.f32.mrf.mxu3 }
 0x2e3   :  { %v3516_v7 = vmul.f32 %v3511_v37, %v3489_v6  ;;  %v3517_v40 = vmul.f32 %v3512_v38, %v3503_v39  ;;  %v8641_v38 = vsel %vm3004_vm0, %v8613_v56, %v8450_v15 }
 0x2e5   :  { %v8596_v36 = vadd.f32 %v3516_v7, %v3375_v52  ;;  %v2862_v50 = vpop.f32.mrf.mxu0  ;;  %v2876_v1 = vpop.f32.mrf.mxu1  ;;  %v3671_v52 = vunpack.c.l.bf16 %v8450_v15 }
 0x2e6   :  { %v2863_v57 = vadd.f32 %v7428_v60, %v2862_v50 }
 0x2e8   :  { %v2877_v17 = vadd.f32 %v2876_v1, %v2863_v57  ;;  %v7491_v59 = vpop.eup %7490 }
 0x2e9   :  { %v2881_v45 = vpack.c.bf16 %v7491_v59, %v7491_v59 }
 0x2ea   :  { %7492 = vtanh.f32 %v2877_v17  ;;  %v3491_v31 = vpop.f32.mrf.mxu2  ;;  %v3505_v58 = vpop.f32.mrf.mxu3 }
 0x2eb   :  { %v3519_v27 = vmul.f32 %v3513_v9, %v3491_v31  ;;  %v3520_v23 = vmul.f32 %v3514_v4, %v3505_v58  ;;  %v3672_v31 = vunpack.c.h.bf16 %v3668_v35  ;;  %v4927_v35 = vld [vmem:[#allocation17 + $0xf8] sm:$0xff] }
 0x2ec   :  { %4969 = vmatpush.msra.mxu0 %v4927_v35  ;;  %v4914_v35 = vld [vmem:[#allocation17 + $0x90] sm:$0xff] }
 0x2ed   :  { %v8605_v62 = vadd.f32 %v3519_v27, %v3378_v44  ;;  %v3201_v61 = vpop.f32.mrf.mxu1  ;;  %v3349_v19 = vpop.f32.mrf.mxu0  ;;  %v4762_v44 = vunpack.c.l.b16 %v2881_v45 }
 0x2ee   :  { %v3215_v49 = vmul.f32 %v3210_v51, %v3201_v61  ;;  %v3370_v48 = vmul.f32 %v3365_v41, %v3349_v19 }
 0x2f0   :  { %v7493_v46 = vpop.eup %7492  ;;  %v3221_v21 = vadd.f32 %v3215_v49, %v3068_v13 }
 0x2f1   :  { %v2882_v53 = vpack.c.bf16 %v7493_v46, %v7493_v46 }
 0x2f2   :  { %v3376_v11 = vadd.f32 %v3370_v48, %v3221_v21  ;;  %v3653_v18 = vpop.f32.mrf.mxu2  ;;  %v8646_v13 = vpop.f32.mrf.mxu3  ;;  %v3819_v48 = vunpack.c.h.bf16 %v8641_v38 }
 0x2f3   :  { %v4763_v10 = vunpack.c.l.b16 %v2882_v53  ;;  %v3676_v55 = vmul.f32 %v3671_v52, %v3653_v18 }
 0x2f4   :  { %v3523_v20 = vadd.f32 %v3517_v40, %v3376_v11 }
 0x2f5   :  { %v8615_v28 = vpack.c.b16 %v4763_v10, %v4762_v44  ;;  %v3203_v32 = vpop.f32.mrf.mxu1  ;;  %v3351_v29 = vpop.f32.mrf.mxu0  ;;  %v3820_v44 = vunpack.c.h.bf16 %v8613_v56 }
 0x2f6   :  { %v3682_v5 = vadd.f32 %v3676_v55, %v3523_v20  ;;  %v3218_v12 = vmul.f32 %v3212_v25, %v3203_v32  ;;  %v3373_v22 = vmul.f32 %v3367_v42, %v3351_v29 }
 0x2f7   :  { %4874 = vrot.lane.b32.xlu1 %v8615_v28, %s7761_s10  ;;  %6940 = vmatmul.msk.bf16.vlgmr.msrb.gmra.mxu0 %vm3004_vm0, %v8615_v28  ;;  %s5021_s10 = sshll.u32 %s7762_s3, 4  ;;  %s5022_s10 = int_to_ptr.vmem [resolvable:$true] %s5021_s10 }
 0x2f8   :  { %v3224_v63 = vadd.f32 %v3218_v12, %v3071_v14  ;;  %6941 = vmatmul.msk.bf16.vlgmr.msra.gmra.mxu1 %vm3004_vm0, %v8615_v28  ;;  %6942 = vmatmul.msk.bf16.vlgmr.msra.gmra.mxu2 %vm3004_vm0, %v8615_v28 }
 0x2fa   :  { %v3379_v60 = vadd.f32 %v3373_v22, %v3224_v63  ;;  %v3655_v2 = vpop.f32.mrf.mxu2  ;;  %v8656_v21 = vpop.f32.mrf.mxu3  ;;  %v4910_v63 = vld [vmem:[#allocation17 + $0x70] sm:$0xff] }
 0x2fb   :  { %v3679_v8 = vmul.f32 %v3673_v0, %v3655_v2  ;;  %v4911_v0 = vld [vmem:[#allocation17 + $0x78] sm:$0xff]  ;;  %v4909_v2 = vld [vmem:[#allocation17 + $0x68] sm:$0xff] }
 0x2fc   :  { %v3526_v33 = vadd.f32 %v3520_v23, %v3379_v60  ;;  %4946 = vmatpush.msrb.mxu3 %v4911_v0  ;;  %v4926_v23 = vld [vmem:[#allocation17 + $0xf0] sm:$0xff] }
 0x2fd   :  { %v3475_v6 = vpop.f32.mrf.mxu1  ;;  %v3625_v7 = vpop.f32.mrf.mxu0  ;;  %4970 = vmatpush.msra.mxu0 %v4926_v23  ;;  %v4898_v0 = vld [vmem:[#allocation17 + $0x10] sm:$0xff] }
 0x2fe   :  { %v3685_v50 = vadd.f32 %v3679_v8, %v3526_v33  ;;  %v3515_v1 = vmul.f32 %v3511_v37, %v3475_v6  ;;  %v3674_v57 = vmul.f32 %v3670_v16, %v3625_v7  ;;  %4947 = vmatpush.msrb.mxu3 %v4910_v63  ;;  %v4908_v8 = vld [vmem:[#allocation17 + $0x60] sm:$0xff]  ;;  %v4907_v6 = vld [vmem:[#allocation17 + $0x58] sm:$0xff]  ;;  %v4933_v63 = vld [vmem:[#allocation17 + $0x128] sm:$0xff] }
 0x2ff   :  { %v4924_v33 = vld [vmem:[#allocation17 + $0xe0] sm:$0xff] }
 0x300   :  { %v3521_v17 = vadd.f32 %v3515_v1, %v8556_v54  ;;  %v3817_v54 = vunpack.c.l.bf16 %v8641_v38  ;;  %4948 = vmatpush.msrb.mxu3 %v4909_v2  ;;  %v4923_v1 = vld [vmem:[#allocation17 + $0xd8] sm:$0xff] }
 0x302   :  { %v8633_v3 = vadd.f32 %v3674_v57, %v3521_v17  ;;  %v8659_v53 = vpop.f32.mrf.mxu2  ;;  %v8666_v42 = vpop.f32.mrf.mxu3  ;;  %4949 = vmatpush.msrb.mxu3 %v4908_v8  ;;  %v4906_v57 = vld [vmem:[#allocation17 + $0x50] sm:$0xff]  ;;  %v4913_v8 = vld [vmem:[#allocation17 + $0x88] sm:$0xff] }
 0x303   :  { %v4922_v17 = vld [vmem:[#allocation17 + $0xd0] sm:$0xff] }
 0x304   :  { %4950 = vmatpush.msrb.mxu3 %v4907_v6  ;;  %v8713_v6 = vpop.permute.xlu1 %3965 }
 0x305   :  { %v3477_v51 = vpop.f32.mrf.mxu1  ;;  %v3627_v41 = vpop.f32.mrf.mxu0 }
 0x306   :  { %v3518_v39 = vmul.f32 %v3513_v9, %v3477_v51  ;;  %v3677_v27 = vmul.f32 %v3672_v31, %v3627_v41  ;;  %4951 = vmatpush.msrb.mxu3 %v4906_v57  ;;  %v4905_v41 = vld [vmem:[#allocation17 + $0x48] sm:$0xff]  ;;  %v4896_v57 = vld [vmem:[#allocation17] sm:$0xff] }
 0x308   :  { %v3524_v59 = vadd.f32 %v3518_v39, %v8554_v26  ;;  %v4921_v39 = vld [vmem:[#allocation17 + $0xc8] sm:$0xff]  ;;  %4952 = vmatpush.msrb.mxu3 %v4905_v41  ;;  %v4931_v41 = vld [vmem:[#allocation17 + $0x118] sm:$0xff] }
 0x30a   :  { %v8643_v37 = vadd.f32 %v3677_v27, %v3524_v59  ;;  %v8669_v10 = vpop.f32.mrf.mxu2  ;;  %v8675_v4 = vpop.f32.mrf.mxu3  ;;  %v4904_v27 = vld [vmem:[#allocation17 + $0x40] sm:$0xff] }
 0x30b   :  { %v4920_v59 = vld [vmem:[#allocation17 + $0xc0] sm:$0xff]  ;;  %4953 = vmatpush.msrb.mxu3 %v4904_v27  ;;  %v3970_v27 = vsel %vm3004_vm0, %v8422_v47, %v8713_v6 }
 0x30d   :  { %v3639_v61 = vpop.f32.mrf.mxu1  ;;  %v3795_v19 = vpop.f32.mrf.mxu0 }
 0x30e   :  { %v3675_v49 = vmul.f32 %v3670_v16, %v3639_v61  ;;  %v3822_v30 = vmul.f32 %v3817_v54, %v3795_v19  ;;  %v4925_v16 = vld [vmem:[#allocation17 + $0xe8] sm:$0xff]  ;;  %v4903_v61 = vld [vmem:[#allocation17 + $0x38] sm:$0xff] }
 0x30f   :  { %4971 = vmatpush.msra.mxu0 %v4925_v16  ;;  %v4919_v19 = vld [vmem:[#allocation17 + $0xb8] sm:$0xff]  ;;  %4954 = vmatpush.msrb.mxu3 %v4903_v61  ;;  %v4897_v16 = vld [vmem:[#allocation17 + $0x8] sm:$0xff] }
 0x310   :  { %v3681_v9 = vadd.f32 %v3675_v49, %v8596_v36  ;;  %v3818_v36 = vunpack.c.l.bf16 %v8613_v56  ;;  %v4902_v49 = vld [vmem:[#allocation17 + $0x30] sm:$0xff]  ;;  %v4929_v61 = vld [vmem:[#allocation17 + $0x108] sm:$0xff] }
 0x311   :  { %4972 = vmatpush.msra.mxu0 %v4924_v33  ;;  %4955 = vmatpush.msrb.mxu3 %v4902_v49  ;;  %v4932_v33 = vld [vmem:[#allocation17 + $0x120] sm:$0xff]  ;;  %v3972_v49 = vunpack.c.l.bf16 %v3970_v27 }
 0x312   :  { %v8651_v26 = vadd.f32 %v3822_v30, %v3681_v9  ;;  %v8677_v32 = vpop.f32.mrf.mxu2  ;;  %v8687_v56 = vpop.f32.mrf.mxu3 }
 0x313   :  { %4973 = vmatpush.msra.mxu0 %v4923_v1 }
 0x315   :  { %v3641_v15 = vpop.f32.mrf.mxu1  ;;  %v3797_v45 = vpop.f32.mrf.mxu0  ;;  %4974 = vmatpush.msra.mxu0 %v4922_v17  ;;  %v4912_v17 = vld [vmem:[#allocation17 + $0x80] sm:$0xff] }
 0x316   :  { %v3678_v52 = vmul.f32 %v3672_v31, %v3641_v15  ;;  %v3825_v46 = vmul.f32 %v3819_v48, %v3797_v45  ;;  %v4918_v15 = vld [vmem:[#allocation17 + $0xb0] sm:$0xff]  ;;  %v4901_v45 = vld [vmem:[#allocation17 + $0x28] sm:$0xff] }
 0x317   :  { %4975 = vmatpush.msra.mxu0 %v4921_v39  ;;  %4956 = vmatpush.msrb.mxu3 %v4901_v45  ;;  %v8728_v45 = vpop.permute.xlu0 %4271 }
 0x318   :  { %v3684_v40 = vadd.f32 %v3678_v52, %v8605_v62  ;;  %v4917_v52 = vld [vmem:[#allocation17 + $0xa8] sm:$0xff]  ;;  %v8756_v38 = vsel %vm3004_vm0, %v8728_v45, %v8480_v24 }
 0x319   :  { %4976 = vmatpush.msra.mxu0 %v4920_v59  ;;  %v4930_v59 = vld [vmem:[#allocation17 + $0x110] sm:$0xff] }
 0x31a   :  { %v8661_v43 = vadd.f32 %v3825_v46, %v3684_v40  ;;  %v8685_v12 = vpop.f32.mrf.mxu2  ;;  %v4935_v46 = vld [vmem:[#allocation17 + $0x138] sm:$0xff]  ;;  %v4934_v40 = vld [vmem:[#allocation17 + $0x130] sm:$0xff] }
 0x31b   :  { %4977 = vmatpush.msra.mxu0 %v4919_v19  ;;  %5000 = vmatpush.msrb.mxu1 %v4935_v46  ;;  %v3821_v19 = vmul.f32 %v3817_v54, %v8646_v13  ;;  %v8736_v54 = vsel %vm3004_vm0, %v8480_v24, %v8728_v45 }
 0x31d   :  { %v3809_v11 = vpop.f32.mrf.mxu1  ;;  %v8671_v20 = vpop.f32.mrf.mxu0  ;;  %4978 = vmatpush.msra.mxu0 %v4918_v15  ;;  %5001 = vmatpush.msrb.mxu1 %v4934_v40  ;;  %v4117_v15 = vsel %vm3004_vm0, %v8713_v6, %v8422_v47  ;;  %v3827_v13 = vadd.f32 %v3821_v19, %v8633_v3 }
 0x31e   :  { %v3823_v18 = vmul.f32 %v3818_v36, %v3809_v11  ;;  %v4900_v11 = vld [vmem:[#allocation17 + $0x20] sm:$0xff] }
 0x31f   :  { %4979 = vmatpush.msra.mxu0 %v4917_v52  ;;  %4957 = vmatpush.msrb.mxu3 %v4900_v11  ;;  %v4928_v52 = vld [vmem:[#allocation17 + $0x100] sm:$0xff]  ;;  %v3974_v11 = vunpack.c.h.bf16 %v3970_v27  ;;  %v4279_v27 = vunpack.c.l.bf16 %v8480_v24 }
 0x320   :  { %v8664_v25 = vadd.f32 %v3823_v18, %v3682_v5  ;;  %v4916_v18 = vld [vmem:[#allocation17 + $0xa0] sm:$0xff]  ;;  %5002 = vmatpush.msrb.mxu1 %v4933_v63 }
 0x321   :  { %4980 = vmatpush.msra.mxu0 %v4916_v18  ;;  %v3977_v18 = vmul.f32 %v3972_v49, %v8666_v42 }
 0x322   :  { %v8693_v7 = vpop.f32.mrf.mxu2  ;;  %5003 = vmatpush.msrb.mxu1 %v4932_v33 }
 0x324   :  { %5004 = vmatpush.msrb.mxu1 %v4931_v41  ;;  %v4121_v41 = vunpack.c.h.bf16 %v4117_v15 }
 0x325   :  { %v3811_v55 = vpop.f32.mrf.mxu1  ;;  %v8681_v14 = vpop.f32.mrf.mxu0 }
 0x326   :  { %v3826_v62 = vmul.f32 %v3820_v44, %v3811_v55  ;;  %v4899_v55 = vld [vmem:[#allocation17 + $0x18] sm:$0xff]  ;;  %5005 = vmatpush.msrb.mxu1 %v4930_v59  ;;  %v3975_v59 = vunpack.c.h.bf16 %v8422_v47 }
 0x327   :  { %4958 = vmatpush.msrb.mxu3 %v4899_v55  ;;  %v4119_v55 = vunpack.c.l.bf16 %v4117_v15  ;;  %v4281_v15 = vunpack.c.h.bf16 %v8480_v24 }
 0x328   :  { %v8673_v58 = vadd.f32 %v3826_v62, %v3685_v50  ;;  %v8695_v50 = vpop.f32.mrf.mxu3  ;;  %v4915_v62 = vld [vmem:[#allocation17 + $0x98] sm:$0xff]  ;;  %5006 = vmatpush.msrb.mxu1 %v4929_v61 }
 0x329   :  { %4981 = vmatpush.msra.mxu0 %v4915_v62  ;;  %4959 = vmatpush.msrb.mxu3 %v4898_v0  ;;  %v3976_v62 = vmul.f32 %v3972_v49, %v8659_v53  ;;  %v3824_v0 = vmul.f32 %v3819_v48, %v8656_v21  ;;  %v4124_v3 = vmul.f32 %v4119_v55, %v8677_v32  ;;  %v4120_v53 = vunpack.c.l.bf16 %v8713_v6 }
 0x32a   :  { %v8701_v30 = vpop.f32.mrf.mxu2  ;;  %5007 = vmatpush.msrb.mxu1 %v4928_v52  ;;  %v4122_v49 = vunpack.c.h.bf16 %v8713_v6 }
 0x32b   :  { %4982 = vmatpush.msra.mxu0 %v4914_v35  ;;  %4960 = vmatpush.msrb.mxu3 %v4897_v16  ;;  %v3973_v35 = vunpack.c.l.bf16 %v8422_v47  ;;  %v4278_v16 = vunpack.c.l.bf16 %v8736_v54  ;;  %v3982_v48 = vadd.f32 %v3976_v62, %v3827_v13  ;;  %v3830_v21 = vadd.f32 %v3824_v0, %v8643_v37 }
 0x32c   :  { %v4425_v37 = vunpack.c.l.bf16 %v8756_v38  ;;  %v4427_v62 = vunpack.c.h.bf16 %v8756_v38 }
 0x32d   :  { %v8679_v29 = vpop.f32.mrf.mxu1  ;;  %v8689_v22 = vpop.f32.mrf.mxu0  ;;  %4983 = vmatpush.msra.mxu0 %v4913_v8  ;;  %4961 = vmatpush.msrb.mxu3 %v4896_v57  ;;  %v3983_v57 = vadd.f32 %v3977_v18, %v8651_v26 }
 0x32e   :  { %v4123_v42 = vmul.f32 %v4119_v55, %v8679_v29  ;;  %v8748_v8 = vpop.permute.xlu2 %4573  ;;  %v3979_v29 = vmul.f32 %v3974_v11, %v8669_v10  ;;  %v4282_v19 = vmul.f32 %v4278_v16, %v8689_v22  ;;  %v4125_v55 = vmul.f32 %v4120_v53, %v8687_v56 }
 0x32f   :  { %4984 = vmatpush.msra.mxu0 %v4912_v17  ;;  %v3978_v17 = vmul.f32 %v3973_v35, %v8671_v20  ;;  %v8765_v26 = vsel %vm3004_vm0, %v8544_v34, %v8748_v8  ;;  %v4130_v10 = vadd.f32 %v4124_v3, %v3983_v57  ;;  %v3980_v20 = vmul.f32 %v3974_v11, %v8675_v4 }
 0x330   :  { %v8703_v9 = vpop.f32.mrf.mxu3  ;;  %v4129_v61 = vadd.f32 %v4123_v42, %v3982_v48  ;;  %v3985_v52 = vadd.f32 %v3979_v29, %v3830_v21  ;;  %v4280_v22 = vunpack.c.h.bf16 %v8736_v54  ;;  %v4127_v35 = vmul.f32 %v4121_v41, %v8685_v12 }
 0x331   :  { %v3984_v18 = vadd.f32 %v3978_v17, %v8664_v25  ;;  %v4429_v6 = vmul.f32 %v4425_v37, %v8703_v9  ;;  %v8785_v25 = vsel %vm3004_vm0, %v8748_v8, %v8544_v34  ;;  %v3986_v56 = vadd.f32 %v3980_v20, %v8661_v43 }
 0x332   :  { %v8709_v23 = vpop.f32.mrf.mxu2  ;;  %v4288_v11 = vadd.f32 %v4282_v19, %v4129_v61  ;;  %v4128_v54 = vmul.f32 %v4122_v49, %v8695_v50  ;;  %v4426_v42 = vunpack.c.l.bf16 %v8728_v45  ;;  %v4284_v9 = vmul.f32 %v4279_v27, %v8693_v7 }
 0x333   :  { %v4582_v57 = vunpack.c.h.bf16 %v8765_v26  ;;  %v4727_v43 = vunpack.c.l.bf16 %v8785_v25 }
 0x334   :  { %v4435_v50 = vadd.f32 %v4429_v6, %v4288_v11 }
 0x335   :  { %v8683_v5 = vpop.f32.mrf.mxu1  ;;  %v8697_v31 = vpop.f32.mrf.mxu0 }
 0x336   :  { %v4126_v24 = vmul.f32 %v4121_v41, %v8683_v5  ;;  %v3981_v5 = vmul.f32 %v3975_v59, %v8681_v14  ;;  %v4285_v17 = vmul.f32 %v4280_v22, %v8697_v31  ;;  %v4133_v41 = vadd.f32 %v4127_v35, %v3986_v56 }
 0x337   :  { %v4581_v14 = vunpack.c.l.bf16 %v8544_v34 }
 0x338   :  { %v8711_v2 = vpop.f32.mrf.mxu3  ;;  %v4132_v29 = vadd.f32 %v4126_v24, %v3985_v52 }
 0x33a   :  { %v8730_v46 = vpop.f32.mrf.mxu2 }
 0x33b   :  { %v4587_v11 = vmul.f32 %v4582_v57, %v8730_v46 }
 0x33d   :  { %v8691_v60 = vpop.f32.mrf.mxu1  ;;  %v8705_v36 = vpop.f32.mrf.mxu0 }
 0x33e   :  { %v4283_v32 = vmul.f32 %v4278_v16, %v8691_v60  ;;  %v4580_v60 = vunpack.c.l.bf16 %v8765_v26  ;;  %v4430_v4 = vmul.f32 %v4425_v37, %v8705_v36  ;;  %v4131_v36 = vadd.f32 %v4125_v55, %v3984_v18 }
 0x33f   :  { %v4291_v37 = vadd.f32 %v4285_v17, %v4132_v29  ;;  %v4729_v55 = vunpack.c.h.bf16 %v8785_v25 }
 0x340   :  { %v4551_v40 = vpop.f32.mrf.mxu3  ;;  %v4289_v0 = vadd.f32 %v4283_v32, %v4130_v10  ;;  %v4584_v21 = vmul.f32 %v4580_v60, %v8709_v23  ;;  %v4290_v26 = vadd.f32 %v4284_v9, %v4131_v36  ;;  %v4287_v32 = vmul.f32 %v4281_v15, %v8701_v30 }
 0x341   :  { %v4585_v48 = vmul.f32 %v4580_v60, %v4551_v40  ;;  %v3987_v40 = vadd.f32 %v3981_v5, %v8673_v58  ;;  %v4728_v58 = vunpack.c.l.bf16 %v8748_v8  ;;  %v4428_v30 = vunpack.c.h.bf16 %v8728_v45 }
 0x342   :  { %v4705_v47 = vpop.f32.mrf.mxu2  ;;  %v4436_v38 = vadd.f32 %v4430_v4, %v4289_v0  ;;  %v4590_v31 = vadd.f32 %v4584_v21, %v4435_v50  ;;  %v4730_v5 = vunpack.c.h.bf16 %v8748_v8  ;;  %v4883_v8 = vunpack.c.h.bf16 %v8615_v28 }
 0x343   :  { %v4732_v61 = vmul.f32 %v4727_v43, %v4705_v47  ;;  %v4134_v15 = vadd.f32 %v4128_v54, %v3987_v40 }
 0x344   :  { %v4591_v59 = vadd.f32 %v4585_v48, %v4436_v38 }
 0x345   :  { %v8699_v51 = vpop.f32.mrf.mxu1  ;;  %v8715_v1 = vpop.f32.mrf.mxu0  ;;  %v4293_v25 = vadd.f32 %v4287_v32, %v4134_v15 }
 0x346   :  { %v4286_v12 = vmul.f32 %v4280_v22, %v8699_v51  ;;  %v4433_v19 = vmul.f32 %v4427_v62, %v8715_v1  ;;  %v4738_v22 = vadd.f32 %v4732_v61, %v4591_v59 }
 0x348   :  { %v4553_v13 = vpop.f32.mrf.mxu3  ;;  %v4292_v23 = vadd.f32 %v4286_v12, %v4133_v41 }
 0x34a   :  { %v4707_v10 = vpop.f32.mrf.mxu2  ;;  %v4439_v0 = vadd.f32 %v4433_v19, %v4292_v23 }
 0x34b   :  { %v4735_v36 = vmul.f32 %v4729_v55, %v4707_v10 }
 0x34d   :  { %v8707_v44 = vpop.f32.mrf.mxu1  ;;  %v8744_v63 = vpop.f32.mrf.mxu0 }
 0x34e   :  { %v4431_v7 = vmul.f32 %v4426_v42, %v8707_v44  ;;  %v4432_v44 = vmul.f32 %v4427_v62, %v8711_v2  ;;  %v4586_v18 = vmul.f32 %v4581_v14, %v8744_v63  ;;  %v4588_v2 = vmul.f32 %v4582_v57, %v4553_v13 }
 0x34f   :  { %v4583_v63 = vunpack.c.h.bf16 %v8544_v34  ;;  %v4881_v13 = vunpack.c.l.bf16 %v8615_v28 }
 0x350   :  { %v4719_v20 = vpop.f32.mrf.mxu3  ;;  %v4437_v52 = vadd.f32 %v4431_v7, %v4290_v26  ;;  %v4438_v4 = vadd.f32 %v4432_v44, %v4291_v37  ;;  %v4594_v42 = vadd.f32 %v4588_v2, %v4439_v0 }
 0x351   :  { %v4733_v56 = vmul.f32 %v4728_v58, %v4719_v20 }
 0x352   :  { %v4592_v24 = vadd.f32 %v4586_v18, %v4437_v52  ;;  %v4593_v9 = vadd.f32 %v4587_v11, %v4438_v4  ;;  %v4741_v21 = vadd.f32 %v4735_v36, %v4594_v42 }
 0x354   :  { %v4739_v34 = vadd.f32 %v4733_v56, %v4592_v24 }
 0x355   :  { %v8717_v39 = vpop.f32.mrf.mxu1  ;;  %v8791_v16 = vpop.f32.mrf.mxu0 }
 0x356   :  { %v4434_v45 = vmul.f32 %v4428_v30, %v8717_v39  ;;  %v4589_v38 = vmul.f32 %v4583_v63, %v8791_v16 }
 0x35d   :  { %v4691_v33 = vpop.f32.mrf.mxu1 }
 0x35e   :  { %v4731_v51 = vmul.f32 %v4727_v43, %v4691_v33  ;;  %v4721_v43 = vpop.f32.mrf.mxu3 }
 0x35f   :  { %v4736_v14 = vmul.f32 %v4730_v5, %v4721_v43 }
 0x360   :  { %v4737_v60 = vadd.f32 %v4731_v51, %v4590_v31  ;;  %v7429_v51 = vld [vmem:[#allocation15] ss:$0 sm:$0xff] }
 0x365   :  { %v4693_v3 = vpop.f32.mrf.mxu1 }
 0x366   :  { %v4734_v54 = vmul.f32 %v4729_v55, %v4693_v3 }
 0x368   :  { %v4740_v3 = vadd.f32 %v4734_v54, %v4593_v9 }
 0x369   :  { %v4875_v53 = vpop.permute.xlu1 %4874 }
 0x36a   :  { %v4878_v27 = vsel %vm3004_vm0, %v8615_v28, %v4875_v53  ;;  %v4440_v53 = vadd.f32 %v4434_v45, %v4293_v25 }
 0x36b   :  { %v4880_v49 = vunpack.c.l.bf16 %v4878_v27  ;;  %v4882_v57 = vunpack.c.h.bf16 %v4878_v27 }
 0x36c   :  { %v4595_v7 = vadd.f32 %v4589_v38, %v4440_v53 }
 0x36e   :  { %v4742_v27 = vadd.f32 %v4736_v14, %v4595_v7 }
 0x374   :  { %v4841_v33 = vpop.f32.mrf.mxu0 }
 0x375   :  { %v4884_v1 = vmul.f32 %v4880_v49, %v4841_v33  ;;  %v4855_v47 = vpop.f32.mrf.mxu1 }
 0x376   :  { %v4885_v62 = vmul.f32 %v4880_v49, %v4855_v47 }
 0x377   :  { %v4890_v6 = vadd.f32 %v4884_v1, %v4737_v60 }
 0x378   :  { %v4891_v35 = vadd.f32 %v4885_v62, %v4738_v22 }
 0x379   :  { %4962 = vmatmul.f32.vlgmr.msrb.gmra.mxu3 %v4890_v6 }
 0x37a   :  { %4985 = vmatmul.f32.vlgmr.msra.gmra.mxu0 %v4891_v35 }
 0x37b   :  { %v4869_v46 = vpop.f32.mrf.mxu2 }
 0x37c   :  { %v4886_v48 = vmul.f32 %v4881_v13, %v4869_v46  ;;  %v4843_v39 = vpop.f32.mrf.mxu0 }
 0x37d   :  { %v4887_v12 = vmul.f32 %v4882_v57, %v4843_v39  ;;  %v4857_v50 = vpop.f32.mrf.mxu1 }
 0x37e   :  { %v4892_v29 = vadd.f32 %v4886_v48, %v4739_v34  ;;  %v4888_v17 = vmul.f32 %v4882_v57, %v4857_v50 }
 0x37f   :  { %v4893_v41 = vadd.f32 %v4887_v12, %v4740_v3 }
 0x380   :  { %v4894_v26 = vadd.f32 %v4888_v17, %v4741_v21  ;;  %6943 = vmatmul.msk.f32.vlgmr.msrb.gmra.mxu1 %vm3004_vm0, %v4892_v29 }
 0x381   :  { %4965 = vmatmul.f32.gmra.mxu3 %v4893_v41 }
 0x382   :  { %4988 = vmatmul.f32.gmra.mxu0 %v4894_v26 }
 0x383   :  { %v4871_v16 = vpop.f32.mrf.mxu2 }
 0x384   :  { %v4889_v40 = vmul.f32 %v4883_v8, %v4871_v16 }
 0x386   :  { %v4895_v32 = vadd.f32 %v4889_v40, %v4742_v27 }
 0x388   :  { %6944 = vmatmul.msk.f32.gmra.mxu1 %vm3004_vm0, %v4895_v32 }
 0x3f7   :  { %v4986_v59 = vpop.f32.mrf.mxu0 }
 0x3fc   :  { %v4963_v61 = vpop.f32.mrf.mxu3 }
 0x3fd   :  { %v4964_v23 = vadd.f32 %v7429_v51, %v4963_v61  ;;  %v5009_v19 = vpop.f32.mrf.mxu1 }
 0x3ff   :  { %v4987_v31 = vadd.f32 %v4986_v59, %v4964_v23  ;;  %v4989_v20 = vpop.f32.mrf.mxu0 }
 0x401   :  { %v5010_v37 = vadd.f32 %v5009_v19, %v4987_v31 }
 0x403   :  { %5015 = vst [vmem:[#allocation18] sm:$0xff] %v5010_v37 }
 0x404   :  { %v4966_v44 = vpop.f32.mrf.mxu3 }
 0x405   :  { %v4967_v10 = vadd.f32 %v7429_v51, %v4966_v44  ;;  %v5012_v49 = vpop.f32.mrf.mxu1 }
 0x407   :  { %v4990_v28 = vadd.f32 %v4989_v20, %v4967_v10 }
 0x409   :  { %v5013_v52 = vadd.f32 %v5012_v49, %v4990_v28 }
 0x40b   :  { %5016 = vst [vmem:[#allocation18 + $0x8] sm:$0xff] %v5013_v52 }
 0x40c   :  { %5029 = dma.vmem_to_hbm [thread:$0]  %s5022_s10, 256, %s5024_s0, [#allocation5], %s7759_s8, %s7759_s8, %s7760_s19  }
 0x40d   :  { %7744 = dma.done.wait [#allocation5], 256  }
 0x40e   :  { %7745 = vsyncadd [#allocation5], 4294967040 }
 0x40f   :  { %5034 = vsyncpa [#allocation4], 1 }
 0x410   :  { %5035 = vsyncpa [#allocation7], 1 }
 0x411   :  { %5036 = vsyncpa [#allocation10], 1 }
 0x412   :  { %5037 = vsyncpa [#allocation13], 1 }
 0x413   :  { %5038 = vsyncpa [#allocation16], 1 }
 0x414   :  { %5039 = vsyncpa [#allocation5], 1 }

</bundles_post_ra>
